<compile_context>
chip_gen: v6e
topology: v6e:2x2x1
jax: 0.10.0
libtpu: 0.0.40
codegen_flags: <defaults>
</compile_context>

<pallas_src>
import numpy as np

import jax
import jax.numpy as jnp
from jax.experimental import pallas as pl
from jax.experimental.pallas import tpu as pltpu


# ----------------------------------------------------------------------------
# Host-side mask / gather-index construction (straight port of Pyraformer).
# ----------------------------------------------------------------------------
def get_mask(input_size, window_size, inner_size):
    all_size = [input_size]
    for w in window_size:
        all_size.append(all_size[-1] // w)
    L = sum(all_size)
    mask = np.zeros((L, L), dtype=np.float32)

    inner_window = inner_size // 2
    for layer_idx in range(len(all_size)):
        start = sum(all_size[:layer_idx])
        for i in range(start, start + all_size[layer_idx]):
            left = max(i - inner_window, start)
            right = min(i + inner_window + 1, start + all_size[layer_idx])
            mask[i, left:right] = 1

    for layer_idx in range(1, len(all_size)):
        start = sum(all_size[:layer_idx])
        for i in range(start, start + all_size[layer_idx]):
            left = (start - all_size[layer_idx - 1]) + (i - start) * window_size[layer_idx - 1]
            if i == (start + all_size[layer_idx] - 1):
                right = start
            else:
                right = (start - all_size[layer_idx - 1]) + (i - start + 1) * window_size[layer_idx - 1]
            mask[i, left:right] = 1
            mask[left:right, i] = 1

    blocked = (1.0 - mask).astype(np.float32)  # 1.0 where attention is NOT allowed
    return blocked, all_size


def refer_points(all_sizes, window_size):
    input_size = all_sizes[0]
    indexes = np.zeros((input_size, len(all_sizes)), dtype=np.int32)
    for i in range(input_size):
        indexes[i, 0] = i
        former = i
        for j in range(1, len(all_sizes)):
            start = sum(all_sizes[:j])
            inner_idx = former - (start - all_sizes[j - 1])
            former = start + min(inner_idx // window_size[j - 1], all_sizes[j] - 1)
            indexes[i, j] = former
    return indexes  # (input_size, n_levels)


def build_static(cfg):
    """Mask bias, conv window selectors, pyramid row-placement, gather one-hots."""
    blocked, all_size = get_mask(cfg["seq_len"], cfg["window_size"], cfg["inner_size"])
    indexes = refer_points(all_size, cfg["window_size"])
    mask_bias = (blocked * -1e9).astype(np.float32)            # additive bias

    D = cfg["d_model"]
    L = sum(all_size)
    n_lev = len(all_size)

    # conv window selection: sel[l][k] @ cur  == cur[k::wsz]  (exact one-hot).
    # bf16 is exact here because the other matmul operand is already bf16.
    sels = []
    T = cfg["seq_len"]
    for w in cfg["window_size"]:
        To = T // w
        sel = np.zeros((w, To, T), dtype=np.float32)
        for k in range(w):
            sel[k, np.arange(To), np.arange(To) * w + k] = 1.0
        sels.append(jnp.asarray(sel, dtype=jnp.bfloat16))
        T = To

    # pyramid row placement: enc = sum_l places[l] @ level_l   (one-hot rows)
    places = []
    off = 0
    for sz in all_size:
        P = np.zeros((L, sz), dtype=np.float32)
        P[off:off + sz, :] = np.eye(sz, dtype=np.float32)
        places.append(jnp.asarray(P))
        off += sz

    # final pyramid gather: gth[j] @ seq_enc == seq_enc[indexes[:, j], :]
    gth = np.zeros((n_lev, all_size[0], L), dtype=np.float32)
    for i in range(all_size[0]):
        for j in range(n_lev):
            gth[j, i, indexes[i, j]] = 1.0

    # lane placement: (gth[j] @ seq_enc) @ out_place[j] puts level j at lanes j*D:(j+1)*D
    out_place = np.zeros((n_lev, D, n_lev * D), dtype=np.float32)
    for j in range(n_lev):
        out_place[j, :, j * D:(j + 1) * D] = np.eye(D, dtype=np.float32)

    return dict(mask_bias=jnp.asarray(mask_bias), all_size=all_size,
                sels=sels, places=places, gth=jnp.asarray(gth),
                out_place=jnp.asarray(out_place))


# ----------------------------------------------------------------------------
# Parameters: deterministic synthetic init (PyTorch-like layout), then a
# host-side prep that folds scales/BN, splits heads, stacks layers, casts bf16.
# ----------------------------------------------------------------------------
def init_params(key, cfg):
    D, E, S = cfg["d_model"], cfg["enc_in"], cfg["seq_len"]
    dk, dv, H = cfg["d_k"], cfg["d_v"], cfg["n_heads"]
    dff = cfg["d_inner_hid"]
    dbn = cfg["d_k"]  # Bottleneck_Construct inner dim == d_k
    ks = iter(jax.random.split(key, 64))

    def w(shape, scale=0.05):
        return (scale * jax.random.normal(next(ks), shape)).astype(jnp.float32)

    params = dict(
        emb_w=w((E, D)), emb_b=jnp.zeros((1, D), jnp.float32), pos_emb=w((S, D)),
        down_w=w((D, dbn)), down_b=jnp.zeros((1, dbn), jnp.float32),
        up_w=w((dbn, D)), up_b=jnp.zeros((1, D), jnp.float32),
        bc_ln_g=jnp.ones((1, D), jnp.float32), bc_ln_b=jnp.zeros((1, D), jnp.float32),
        conv=[], layers=[],
    )
    for wsz in cfg["window_size"]:
        params["conv"].append(dict(
            w=w((wsz * dbn, dbn)), b=jnp.zeros((1, dbn), jnp.float32),
            bn_g=jnp.ones((1, dbn), jnp.float32), bn_b=jnp.zeros((1, dbn), jnp.float32),
            bn_mu=jnp.zeros((1, dbn), jnp.float32), bn_var=jnp.ones((1, dbn), jnp.float32),
        ))
    for _ in range(cfg["n_layer"]):
        params["layers"].append(dict(
            wq=w((D, H * dk)), wk=w((D, H * dk)), wv=w((D, H * dv)),
            fc_w=w((H * dv, D)), fc_b=jnp.zeros((1, D), jnp.float32),
            ln1_g=jnp.ones((1, D), jnp.float32), ln1_b=jnp.zeros((1, D), jnp.float32),
            w1=w((D, dff)), b1=jnp.zeros((1, dff), jnp.float32),
            w2=w((dff, D)), b2=jnp.zeros((1, D), jnp.float32),
            ln2_g=jnp.ones((1, D), jnp.float32), ln2_b=jnp.zeros((1, D), jnp.float32),
        ))
    return params


def prepare_params(params, cfg):
    D, H = cfg["d_model"], cfg["n_heads"]
    dk, dv = cfg["d_k"], cfg["d_v"]
    dbn = cfg["d_k"]
    bf16 = jnp.bfloat16

    p = dict(
        emb_w=params["emb_w"].astype(bf16),
        emb_pos=(params["pos_emb"] + params["emb_b"]).astype(jnp.float32),
        down_w=params["down_w"].astype(bf16), down_b=params["down_b"],
        up_w=params["up_w"].astype(bf16), up_b=params["up_b"],
        bc_ln_g=params["bc_ln_g"], bc_ln_b=params["bc_ln_b"],
    )

    # Fold eval-mode BatchNorm1d into the conv weight/bias; split per window pos.
    conv_w, conv_b = [], []
    for cp, wsz in zip(params["conv"], cfg["window_size"]):
        s = cp["bn_g"] * jax.lax.rsqrt(cp["bn_var"] + 1e-5)          # (1, dbn)
        t = cp["bn_b"] - cp["bn_mu"] * s
        wf = cp["w"] * s                                             # (wsz*dbn, dbn)
        bf = cp["b"] * s + t
        conv_w.append(wf.reshape(wsz, dbn, dbn).astype(bf16))
        conv_b.append(bf.astype(jnp.float32))
    p["conv_w"], p["conv_b"] = conv_w, conv_b

    # Encoder layers: fold 1/sqrt(dk) into wq, split heads, stack over layers.
    scale = 1.0 / float(dk) ** 0.5
    Ls = params["layers"]
    p["wq"] = jnp.stack([(lp["wq"] * scale).reshape(D, H, dk).transpose(1, 0, 2)
                         for lp in Ls]).astype(bf16)                  # (nl,H,D,dk)
    p["wk"] = jnp.stack([lp["wk"].reshape(D, H, dk).transpose(1, 0, 2)
                         for lp in Ls]).astype(bf16)                  # (nl,H,D,dk)
    p["wv"] = jnp.stack([lp["wv"].reshape(D, H, dv).transpose(1, 0, 2)
                         for lp in Ls]).astype(bf16)                  # (nl,H,D,dv)
    p["fc_w"] = jnp.stack([lp["fc_w"].reshape(H, dv, D) for lp in Ls]).astype(bf16)
    p["fc_b"] = jnp.stack([lp["fc_b"] for lp in Ls])                  # (nl,1,D)
    p["ln1_g"] = jnp.stack([lp["ln1_g"] for lp in Ls])
    p["ln1_b"] = jnp.stack([lp["ln1_b"] for lp in Ls])
    p["w1"] = jnp.stack([lp["w1"] for lp in Ls]).astype(bf16)         # (nl,D,dff)
    p["b1"] = jnp.stack([lp["b1"] for lp in Ls])
    p["w2"] = jnp.stack([lp["w2"] for lp in Ls]).astype(bf16)         # (nl,dff,D)
    p["b2"] = jnp.stack([lp["b2"] for lp in Ls])
    p["ln2_g"] = jnp.stack([lp["ln2_g"] for lp in Ls])
    p["ln2_b"] = jnp.stack([lp["ln2_b"] for lp in Ls])
    return p


# ----------------------------------------------------------------------------
# Fused forward: one pallas_call, grid over batch (parallel -> megacore split).
# ----------------------------------------------------------------------------
def encoder_forward(x, prep, static, cfg):
    B, S, E = x.shape
    D = cfg["d_model"]
    H = cfg["n_heads"]
    n_layer = cfg["n_layer"]
    window_size = cfg["window_size"]
    n_conv = len(window_size)
    all_size = static["all_size"]
    n_lev = len(all_size)
    L = sum(all_size)
    f32, bf16 = jnp.float32, jnp.bfloat16

    def kernel(x_ref, maskb_ref, embw_ref, embpos_ref, downw_ref, downb_ref,
               upw_ref, upb_ref, bclng_ref, bclnb_ref,
               wq_ref, wk_ref, wv_ref, fcw_ref, fcb_ref,
               ln1g_ref, ln1b_ref, w1_ref, b1_ref, w2_ref, b2_ref,
               ln2g_ref, ln2b_ref, gth_ref, oplace_ref, place0_ref, *rest):
        conv_refs = rest[:4 * n_conv]        # per level: (conv_w, conv_b, sel, place)
        o_ref = rest[4 * n_conv]

        def layer_norm(v, g, b, eps):
            mu = jnp.mean(v, axis=-1, keepdims=True)
            var = jnp.mean((v - mu) ** 2, axis=-1, keepdims=True)
            return (v - mu) * jax.lax.rsqrt(var + eps) * g + b

        # ---- embedding (Linear + positional) ----------------------------
        xb = x_ref[0].astype(bf16)                                   # (S, E)
        seq = jnp.dot(xb, embw_ref[...], preferred_element_type=f32) + embpos_ref[...]

        # ---- Bottleneck_Construct: down -> conv pyramid -> up ------------
        cur = jnp.dot(seq.astype(bf16), downw_ref[...],
                      preferred_element_type=f32) + downb_ref[...]   # (S, dbn)
        # rows 0..S-1 of the pyramid: the embedding output itself
        enc = jnp.dot(place0_ref[...], seq, preferred_element_type=f32)   # (L, D)
        for l, wsz in enumerate(window_size):
            cw_ref, cb_ref, sel_ref, pl_ref = conv_refs[4 * l:4 * l + 4]
            cur_b = cur.astype(bf16)
            acc = None
            for k in range(wsz):
                # gather strided rows first (bf16 one-hot, exact), then project
                win = jnp.dot(sel_ref[k], cur_b, preferred_element_type=f32)   # (To, dbn)
                term = jnp.dot(win.astype(bf16), cw_ref[k], preferred_element_type=f32)
                acc = term if acc is None else acc + term
            y = acc + cb_ref[...]                                    # BN folded
            y = jnp.where(y > 0, y, jnp.exp(jnp.minimum(y, 0.0)) - 1.0)   # ELU
            up = jnp.dot(y.astype(bf16), upw_ref[...],
                         preferred_element_type=f32) + upb_ref[...]
            enc = enc + jnp.dot(pl_ref[...], up, preferred_element_type=f32)
            cur = y

        seq_enc = layer_norm(enc, bclng_ref[...], bclnb_ref[...], 1e-5)

        # ---- Encoder layers (post-LN MHA + FFN) --------------------------
        mask_bias = maskb_ref[...]                                   # (L, L) f32
        for l in range(n_layer):
            resid = seq_enc
            sb = seq_enc.astype(bf16)
            attn = None
            for h in range(H):
                q = jnp.dot(sb, wq_ref[l, h], preferred_element_type=f32)  # scale folded
                kk = jnp.dot(sb, wk_ref[l, h], preferred_element_type=f32)
                v = jnp.dot(sb, wv_ref[l, h], preferred_element_type=f32)
                s = jax.lax.dot_general(q.astype(bf16), kk.astype(bf16),
                                        (((1,), (1,)), ((), ())),
                                        preferred_element_type=f32) + mask_bias
                s = s - jnp.max(s, axis=-1, keepdims=True)
                pexp = jnp.exp(s)
                pexp = pexp * pl.reciprocal(jnp.sum(pexp, axis=-1, keepdims=True),
                                            approx=True)
                oh = jnp.dot(pexp.astype(bf16), v.astype(bf16),
                             preferred_element_type=f32)             # (L, dv)
                term = jnp.dot(oh.astype(bf16), fcw_ref[l, h],
                               preferred_element_type=f32)
                attn = term if attn is None else attn + term
            out = attn + fcb_ref[l] + resid
            out = layer_norm(out, ln1g_ref[l], ln1b_ref[l], 1e-6)

            resid2 = out
            h1 = jnp.dot(out.astype(bf16), w1_ref[l],
                         preferred_element_type=f32) + b1_ref[l]
            h1 = 0.5 * h1 * (1.0 + jax.lax.erf(h1 * 0.7071067811865476))  # exact GELU
            h2 = jnp.dot(h1.astype(bf16), w2_ref[l],
                         preferred_element_type=f32) + b2_ref[l]
            seq_enc = layer_norm(h2 + resid2, ln2g_ref[l], ln2b_ref[l], 1e-6)

        # ---- final pyramid gather -> ONE lane-dense (S, n_lev*D) store ----
        full = None
        for j in range(n_lev):
            g = jnp.dot(gth_ref[j], seq_enc, preferred_element_type=f32)    # (S, D)
            term = jnp.dot(g, oplace_ref[j], preferred_element_type=f32)    # (S, n_lev*D)
            full = term if full is None else full + term
        o_ref[0] = full

    # ----- inputs (order must match kernel signature) ----------------------
    inputs = [x, static["mask_bias"], prep["emb_w"], prep["emb_pos"],
              prep["down_w"], prep["down_b"], prep["up_w"], prep["up_b"],
              prep["bc_ln_g"], prep["bc_ln_b"],
              prep["wq"], prep["wk"], prep["wv"], prep["fc_w"], prep["fc_b"],
              prep["ln1_g"], prep["ln1_b"], prep["w1"], prep["b1"],
              prep["w2"], prep["b2"], prep["ln2_g"], prep["ln2_b"],
              static["gth"], static["out_place"], static["places"][0]]
    for l in range(n_conv):
        inputs += [prep["conv_w"][l], prep["conv_b"][l], static["sels"][l],
                   static["places"][l + 1]]

    def full_spec(a):
        nd = a.ndim
        return pl.BlockSpec(a.shape, lambda b, _n=nd: (0,) * _n)

    in_specs = [pl.BlockSpec((1, S, E), lambda b: (b, 0, 0))]
    in_specs += [full_spec(a) for a in inputs[1:]]
    out_specs = pl.BlockSpec((1, S, n_lev * D), lambda b: (b, 0, 0))

    fwd = pl.pallas_call(
        kernel,
        out_shape=jax.ShapeDtypeStruct((B, S, n_lev * D), jnp.float32),
        grid=(B,),
        in_specs=in_specs,
        out_specs=out_specs,
        compiler_params=pltpu.CompilerParams(dimension_semantics=("parallel",)),
    )
    return fwd(*inputs)


if __name__ == "__main__":
    cfg = dict(seq_len=16, enc_in=4, d_model=32, d_inner_hid=64,
               n_heads=2, d_k=16, d_v=16, n_layer=2,
               window_size=[2, 2], inner_size=3)

    static = build_static(cfg)

    key = jax.random.PRNGKey(0)
    kp, kx = jax.random.split(key)
    raw_params = init_params(kp, cfg)
    prep = prepare_params(raw_params, cfg)

    B = 2
    x = jax.random.normal(kx, (B, cfg["seq_len"], cfg["enc_in"]), dtype=jnp.float32)

    out = encoder_forward(x, prep, static, cfg)
    out = jax.block_until_ready(out)

    assert out.shape == (B, static["all_size"][0],
                         len(static["all_size"]) * cfg["d_model"]), out.shape
    assert bool(jnp.all(jnp.isfinite(out)))
    print("KERNEL_OK")
</pallas_src>

<mosaic_0001>
module attributes {stable_mosaic.version = 11 : i64} {
  func.func @kernel(%arg0: i32, %arg1: memref<1x16x4xf32, #tpu.memory_space<vmem>>, %arg2: memref<28x28xf32, #tpu.memory_space<vmem>>, %arg3: memref<4x32xbf16, #tpu.memory_space<vmem>>, %arg4: memref<16x32xf32, #tpu.memory_space<vmem>>, %arg5: memref<32x16xbf16, #tpu.memory_space<vmem>>, %arg6: memref<1x16xf32, #tpu.memory_space<vmem>>, %arg7: memref<16x32xbf16, #tpu.memory_space<vmem>>, %arg8: memref<1x32xf32, #tpu.memory_space<vmem>>, %arg9: memref<1x32xf32, #tpu.memory_space<vmem>>, %arg10: memref<1x32xf32, #tpu.memory_space<vmem>>, %arg11: memref<2x2x32x16xbf16, #tpu.memory_space<vmem>>, %arg12: memref<2x2x32x16xbf16, #tpu.memory_space<vmem>>, %arg13: memref<2x2x32x16xbf16, #tpu.memory_space<vmem>>, %arg14: memref<2x2x16x32xbf16, #tpu.memory_space<vmem>>, %arg15: memref<2x1x32xf32, #tpu.memory_space<vmem>>, %arg16: memref<2x1x32xf32, #tpu.memory_space<vmem>>, %arg17: memref<2x1x32xf32, #tpu.memory_space<vmem>>, %arg18: memref<2x32x64xbf16, #tpu.memory_space<vmem>>, %arg19: memref<2x1x64xf32, #tpu.memory_space<vmem>>, %arg20: memref<2x64x32xbf16, #tpu.memory_space<vmem>>, %arg21: memref<2x1x32xf32, #tpu.memory_space<vmem>>, %arg22: memref<2x1x32xf32, #tpu.memory_space<vmem>>, %arg23: memref<2x1x32xf32, #tpu.memory_space<vmem>>, %arg24: memref<3x16x28xf32, #tpu.memory_space<vmem>>, %arg25: memref<3x32x96xf32, #tpu.memory_space<vmem>>, %arg26: memref<28x16xf32, #tpu.memory_space<vmem>>, %arg27: memref<2x16x16xbf16, #tpu.memory_space<vmem>>, %arg28: memref<1x16xf32, #tpu.memory_space<vmem>>, %arg29: memref<2x8x16xbf16, #tpu.memory_space<vmem>>, %arg30: memref<28x8xf32, #tpu.memory_space<vmem>>, %arg31: memref<2x16x16xbf16, #tpu.memory_space<vmem>>, %arg32: memref<1x16xf32, #tpu.memory_space<vmem>>, %arg33: memref<2x4x8xbf16, #tpu.memory_space<vmem>>, %arg34: memref<28x4xf32, #tpu.memory_space<vmem>>, %arg35: memref<1x16x96xf32, #tpu.memory_space<vmem>>) attributes {dimension_semantics = [#tpu.dimension_semantics<parallel>], iteration_bounds = array<i64: 2>, scalar_prefetch = 0 : i64, scratch_operands = 0 : i64, tpu.core_type = #tpu.core_type<tc>, window_params = [{transform_indices = @transform_0, window_bounds = array<i64: 1, 16, 4>}, {pipeline_mode = #tpu.pipeline_mode<synchronous>, transform_indices = @transform_1, window_bounds = array<i64: 28, 28>}, {pipeline_mode = #tpu.pipeline_mode<synchronous>, transform_indices = @transform_2, window_bounds = array<i64: 4, 32>}, {pipeline_mode = #tpu.pipeline_mode<synchronous>, transform_indices = @transform_3, window_bounds = array<i64: 16, 32>}, {pipeline_mode = #tpu.pipeline_mode<synchronous>, transform_indices = @transform_4, window_bounds = array<i64: 32, 16>}, {pipeline_mode = #tpu.pipeline_mode<synchronous>, transform_indices = @transform_5, window_bounds = array<i64: 1, 16>}, {pipeline_mode = #tpu.pipeline_mode<synchronous>, transform_indices = @transform_6, window_bounds = array<i64: 16, 32>}, {pipeline_mode = #tpu.pipeline_mode<synchronous>, transform_indices = @transform_7, window_bounds = array<i64: 1, 32>}, {pipeline_mode = #tpu.pipeline_mode<synchronous>, transform_indices = @transform_8, window_bounds = array<i64: 1, 32>}, {pipeline_mode = #tpu.pipeline_mode<synchronous>, transform_indices = @transform_9, window_bounds = array<i64: 1, 32>}, {pipeline_mode = #tpu.pipeline_mode<synchronous>, transform_indices = @transform_10, window_bounds = array<i64: 2, 2, 32, 16>}, {pipeline_mode = #tpu.pipeline_mode<synchronous>, transform_indices = @transform_11, window_bounds = array<i64: 2, 2, 32, 16>}, {pipeline_mode = #tpu.pipeline_mode<synchronous>, transform_indices = @transform_12, window_bounds = array<i64: 2, 2, 32, 16>}, {pipeline_mode = #tpu.pipeline_mode<synchronous>, transform_indices = @transform_13, window_bounds = array<i64: 2, 2, 16, 32>}, {pipeline_mode = #tpu.pipeline_mode<synchronous>, transform_indices = @transform_14, window_bounds = array<i64: 2, 1, 32>}, {pipeline_mode = #tpu.pipeline_mode<synchronous>, transform_indices = @transform_15, window_bounds = array<i64: 2, 1, 32>}, {pipeline_mode = #tpu.pipeline_mode<synchronous>, transform_indices = @transform_16, window_bounds = array<i64: 2, 1, 32>}, {pipeline_mode = #tpu.pipeline_mode<synchronous>, transform_indices = @transform_17, window_bounds = array<i64: 2, 32, 64>}, {pipeline_mode = #tpu.pipeline_mode<synchronous>, transform_indices = @transform_18, window_bounds = array<i64: 2, 1, 64>}, {pipeline_mode = #tpu.pipeline_mode<synchronous>, transform_indices = @transform_19, window_bounds = array<i64: 2, 64, 32>}, {pipeline_mode = #tpu.pipeline_mode<synchronous>, transform_indices = @transform_20, window_bounds = array<i64: 2, 1, 32>}, {pipeline_mode = #tpu.pipeline_mode<synchronous>, transform_indices = @transform_21, window_bounds = array<i64: 2, 1, 32>}, {pipeline_mode = #tpu.pipeline_mode<synchronous>, transform_indices = @transform_22, window_bounds = array<i64: 2, 1, 32>}, {pipeline_mode = #tpu.pipeline_mode<synchronous>, transform_indices = @transform_23, window_bounds = array<i64: 3, 16, 28>}, {pipeline_mode = #tpu.pipeline_mode<synchronous>, transform_indices = @transform_24, window_bounds = array<i64: 3, 32, 96>}, {pipeline_mode = #tpu.pipeline_mode<synchronous>, transform_indices = @transform_25, window_bounds = array<i64: 28, 16>}, {pipeline_mode = #tpu.pipeline_mode<synchronous>, transform_indices = @transform_26, window_bounds = array<i64: 2, 16, 16>}, {pipeline_mode = #tpu.pipeline_mode<synchronous>, transform_indices = @transform_27, window_bounds = array<i64: 1, 16>}, {pipeline_mode = #tpu.pipeline_mode<synchronous>, transform_indices = @transform_28, window_bounds = array<i64: 2, 8, 16>}, {pipeline_mode = #tpu.pipeline_mode<synchronous>, transform_indices = @transform_29, window_bounds = array<i64: 28, 8>}, {pipeline_mode = #tpu.pipeline_mode<synchronous>, transform_indices = @transform_30, window_bounds = array<i64: 2, 16, 16>}, {pipeline_mode = #tpu.pipeline_mode<synchronous>, transform_indices = @transform_31, window_bounds = array<i64: 1, 16>}, {pipeline_mode = #tpu.pipeline_mode<synchronous>, transform_indices = @transform_32, window_bounds = array<i64: 2, 4, 8>}, {pipeline_mode = #tpu.pipeline_mode<synchronous>, transform_indices = @transform_33, window_bounds = array<i64: 28, 4>}, {transform_indices = @transform_34, window_bounds = array<i64: 1, 16, 96>}]} {
    %c0 = arith.constant 0 : index
    %c0_0 = arith.constant 0 : index
    %c0_1 = arith.constant 0 : index
    %0 = vector.load %arg1[%c0, %c0_0, %c0_1] : memref<1x16x4xf32, #tpu.memory_space<vmem>>, vector<1x16x4xf32>
    %1 = vector.shape_cast %0 : vector<1x16x4xf32> to vector<16x4xf32>
    %2 = arith.truncf %1 : vector<16x4xf32> to vector<16x4xbf16>
    %c0_2 = arith.constant 0 : index
    %c0_3 = arith.constant 0 : index
    %3 = vector.load %arg3[%c0_2, %c0_3] : memref<4x32xbf16, #tpu.memory_space<vmem>>, vector<4x32xbf16>
    %cst = arith.constant dense<0.000000e+00> : vector<16x32xf32>
    %4 = tpu.matmul %2, %3, %cst {dimension_numbers = #tpu.dot_dimension_numbers<[1], [0], [0], [1], [0, 0, 1, 1], [], []>} : vector<16x4xbf16>, vector<4x32xbf16>, vector<16x32xf32> -> vector<16x32xf32>
    %c0_4 = arith.constant 0 : index
    %c0_5 = arith.constant 0 : index
    %5 = vector.load %arg4[%c0_4, %c0_5] : memref<16x32xf32, #tpu.memory_space<vmem>>, vector<16x32xf32>
    %6 = arith.addf %4, %5 : vector<16x32xf32>
    %7 = arith.truncf %6 : vector<16x32xf32> to vector<16x32xbf16>
    %c0_6 = arith.constant 0 : index
    %c0_7 = arith.constant 0 : index
    %8 = vector.load %arg5[%c0_6, %c0_7] : memref<32x16xbf16, #tpu.memory_space<vmem>>, vector<32x16xbf16>
    %cst_8 = arith.constant dense<0.000000e+00> : vector<16x16xf32>
    %9 = tpu.matmul %7, %8, %cst_8 {dimension_numbers = #tpu.dot_dimension_numbers<[1], [0], [0], [1], [0, 0, 1, 1], [], []>} : vector<16x32xbf16>, vector<32x16xbf16>, vector<16x16xf32> -> vector<16x16xf32>
    %c0_9 = arith.constant 0 : index
    %c0_10 = arith.constant 0 : index
    %10 = vector.load %arg6[%c0_9, %c0_10] : memref<1x16xf32, #tpu.memory_space<vmem>>, vector<1x16xf32>
    %11 = vector.broadcast %10 : vector<1x16xf32> to vector<16x16xf32>
    %12 = arith.addf %9, %11 : vector<16x16xf32>
    %c0_11 = arith.constant 0 : index
    %c0_12 = arith.constant 0 : index
    %13 = vector.load %arg26[%c0_11, %c0_12] : memref<28x16xf32, #tpu.memory_space<vmem>>, vector<28x16xf32>
    %cst_13 = arith.constant dense<0.000000e+00> : vector<28x32xf32>
    %14 = tpu.matmul %13, %6, %cst_13 {dimension_numbers = #tpu.dot_dimension_numbers<[1], [0], [0], [1], [0, 0, 1, 1], [], []>} : vector<28x16xf32>, vector<16x32xf32>, vector<28x32xf32> -> vector<28x32xf32>
    %15 = arith.truncf %12 : vector<16x16xf32> to vector<16x16xbf16>
    %c0_14 = arith.constant 0 : index
    %c0_15 = arith.constant 0 : index
    %c0_16 = arith.constant 0 : index
    %16 = vector.load %arg29[%c0_14, %c0_15, %c0_16] : memref<2x8x16xbf16, #tpu.memory_space<vmem>>, vector<1x8x16xbf16>
    %17 = vector.shape_cast %16 : vector<1x8x16xbf16> to vector<8x16xbf16>
    %cst_17 = arith.constant dense<0.000000e+00> : vector<8x16xf32>
    %18 = tpu.matmul %17, %15, %cst_17 {dimension_numbers = #tpu.dot_dimension_numbers<[1], [0], [0], [1], [0, 0, 1, 1], [], []>} : vector<8x16xbf16>, vector<16x16xbf16>, vector<8x16xf32> -> vector<8x16xf32>
    %19 = arith.truncf %18 : vector<8x16xf32> to vector<8x16xbf16>
    %c0_18 = arith.constant 0 : index
    %c0_19 = arith.constant 0 : index
    %c0_20 = arith.constant 0 : index
    %20 = vector.load %arg27[%c0_18, %c0_19, %c0_20] : memref<2x16x16xbf16, #tpu.memory_space<vmem>>, vector<1x16x16xbf16>
    %21 = vector.shape_cast %20 : vector<1x16x16xbf16> to vector<16x16xbf16>
    %cst_21 = arith.constant dense<0.000000e+00> : vector<8x16xf32>
    %22 = tpu.matmul %19, %21, %cst_21 {dimension_numbers = #tpu.dot_dimension_numbers<[1], [0], [0], [1], [0, 0, 1, 1], [], []>} : vector<8x16xbf16>, vector<16x16xbf16>, vector<8x16xf32> -> vector<8x16xf32>
    %c1 = arith.constant 1 : index
    %c0_22 = arith.constant 0 : index
    %c0_23 = arith.constant 0 : index
    %23 = vector.load %arg29[%c1, %c0_22, %c0_23] : memref<2x8x16xbf16, #tpu.memory_space<vmem>>, vector<1x8x16xbf16>
    %24 = vector.shape_cast %23 : vector<1x8x16xbf16> to vector<8x16xbf16>
    %cst_24 = arith.constant dense<0.000000e+00> : vector<8x16xf32>
    %25 = tpu.matmul %24, %15, %cst_24 {dimension_numbers = #tpu.dot_dimension_numbers<[1], [0], [0], [1], [0, 0, 1, 1], [], []>} : vector<8x16xbf16>, vector<16x16xbf16>, vector<8x16xf32> -> vector<8x16xf32>
    %26 = arith.truncf %25 : vector<8x16xf32> to vector<8x16xbf16>
    %c1_25 = arith.constant 1 : index
    %c0_26 = arith.constant 0 : index
    %c0_27 = arith.constant 0 : index
    %27 = vector.load %arg27[%c1_25, %c0_26, %c0_27] : memref<2x16x16xbf16, #tpu.memory_space<vmem>>, vector<1x16x16xbf16>
    %28 = vector.shape_cast %27 : vector<1x16x16xbf16> to vector<16x16xbf16>
    %cst_28 = arith.constant dense<0.000000e+00> : vector<8x16xf32>
    %29 = tpu.matmul %26, %28, %cst_28 {dimension_numbers = #tpu.dot_dimension_numbers<[1], [0], [0], [1], [0, 0, 1, 1], [], []>} : vector<8x16xbf16>, vector<16x16xbf16>, vector<8x16xf32> -> vector<8x16xf32>
    %30 = arith.addf %22, %29 : vector<8x16xf32>
    %c0_29 = arith.constant 0 : index
    %c0_30 = arith.constant 0 : index
    %31 = vector.load %arg28[%c0_29, %c0_30] : memref<1x16xf32, #tpu.memory_space<vmem>>, vector<1x16xf32>
    %32 = vector.broadcast %31 : vector<1x16xf32> to vector<8x16xf32>
    %33 = arith.addf %30, %32 : vector<8x16xf32>
    %cst_31 = arith.constant 0.000000e+00 : f32
    %34 = vector.broadcast %cst_31 : f32 to vector<8x16xf32>
    %35 = arith.cmpf ogt, %33, %34 : vector<8x16xf32>
    %cst_32 = arith.constant 0.000000e+00 : f32
    %36 = vector.broadcast %cst_32 : f32 to vector<8x16xf32>
    %37 = arith.minimumf %33, %36 : vector<8x16xf32>
    %38 = math.exp %37 : vector<8x16xf32>
    %cst_33 = arith.constant 1.000000e+00 : f32
    %39 = vector.broadcast %cst_33 : f32 to vector<8x16xf32>
    %40 = arith.subf %38, %39 : vector<8x16xf32>
    %41 = arith.select %35, %33, %40 : vector<8x16xi1>, vector<8x16xf32>
    %42 = arith.truncf %41 : vector<8x16xf32> to vector<8x16xbf16>
    %c0_34 = arith.constant 0 : index
    %c0_35 = arith.constant 0 : index
    %43 = vector.load %arg7[%c0_34, %c0_35] : memref<16x32xbf16, #tpu.memory_space<vmem>>, vector<16x32xbf16>
    %cst_36 = arith.constant dense<0.000000e+00> : vector<8x32xf32>
    %44 = tpu.matmul %42, %43, %cst_36 {dimension_numbers = #tpu.dot_dimension_numbers<[1], [0], [0], [1], [0, 0, 1, 1], [], []>} : vector<8x16xbf16>, vector<16x32xbf16>, vector<8x32xf32> -> vector<8x32xf32>
    %c0_37 = arith.constant 0 : index
    %c0_38 = arith.constant 0 : index
    %45 = vector.load %arg8[%c0_37, %c0_38] : memref<1x32xf32, #tpu.memory_space<vmem>>, vector<1x32xf32>
    %46 = vector.broadcast %45 : vector<1x32xf32> to vector<8x32xf32>
    %47 = arith.addf %44, %46 : vector<8x32xf32>
    %c0_39 = arith.constant 0 : index
    %c0_40 = arith.constant 0 : index
    %48 = vector.load %arg30[%c0_39, %c0_40] : memref<28x8xf32, #tpu.memory_space<vmem>>, vector<28x8xf32>
    %cst_41 = arith.constant dense<0.000000e+00> : vector<28x32xf32>
    %49 = tpu.matmul %48, %47, %cst_41 {dimension_numbers = #tpu.dot_dimension_numbers<[1], [0], [0], [1], [0, 0, 1, 1], [], []>} : vector<28x8xf32>, vector<8x32xf32>, vector<28x32xf32> -> vector<28x32xf32>
    %50 = arith.addf %14, %49 : vector<28x32xf32>
    %51 = arith.truncf %41 : vector<8x16xf32> to vector<8x16xbf16>
    %c0_42 = arith.constant 0 : index
    %c0_43 = arith.constant 0 : index
    %c0_44 = arith.constant 0 : index
    %52 = vector.load %arg33[%c0_42, %c0_43, %c0_44] : memref<2x4x8xbf16, #tpu.memory_space<vmem>>, vector<1x4x8xbf16>
    %53 = vector.shape_cast %52 : vector<1x4x8xbf16> to vector<4x8xbf16>
    %cst_45 = arith.constant dense<0.000000e+00> : vector<4x16xf32>
    %54 = tpu.matmul %53, %51, %cst_45 {dimension_numbers = #tpu.dot_dimension_numbers<[1], [0], [0], [1], [0, 0, 1, 1], [], []>} : vector<4x8xbf16>, vector<8x16xbf16>, vector<4x16xf32> -> vector<4x16xf32>
    %55 = arith.truncf %54 : vector<4x16xf32> to vector<4x16xbf16>
    %c0_46 = arith.constant 0 : index
    %c0_47 = arith.constant 0 : index
    %c0_48 = arith.constant 0 : index
    %56 = vector.load %arg31[%c0_46, %c0_47, %c0_48] : memref<2x16x16xbf16, #tpu.memory_space<vmem>>, vector<1x16x16xbf16>
    %57 = vector.shape_cast %56 : vector<1x16x16xbf16> to vector<16x16xbf16>
    %cst_49 = arith.constant dense<0.000000e+00> : vector<4x16xf32>
    %58 = tpu.matmul %55, %57, %cst_49 {dimension_numbers = #tpu.dot_dimension_numbers<[1], [0], [0], [1], [0, 0, 1, 1], [], []>} : vector<4x16xbf16>, vector<16x16xbf16>, vector<4x16xf32> -> vector<4x16xf32>
    %c1_50 = arith.constant 1 : index
    %c0_51 = arith.constant 0 : index
    %c0_52 = arith.constant 0 : index
    %59 = vector.load %arg33[%c1_50, %c0_51, %c0_52] : memref<2x4x8xbf16, #tpu.memory_space<vmem>>, vector<1x4x8xbf16>
    %60 = vector.shape_cast %59 : vector<1x4x8xbf16> to vector<4x8xbf16>
    %cst_53 = arith.constant dense<0.000000e+00> : vector<4x16xf32>
    %61 = tpu.matmul %60, %51, %cst_53 {dimension_numbers = #tpu.dot_dimension_numbers<[1], [0], [0], [1], [0, 0, 1, 1], [], []>} : vector<4x8xbf16>, vector<8x16xbf16>, vector<4x16xf32> -> vector<4x16xf32>
    %62 = arith.truncf %61 : vector<4x16xf32> to vector<4x16xbf16>
    %c1_54 = arith.constant 1 : index
    %c0_55 = arith.constant 0 : index
    %c0_56 = arith.constant 0 : index
    %63 = vector.load %arg31[%c1_54, %c0_55, %c0_56] : memref<2x16x16xbf16, #tpu.memory_space<vmem>>, vector<1x16x16xbf16>
    %64 = vector.shape_cast %63 : vector<1x16x16xbf16> to vector<16x16xbf16>
    %cst_57 = arith.constant dense<0.000000e+00> : vector<4x16xf32>
    %65 = tpu.matmul %62, %64, %cst_57 {dimension_numbers = #tpu.dot_dimension_numbers<[1], [0], [0], [1], [0, 0, 1, 1], [], []>} : vector<4x16xbf16>, vector<16x16xbf16>, vector<4x16xf32> -> vector<4x16xf32>
    %66 = arith.addf %58, %65 : vector<4x16xf32>
    %c0_58 = arith.constant 0 : index
    %c0_59 = arith.constant 0 : index
    %67 = vector.load %arg32[%c0_58, %c0_59] : memref<1x16xf32, #tpu.memory_space<vmem>>, vector<1x16xf32>
    %68 = vector.broadcast %67 : vector<1x16xf32> to vector<4x16xf32>
    %69 = arith.addf %66, %68 : vector<4x16xf32>
    %cst_60 = arith.constant 0.000000e+00 : f32
    %70 = vector.broadcast %cst_60 : f32 to vector<4x16xf32>
    %71 = arith.cmpf ogt, %69, %70 : vector<4x16xf32>
    %cst_61 = arith.constant 0.000000e+00 : f32
    %72 = vector.broadcast %cst_61 : f32 to vector<4x16xf32>
    %73 = arith.minimumf %69, %72 : vector<4x16xf32>
    %74 = math.exp %73 : vector<4x16xf32>
    %cst_62 = arith.constant 1.000000e+00 : f32
    %75 = vector.broadcast %cst_62 : f32 to vector<4x16xf32>
    %76 = arith.subf %74, %75 : vector<4x16xf32>
    %77 = arith.select %71, %69, %76 : vector<4x16xi1>, vector<4x16xf32>
    %78 = arith.truncf %77 : vector<4x16xf32> to vector<4x16xbf16>
    %c0_63 = arith.constant 0 : index
    %c0_64 = arith.constant 0 : index
    %79 = vector.load %arg7[%c0_63, %c0_64] : memref<16x32xbf16, #tpu.memory_space<vmem>>, vector<16x32xbf16>
    %cst_65 = arith.constant dense<0.000000e+00> : vector<4x32xf32>
    %80 = tpu.matmul %78, %79, %cst_65 {dimension_numbers = #tpu.dot_dimension_numbers<[1], [0], [0], [1], [0, 0, 1, 1], [], []>} : vector<4x16xbf16>, vector<16x32xbf16>, vector<4x32xf32> -> vector<4x32xf32>
    %c0_66 = arith.constant 0 : index
    %c0_67 = arith.constant 0 : index
    %81 = vector.load %arg8[%c0_66, %c0_67] : memref<1x32xf32, #tpu.memory_space<vmem>>, vector<1x32xf32>
    %82 = vector.broadcast %81 : vector<1x32xf32> to vector<4x32xf32>
    %83 = arith.addf %80, %82 : vector<4x32xf32>
    %c0_68 = arith.constant 0 : index
    %c0_69 = arith.constant 0 : index
    %84 = vector.load %arg34[%c0_68, %c0_69] : memref<28x4xf32, #tpu.memory_space<vmem>>, vector<28x4xf32>
    %cst_70 = arith.constant dense<0.000000e+00> : vector<28x32xf32>
    %85 = tpu.matmul %84, %83, %cst_70 {dimension_numbers = #tpu.dot_dimension_numbers<[1], [0], [0], [1], [0, 0, 1, 1], [], []>} : vector<28x4xf32>, vector<4x32xf32>, vector<28x32xf32> -> vector<28x32xf32>
    %86 = arith.addf %50, %85 : vector<28x32xf32>
    %c0_71 = arith.constant 0 : index
    %c0_72 = arith.constant 0 : index
    %87 = vector.load %arg9[%c0_71, %c0_72] : memref<1x32xf32, #tpu.memory_space<vmem>>, vector<1x32xf32>
    %c0_73 = arith.constant 0 : index
    %c0_74 = arith.constant 0 : index
    %88 = vector.load %arg10[%c0_73, %c0_74] : memref<1x32xf32, #tpu.memory_space<vmem>>, vector<1x32xf32>
    %cst_75 = arith.constant dense<0.000000e+00> : vector<28xf32>
    %89 = vector.multi_reduction <add>, %86, %cst_75 [1] : vector<28x32xf32> to vector<28xf32>
    %90 = vector.shape_cast %89 : vector<28xf32> to vector<28x1xf32>
    %cst_76 = arith.constant 3.200000e+01 : f32
    %91 = vector.broadcast %cst_76 : f32 to vector<28x1xf32>
    %92 = arith.divf %90, %91 : vector<28x1xf32>
    %93 = vector.broadcast %92 : vector<28x1xf32> to vector<28x32xf32>
    %94 = arith.subf %86, %93 : vector<28x32xf32>
    %95 = arith.mulf %94, %94 : vector<28x32xf32>
    %cst_77 = arith.constant dense<0.000000e+00> : vector<28xf32>
    %96 = vector.multi_reduction <add>, %95, %cst_77 [1] : vector<28x32xf32> to vector<28xf32>
    %97 = vector.shape_cast %96 : vector<28xf32> to vector<28x1xf32>
    %cst_78 = arith.constant 3.200000e+01 : f32
    %98 = vector.broadcast %cst_78 : f32 to vector<28x1xf32>
    %99 = arith.divf %97, %98 : vector<28x1xf32>
    %100 = vector.broadcast %92 : vector<28x1xf32> to vector<28x32xf32>
    %101 = arith.subf %86, %100 : vector<28x32xf32>
    %cst_79 = arith.constant 9.99999974E-6 : f32
    %102 = vector.broadcast %cst_79 : f32 to vector<28x1xf32>
    %103 = arith.addf %99, %102 : vector<28x1xf32>
    %104 = math.rsqrt %103 : vector<28x1xf32>
    %105 = vector.broadcast %104 : vector<28x1xf32> to vector<28x32xf32>
    %106 = arith.mulf %101, %105 : vector<28x32xf32>
    %107 = vector.broadcast %87 : vector<1x32xf32> to vector<28x32xf32>
    %108 = arith.mulf %106, %107 : vector<28x32xf32>
    %109 = vector.broadcast %88 : vector<1x32xf32> to vector<28x32xf32>
    %110 = arith.addf %108, %109 : vector<28x32xf32>
    %c0_80 = arith.constant 0 : index
    %c0_81 = arith.constant 0 : index
    %111 = vector.load %arg2[%c0_80, %c0_81] : memref<28x28xf32, #tpu.memory_space<vmem>>, vector<28x28xf32>
    %112 = arith.truncf %110 : vector<28x32xf32> to vector<28x32xbf16>
    %c0_82 = arith.constant 0 : index
    %c0_83 = arith.constant 0 : index
    %c0_84 = arith.constant 0 : index
    %c0_85 = arith.constant 0 : index
    %113 = vector.load %arg11[%c0_82, %c0_83, %c0_84, %c0_85] : memref<2x2x32x16xbf16, #tpu.memory_space<vmem>>, vector<1x1x32x16xbf16>
    %114 = vector.shape_cast %113 : vector<1x1x32x16xbf16> to vector<32x16xbf16>
    %cst_86 = arith.constant dense<0.000000e+00> : vector<28x16xf32>
    %115 = tpu.matmul %112, %114, %cst_86 {dimension_numbers = #tpu.dot_dimension_numbers<[1], [0], [0], [1], [0, 0, 1, 1], [], []>} : vector<28x32xbf16>, vector<32x16xbf16>, vector<28x16xf32> -> vector<28x16xf32>
    %c0_87 = arith.constant 0 : index
    %c0_88 = arith.constant 0 : index
    %c0_89 = arith.constant 0 : index
    %c0_90 = arith.constant 0 : index
    %116 = vector.load %arg12[%c0_87, %c0_88, %c0_89, %c0_90] : memref<2x2x32x16xbf16, #tpu.memory_space<vmem>>, vector<1x1x32x16xbf16>
    %117 = vector.shape_cast %116 : vector<1x1x32x16xbf16> to vector<32x16xbf16>
    %cst_91 = arith.constant dense<0.000000e+00> : vector<28x16xf32>
    %118 = tpu.matmul %112, %117, %cst_91 {dimension_numbers = #tpu.dot_dimension_numbers<[1], [0], [0], [1], [0, 0, 1, 1], [], []>} : vector<28x32xbf16>, vector<32x16xbf16>, vector<28x16xf32> -> vector<28x16xf32>
    %c0_92 = arith.constant 0 : index
    %c0_93 = arith.constant 0 : index
    %c0_94 = arith.constant 0 : index
    %c0_95 = arith.constant 0 : index
    %119 = vector.load %arg13[%c0_92, %c0_93, %c0_94, %c0_95] : memref<2x2x32x16xbf16, #tpu.memory_space<vmem>>, vector<1x1x32x16xbf16>
    %120 = vector.shape_cast %119 : vector<1x1x32x16xbf16> to vector<32x16xbf16>
    %cst_96 = arith.constant dense<0.000000e+00> : vector<28x16xf32>
    %121 = tpu.matmul %112, %120, %cst_96 {dimension_numbers = #tpu.dot_dimension_numbers<[1], [0], [0], [1], [0, 0, 1, 1], [], []>} : vector<28x32xbf16>, vector<32x16xbf16>, vector<28x16xf32> -> vector<28x16xf32>
    %122 = arith.truncf %115 : vector<28x16xf32> to vector<28x16xbf16>
    %123 = arith.truncf %118 : vector<28x16xf32> to vector<28x16xbf16>
    %cst_97 = arith.constant dense<0.000000e+00> : vector<28x28xf32>
    %124 = tpu.matmul %122, %123, %cst_97 {dimension_numbers = #tpu.dot_dimension_numbers<[1], [1], [0], [0], [0, 0, 1, 0], [], []>} : vector<28x16xbf16>, vector<28x16xbf16>, vector<28x28xf32> -> vector<28x28xf32>
    %125 = arith.addf %124, %111 : vector<28x28xf32>
    %cst_98 = arith.constant dense<0xFF800000> : vector<28xf32>
    %126 = vector.multi_reduction <maximumf>, %125, %cst_98 [1] : vector<28x28xf32> to vector<28xf32>
    %127 = vector.shape_cast %126 : vector<28xf32> to vector<28x1xf32>
    %128 = vector.broadcast %127 : vector<28x1xf32> to vector<28x28xf32>
    %129 = arith.subf %125, %128 : vector<28x28xf32>
    %130 = math.exp %129 : vector<28x28xf32>
    %cst_99 = arith.constant dense<0.000000e+00> : vector<28xf32>
    %131 = vector.multi_reduction <add>, %130, %cst_99 [1] : vector<28x28xf32> to vector<28xf32>
    %132 = vector.shape_cast %131 : vector<28xf32> to vector<28x1xf32>
    %133 = tpu.reciprocal %132 {approx = true} : vector<28x1xf32> -> vector<28x1xf32>
    %134 = vector.broadcast %133 : vector<28x1xf32> to vector<28x28xf32>
    %135 = arith.mulf %130, %134 : vector<28x28xf32>
    %136 = arith.truncf %135 : vector<28x28xf32> to vector<28x28xbf16>
    %137 = arith.truncf %121 : vector<28x16xf32> to vector<28x16xbf16>
    %cst_100 = arith.constant dense<0.000000e+00> : vector<28x16xf32>
    %138 = tpu.matmul %136, %137, %cst_100 {dimension_numbers = #tpu.dot_dimension_numbers<[1], [0], [0], [1], [0, 0, 1, 1], [], []>} : vector<28x28xbf16>, vector<28x16xbf16>, vector<28x16xf32> -> vector<28x16xf32>
    %139 = arith.truncf %138 : vector<28x16xf32> to vector<28x16xbf16>
    %c0_101 = arith.constant 0 : index
    %c0_102 = arith.constant 0 : index
    %c0_103 = arith.constant 0 : index
    %c0_104 = arith.constant 0 : index
    %140 = vector.load %arg14[%c0_101, %c0_102, %c0_103, %c0_104] : memref<2x2x16x32xbf16, #tpu.memory_space<vmem>>, vector<1x1x16x32xbf16>
    %141 = vector.shape_cast %140 : vector<1x1x16x32xbf16> to vector<16x32xbf16>
    %cst_105 = arith.constant dense<0.000000e+00> : vector<28x32xf32>
    %142 = tpu.matmul %139, %141, %cst_105 {dimension_numbers = #tpu.dot_dimension_numbers<[1], [0], [0], [1], [0, 0, 1, 1], [], []>} : vector<28x16xbf16>, vector<16x32xbf16>, vector<28x32xf32> -> vector<28x32xf32>
    %c0_106 = arith.constant 0 : index
    %c1_107 = arith.constant 1 : index
    %c0_108 = arith.constant 0 : index
    %c0_109 = arith.constant 0 : index
    %143 = vector.load %arg11[%c0_106, %c1_107, %c0_108, %c0_109] : memref<2x2x32x16xbf16, #tpu.memory_space<vmem>>, vector<1x1x32x16xbf16>
    %144 = vector.shape_cast %143 : vector<1x1x32x16xbf16> to vector<32x16xbf16>
    %cst_110 = arith.constant dense<0.000000e+00> : vector<28x16xf32>
    %145 = tpu.matmul %112, %144, %cst_110 {dimension_numbers = #tpu.dot_dimension_numbers<[1], [0], [0], [1], [0, 0, 1, 1], [], []>} : vector<28x32xbf16>, vector<32x16xbf16>, vector<28x16xf32> -> vector<28x16xf32>
    %c0_111 = arith.constant 0 : index
    %c1_112 = arith.constant 1 : index
    %c0_113 = arith.constant 0 : index
    %c0_114 = arith.constant 0 : index
    %146 = vector.load %arg12[%c0_111, %c1_112, %c0_113, %c0_114] : memref<2x2x32x16xbf16, #tpu.memory_space<vmem>>, vector<1x1x32x16xbf16>
    %147 = vector.shape_cast %146 : vector<1x1x32x16xbf16> to vector<32x16xbf16>
    %cst_115 = arith.constant dense<0.000000e+00> : vector<28x16xf32>
    %148 = tpu.matmul %112, %147, %cst_115 {dimension_numbers = #tpu.dot_dimension_numbers<[1], [0], [0], [1], [0, 0, 1, 1], [], []>} : vector<28x32xbf16>, vector<32x16xbf16>, vector<28x16xf32> -> vector<28x16xf32>
    %c0_116 = arith.constant 0 : index
    %c1_117 = arith.constant 1 : index
    %c0_118 = arith.constant 0 : index
    %c0_119 = arith.constant 0 : index
    %149 = vector.load %arg13[%c0_116, %c1_117, %c0_118, %c0_119] : memref<2x2x32x16xbf16, #tpu.memory_space<vmem>>, vector<1x1x32x16xbf16>
    %150 = vector.shape_cast %149 : vector<1x1x32x16xbf16> to vector<32x16xbf16>
    %cst_120 = arith.constant dense<0.000000e+00> : vector<28x16xf32>
    %151 = tpu.matmul %112, %150, %cst_120 {dimension_numbers = #tpu.dot_dimension_numbers<[1], [0], [0], [1], [0, 0, 1, 1], [], []>} : vector<28x32xbf16>, vector<32x16xbf16>, vector<28x16xf32> -> vector<28x16xf32>
    %152 = arith.truncf %145 : vector<28x16xf32> to vector<28x16xbf16>
    %153 = arith.truncf %148 : vector<28x16xf32> to vector<28x16xbf16>
    %cst_121 = arith.constant dense<0.000000e+00> : vector<28x28xf32>
    %154 = tpu.matmul %152, %153, %cst_121 {dimension_numbers = #tpu.dot_dimension_numbers<[1], [1], [0], [0], [0, 0, 1, 0], [], []>} : vector<28x16xbf16>, vector<28x16xbf16>, vector<28x28xf32> -> vector<28x28xf32>
    %155 = arith.addf %154, %111 : vector<28x28xf32>
    %cst_122 = arith.constant dense<0xFF800000> : vector<28xf32>
    %156 = vector.multi_reduction <maximumf>, %155, %cst_122 [1] : vector<28x28xf32> to vector<28xf32>
    %157 = vector.shape_cast %156 : vector<28xf32> to vector<28x1xf32>
    %158 = vector.broadcast %157 : vector<28x1xf32> to vector<28x28xf32>
    %159 = arith.subf %155, %158 : vector<28x28xf32>
    %160 = math.exp %159 : vector<28x28xf32>
    %cst_123 = arith.constant dense<0.000000e+00> : vector<28xf32>
    %161 = vector.multi_reduction <add>, %160, %cst_123 [1] : vector<28x28xf32> to vector<28xf32>
    %162 = vector.shape_cast %161 : vector<28xf32> to vector<28x1xf32>
    %163 = tpu.reciprocal %162 {approx = true} : vector<28x1xf32> -> vector<28x1xf32>
    %164 = vector.broadcast %163 : vector<28x1xf32> to vector<28x28xf32>
    %165 = arith.mulf %160, %164 : vector<28x28xf32>
    %166 = arith.truncf %165 : vector<28x28xf32> to vector<28x28xbf16>
    %167 = arith.truncf %151 : vector<28x16xf32> to vector<28x16xbf16>
    %cst_124 = arith.constant dense<0.000000e+00> : vector<28x16xf32>
    %168 = tpu.matmul %166, %167, %cst_124 {dimension_numbers = #tpu.dot_dimension_numbers<[1], [0], [0], [1], [0, 0, 1, 1], [], []>} : vector<28x28xbf16>, vector<28x16xbf16>, vector<28x16xf32> -> vector<28x16xf32>
    %169 = arith.truncf %168 : vector<28x16xf32> to vector<28x16xbf16>
    %c0_125 = arith.constant 0 : index
    %c1_126 = arith.constant 1 : index
    %c0_127 = arith.constant 0 : index
    %c0_128 = arith.constant 0 : index
    %170 = vector.load %arg14[%c0_125, %c1_126, %c0_127, %c0_128] : memref<2x2x16x32xbf16, #tpu.memory_space<vmem>>, vector<1x1x16x32xbf16>
    %171 = vector.shape_cast %170 : vector<1x1x16x32xbf16> to vector<16x32xbf16>
    %cst_129 = arith.constant dense<0.000000e+00> : vector<28x32xf32>
    %172 = tpu.matmul %169, %171, %cst_129 {dimension_numbers = #tpu.dot_dimension_numbers<[1], [0], [0], [1], [0, 0, 1, 1], [], []>} : vector<28x16xbf16>, vector<16x32xbf16>, vector<28x32xf32> -> vector<28x32xf32>
    %173 = arith.addf %142, %172 : vector<28x32xf32>
    %c0_130 = arith.constant 0 : index
    %c0_131 = arith.constant 0 : index
    %c0_132 = arith.constant 0 : index
    %174 = vector.load %arg15[%c0_130, %c0_131, %c0_132] : memref<2x1x32xf32, #tpu.memory_space<vmem>>, vector<1x1x32xf32>
    %175 = vector.shape_cast %174 : vector<1x1x32xf32> to vector<1x32xf32>
    %176 = vector.broadcast %175 : vector<1x32xf32> to vector<28x32xf32>
    %177 = arith.addf %173, %176 : vector<28x32xf32>
    %178 = arith.addf %177, %110 : vector<28x32xf32>
    %c0_133 = arith.constant 0 : index
    %c0_134 = arith.constant 0 : index
    %c0_135 = arith.constant 0 : index
    %179 = vector.load %arg16[%c0_133, %c0_134, %c0_135] : memref<2x1x32xf32, #tpu.memory_space<vmem>>, vector<1x1x32xf32>
    %180 = vector.shape_cast %179 : vector<1x1x32xf32> to vector<1x32xf32>
    %c0_136 = arith.constant 0 : index
    %c0_137 = arith.constant 0 : index
    %c0_138 = arith.constant 0 : index
    %181 = vector.load %arg17[%c0_136, %c0_137, %c0_138] : memref<2x1x32xf32, #tpu.memory_space<vmem>>, vector<1x1x32xf32>
    %182 = vector.shape_cast %181 : vector<1x1x32xf32> to vector<1x32xf32>
    %cst_139 = arith.constant dense<0.000000e+00> : vector<28xf32>
    %183 = vector.multi_reduction <add>, %178, %cst_139 [1] : vector<28x32xf32> to vector<28xf32>
    %184 = vector.shape_cast %183 : vector<28xf32> to vector<28x1xf32>
    %cst_140 = arith.constant 3.200000e+01 : f32
    %185 = vector.broadcast %cst_140 : f32 to vector<28x1xf32>
    %186 = arith.divf %184, %185 : vector<28x1xf32>
    %187 = vector.broadcast %186 : vector<28x1xf32> to vector<28x32xf32>
    %188 = arith.subf %178, %187 : vector<28x32xf32>
    %189 = arith.mulf %188, %188 : vector<28x32xf32>
    %cst_141 = arith.constant dense<0.000000e+00> : vector<28xf32>
    %190 = vector.multi_reduction <add>, %189, %cst_141 [1] : vector<28x32xf32> to vector<28xf32>
    %191 = vector.shape_cast %190 : vector<28xf32> to vector<28x1xf32>
    %cst_142 = arith.constant 3.200000e+01 : f32
    %192 = vector.broadcast %cst_142 : f32 to vector<28x1xf32>
    %193 = arith.divf %191, %192 : vector<28x1xf32>
    %194 = vector.broadcast %186 : vector<28x1xf32> to vector<28x32xf32>
    %195 = arith.subf %178, %194 : vector<28x32xf32>
    %cst_143 = arith.constant 9.99999997E-7 : f32
    %196 = vector.broadcast %cst_143 : f32 to vector<28x1xf32>
    %197 = arith.addf %193, %196 : vector<28x1xf32>
    %198 = math.rsqrt %197 : vector<28x1xf32>
    %199 = vector.broadcast %198 : vector<28x1xf32> to vector<28x32xf32>
    %200 = arith.mulf %195, %199 : vector<28x32xf32>
    %201 = vector.broadcast %180 : vector<1x32xf32> to vector<28x32xf32>
    %202 = arith.mulf %200, %201 : vector<28x32xf32>
    %203 = vector.broadcast %182 : vector<1x32xf32> to vector<28x32xf32>
    %204 = arith.addf %202, %203 : vector<28x32xf32>
    %205 = arith.truncf %204 : vector<28x32xf32> to vector<28x32xbf16>
    %c0_144 = arith.constant 0 : index
    %c0_145 = arith.constant 0 : index
    %c0_146 = arith.constant 0 : index
    %206 = vector.load %arg18[%c0_144, %c0_145, %c0_146] : memref<2x32x64xbf16, #tpu.memory_space<vmem>>, vector<1x32x64xbf16>
    %207 = vector.shape_cast %206 : vector<1x32x64xbf16> to vector<32x64xbf16>
    %cst_147 = arith.constant dense<0.000000e+00> : vector<28x64xf32>
    %208 = tpu.matmul %205, %207, %cst_147 {dimension_numbers = #tpu.dot_dimension_numbers<[1], [0], [0], [1], [0, 0, 1, 1], [], []>} : vector<28x32xbf16>, vector<32x64xbf16>, vector<28x64xf32> -> vector<28x64xf32>
    %c0_148 = arith.constant 0 : index
    %c0_149 = arith.constant 0 : index
    %c0_150 = arith.constant 0 : index
    %209 = vector.load %arg19[%c0_148, %c0_149, %c0_150] : memref<2x1x64xf32, #tpu.memory_space<vmem>>, vector<1x1x64xf32>
    %210 = vector.shape_cast %209 : vector<1x1x64xf32> to vector<1x64xf32>
    %211 = vector.broadcast %210 : vector<1x64xf32> to vector<28x64xf32>
    %212 = arith.addf %208, %211 : vector<28x64xf32>
    %cst_151 = arith.constant 5.000000e-01 : f32
    %213 = vector.broadcast %cst_151 : f32 to vector<28x64xf32>
    %214 = arith.mulf %213, %212 : vector<28x64xf32>
    %cst_152 = arith.constant 0.707106769 : f32
    %215 = vector.broadcast %cst_152 : f32 to vector<28x64xf32>
    %216 = arith.mulf %212, %215 : vector<28x64xf32>
    %217 = math.erf %216 : vector<28x64xf32>
    %cst_153 = arith.constant 1.000000e+00 : f32
    %218 = vector.broadcast %cst_153 : f32 to vector<28x64xf32>
    %219 = arith.addf %218, %217 : vector<28x64xf32>
    %220 = arith.mulf %214, %219 : vector<28x64xf32>
    %221 = arith.truncf %220 : vector<28x64xf32> to vector<28x64xbf16>
    %c0_154 = arith.constant 0 : index
    %c0_155 = arith.constant 0 : index
    %c0_156 = arith.constant 0 : index
    %222 = vector.load %arg20[%c0_154, %c0_155, %c0_156] : memref<2x64x32xbf16, #tpu.memory_space<vmem>>, vector<1x64x32xbf16>
    %223 = vector.shape_cast %222 : vector<1x64x32xbf16> to vector<64x32xbf16>
    %cst_157 = arith.constant dense<0.000000e+00> : vector<28x32xf32>
    %224 = tpu.matmul %221, %223, %cst_157 {dimension_numbers = #tpu.dot_dimension_numbers<[1], [0], [0], [1], [0, 0, 1, 1], [], []>} : vector<28x64xbf16>, vector<64x32xbf16>, vector<28x32xf32> -> vector<28x32xf32>
    %c0_158 = arith.constant 0 : index
    %c0_159 = arith.constant 0 : index
    %c0_160 = arith.constant 0 : index
    %225 = vector.load %arg21[%c0_158, %c0_159, %c0_160] : memref<2x1x32xf32, #tpu.memory_space<vmem>>, vector<1x1x32xf32>
    %226 = vector.shape_cast %225 : vector<1x1x32xf32> to vector<1x32xf32>
    %227 = vector.broadcast %226 : vector<1x32xf32> to vector<28x32xf32>
    %228 = arith.addf %224, %227 : vector<28x32xf32>
    %229 = arith.addf %228, %204 : vector<28x32xf32>
    %c0_161 = arith.constant 0 : index
    %c0_162 = arith.constant 0 : index
    %c0_163 = arith.constant 0 : index
    %230 = vector.load %arg22[%c0_161, %c0_162, %c0_163] : memref<2x1x32xf32, #tpu.memory_space<vmem>>, vector<1x1x32xf32>
    %231 = vector.shape_cast %230 : vector<1x1x32xf32> to vector<1x32xf32>
    %c0_164 = arith.constant 0 : index
    %c0_165 = arith.constant 0 : index
    %c0_166 = arith.constant 0 : index
    %232 = vector.load %arg23[%c0_164, %c0_165, %c0_166] : memref<2x1x32xf32, #tpu.memory_space<vmem>>, vector<1x1x32xf32>
    %233 = vector.shape_cast %232 : vector<1x1x32xf32> to vector<1x32xf32>
    %cst_167 = arith.constant dense<0.000000e+00> : vector<28xf32>
    %234 = vector.multi_reduction <add>, %229, %cst_167 [1] : vector<28x32xf32> to vector<28xf32>
    %235 = vector.shape_cast %234 : vector<28xf32> to vector<28x1xf32>
    %cst_168 = arith.constant 3.200000e+01 : f32
    %236 = vector.broadcast %cst_168 : f32 to vector<28x1xf32>
    %237 = arith.divf %235, %236 : vector<28x1xf32>
    %238 = vector.broadcast %237 : vector<28x1xf32> to vector<28x32xf32>
    %239 = arith.subf %229, %238 : vector<28x32xf32>
    %240 = arith.mulf %239, %239 : vector<28x32xf32>
    %cst_169 = arith.constant dense<0.000000e+00> : vector<28xf32>
    %241 = vector.multi_reduction <add>, %240, %cst_169 [1] : vector<28x32xf32> to vector<28xf32>
    %242 = vector.shape_cast %241 : vector<28xf32> to vector<28x1xf32>
    %cst_170 = arith.constant 3.200000e+01 : f32
    %243 = vector.broadcast %cst_170 : f32 to vector<28x1xf32>
    %244 = arith.divf %242, %243 : vector<28x1xf32>
    %245 = vector.broadcast %237 : vector<28x1xf32> to vector<28x32xf32>
    %246 = arith.subf %229, %245 : vector<28x32xf32>
    %cst_171 = arith.constant 9.99999997E-7 : f32
    %247 = vector.broadcast %cst_171 : f32 to vector<28x1xf32>
    %248 = arith.addf %244, %247 : vector<28x1xf32>
    %249 = math.rsqrt %248 : vector<28x1xf32>
    %250 = vector.broadcast %249 : vector<28x1xf32> to vector<28x32xf32>
    %251 = arith.mulf %246, %250 : vector<28x32xf32>
    %252 = vector.broadcast %231 : vector<1x32xf32> to vector<28x32xf32>
    %253 = arith.mulf %251, %252 : vector<28x32xf32>
    %254 = vector.broadcast %233 : vector<1x32xf32> to vector<28x32xf32>
    %255 = arith.addf %253, %254 : vector<28x32xf32>
    %256 = arith.truncf %255 : vector<28x32xf32> to vector<28x32xbf16>
    %c1_172 = arith.constant 1 : index
    %c0_173 = arith.constant 0 : index
    %c0_174 = arith.constant 0 : index
    %c0_175 = arith.constant 0 : index
    %257 = vector.load %arg11[%c1_172, %c0_173, %c0_174, %c0_175] : memref<2x2x32x16xbf16, #tpu.memory_space<vmem>>, vector<1x1x32x16xbf16>
    %258 = vector.shape_cast %257 : vector<1x1x32x16xbf16> to vector<32x16xbf16>
    %cst_176 = arith.constant dense<0.000000e+00> : vector<28x16xf32>
    %259 = tpu.matmul %256, %258, %cst_176 {dimension_numbers = #tpu.dot_dimension_numbers<[1], [0], [0], [1], [0, 0, 1, 1], [], []>} : vector<28x32xbf16>, vector<32x16xbf16>, vector<28x16xf32> -> vector<28x16xf32>
    %c1_177 = arith.constant 1 : index
    %c0_178 = arith.constant 0 : index
    %c0_179 = arith.constant 0 : index
    %c0_180 = arith.constant 0 : index
    %260 = vector.load %arg12[%c1_177, %c0_178, %c0_179, %c0_180] : memref<2x2x32x16xbf16, #tpu.memory_space<vmem>>, vector<1x1x32x16xbf16>
    %261 = vector.shape_cast %260 : vector<1x1x32x16xbf16> to vector<32x16xbf16>
    %cst_181 = arith.constant dense<0.000000e+00> : vector<28x16xf32>
    %262 = tpu.matmul %256, %261, %cst_181 {dimension_numbers = #tpu.dot_dimension_numbers<[1], [0], [0], [1], [0, 0, 1, 1], [], []>} : vector<28x32xbf16>, vector<32x16xbf16>, vector<28x16xf32> -> vector<28x16xf32>
    %c1_182 = arith.constant 1 : index
    %c0_183 = arith.constant 0 : index
    %c0_184 = arith.constant 0 : index
    %c0_185 = arith.constant 0 : index
    %263 = vector.load %arg13[%c1_182, %c0_183, %c0_184, %c0_185] : memref<2x2x32x16xbf16, #tpu.memory_space<vmem>>, vector<1x1x32x16xbf16>
    %264 = vector.shape_cast %263 : vector<1x1x32x16xbf16> to vector<32x16xbf16>
    %cst_186 = arith.constant dense<0.000000e+00> : vector<28x16xf32>
    %265 = tpu.matmul %256, %264, %cst_186 {dimension_numbers = #tpu.dot_dimension_numbers<[1], [0], [0], [1], [0, 0, 1, 1], [], []>} : vector<28x32xbf16>, vector<32x16xbf16>, vector<28x16xf32> -> vector<28x16xf32>
    %266 = arith.truncf %259 : vector<28x16xf32> to vector<28x16xbf16>
    %267 = arith.truncf %262 : vector<28x16xf32> to vector<28x16xbf16>
    %cst_187 = arith.constant dense<0.000000e+00> : vector<28x28xf32>
    %268 = tpu.matmul %266, %267, %cst_187 {dimension_numbers = #tpu.dot_dimension_numbers<[1], [1], [0], [0], [0, 0, 1, 0], [], []>} : vector<28x16xbf16>, vector<28x16xbf16>, vector<28x28xf32> -> vector<28x28xf32>
    %269 = arith.addf %268, %111 : vector<28x28xf32>
    %cst_188 = arith.constant dense<0xFF800000> : vector<28xf32>
    %270 = vector.multi_reduction <maximumf>, %269, %cst_188 [1] : vector<28x28xf32> to vector<28xf32>
    %271 = vector.shape_cast %270 : vector<28xf32> to vector<28x1xf32>
    %272 = vector.broadcast %271 : vector<28x1xf32> to vector<28x28xf32>
    %273 = arith.subf %269, %272 : vector<28x28xf32>
    %274 = math.exp %273 : vector<28x28xf32>
    %cst_189 = arith.constant dense<0.000000e+00> : vector<28xf32>
    %275 = vector.multi_reduction <add>, %274, %cst_189 [1] : vector<28x28xf32> to vector<28xf32>
    %276 = vector.shape_cast %275 : vector<28xf32> to vector<28x1xf32>
    %277 = tpu.reciprocal %276 {approx = true} : vector<28x1xf32> -> vector<28x1xf32>
    %278 = vector.broadcast %277 : vector<28x1xf32> to vector<28x28xf32>
    %279 = arith.mulf %274, %278 : vector<28x28xf32>
    %280 = arith.truncf %279 : vector<28x28xf32> to vector<28x28xbf16>
    %281 = arith.truncf %265 : vector<28x16xf32> to vector<28x16xbf16>
    %cst_190 = arith.constant dense<0.000000e+00> : vector<28x16xf32>
    %282 = tpu.matmul %280, %281, %cst_190 {dimension_numbers = #tpu.dot_dimension_numbers<[1], [0], [0], [1], [0, 0, 1, 1], [], []>} : vector<28x28xbf16>, vector<28x16xbf16>, vector<28x16xf32> -> vector<28x16xf32>
    %283 = arith.truncf %282 : vector<28x16xf32> to vector<28x16xbf16>
    %c1_191 = arith.constant 1 : index
    %c0_192 = arith.constant 0 : index
    %c0_193 = arith.constant 0 : index
    %c0_194 = arith.constant 0 : index
    %284 = vector.load %arg14[%c1_191, %c0_192, %c0_193, %c0_194] : memref<2x2x16x32xbf16, #tpu.memory_space<vmem>>, vector<1x1x16x32xbf16>
    %285 = vector.shape_cast %284 : vector<1x1x16x32xbf16> to vector<16x32xbf16>
    %cst_195 = arith.constant dense<0.000000e+00> : vector<28x32xf32>
    %286 = tpu.matmul %283, %285, %cst_195 {dimension_numbers = #tpu.dot_dimension_numbers<[1], [0], [0], [1], [0, 0, 1, 1], [], []>} : vector<28x16xbf16>, vector<16x32xbf16>, vector<28x32xf32> -> vector<28x32xf32>
    %c1_196 = arith.constant 1 : index
    %c1_197 = arith.constant 1 : index
    %c0_198 = arith.constant 0 : index
    %c0_199 = arith.constant 0 : index
    %287 = vector.load %arg11[%c1_196, %c1_197, %c0_198, %c0_199] : memref<2x2x32x16xbf16, #tpu.memory_space<vmem>>, vector<1x1x32x16xbf16>
    %288 = vector.shape_cast %287 : vector<1x1x32x16xbf16> to vector<32x16xbf16>
    %cst_200 = arith.constant dense<0.000000e+00> : vector<28x16xf32>
    %289 = tpu.matmul %256, %288, %cst_200 {dimension_numbers = #tpu.dot_dimension_numbers<[1], [0], [0], [1], [0, 0, 1, 1], [], []>} : vector<28x32xbf16>, vector<32x16xbf16>, vector<28x16xf32> -> vector<28x16xf32>
    %c1_201 = arith.constant 1 : index
    %c1_202 = arith.constant 1 : index
    %c0_203 = arith.constant 0 : index
    %c0_204 = arith.constant 0 : index
    %290 = vector.load %arg12[%c1_201, %c1_202, %c0_203, %c0_204] : memref<2x2x32x16xbf16, #tpu.memory_space<vmem>>, vector<1x1x32x16xbf16>
    %291 = vector.shape_cast %290 : vector<1x1x32x16xbf16> to vector<32x16xbf16>
    %cst_205 = arith.constant dense<0.000000e+00> : vector<28x16xf32>
    %292 = tpu.matmul %256, %291, %cst_205 {dimension_numbers = #tpu.dot_dimension_numbers<[1], [0], [0], [1], [0, 0, 1, 1], [], []>} : vector<28x32xbf16>, vector<32x16xbf16>, vector<28x16xf32> -> vector<28x16xf32>
    %c1_206 = arith.constant 1 : index
    %c1_207 = arith.constant 1 : index
    %c0_208 = arith.constant 0 : index
    %c0_209 = arith.constant 0 : index
    %293 = vector.load %arg13[%c1_206, %c1_207, %c0_208, %c0_209] : memref<2x2x32x16xbf16, #tpu.memory_space<vmem>>, vector<1x1x32x16xbf16>
    %294 = vector.shape_cast %293 : vector<1x1x32x16xbf16> to vector<32x16xbf16>
    %cst_210 = arith.constant dense<0.000000e+00> : vector<28x16xf32>
    %295 = tpu.matmul %256, %294, %cst_210 {dimension_numbers = #tpu.dot_dimension_numbers<[1], [0], [0], [1], [0, 0, 1, 1], [], []>} : vector<28x32xbf16>, vector<32x16xbf16>, vector<28x16xf32> -> vector<28x16xf32>
    %296 = arith.truncf %289 : vector<28x16xf32> to vector<28x16xbf16>
    %297 = arith.truncf %292 : vector<28x16xf32> to vector<28x16xbf16>
    %cst_211 = arith.constant dense<0.000000e+00> : vector<28x28xf32>
    %298 = tpu.matmul %296, %297, %cst_211 {dimension_numbers = #tpu.dot_dimension_numbers<[1], [1], [0], [0], [0, 0, 1, 0], [], []>} : vector<28x16xbf16>, vector<28x16xbf16>, vector<28x28xf32> -> vector<28x28xf32>
    %299 = arith.addf %298, %111 : vector<28x28xf32>
    %cst_212 = arith.constant dense<0xFF800000> : vector<28xf32>
    %300 = vector.multi_reduction <maximumf>, %299, %cst_212 [1] : vector<28x28xf32> to vector<28xf32>
    %301 = vector.shape_cast %300 : vector<28xf32> to vector<28x1xf32>
    %302 = vector.broadcast %301 : vector<28x1xf32> to vector<28x28xf32>
    %303 = arith.subf %299, %302 : vector<28x28xf32>
    %304 = math.exp %303 : vector<28x28xf32>
    %cst_213 = arith.constant dense<0.000000e+00> : vector<28xf32>
    %305 = vector.multi_reduction <add>, %304, %cst_213 [1] : vector<28x28xf32> to vector<28xf32>
    %306 = vector.shape_cast %305 : vector<28xf32> to vector<28x1xf32>
    %307 = tpu.reciprocal %306 {approx = true} : vector<28x1xf32> -> vector<28x1xf32>
    %308 = vector.broadcast %307 : vector<28x1xf32> to vector<28x28xf32>
    %309 = arith.mulf %304, %308 : vector<28x28xf32>
    %310 = arith.truncf %309 : vector<28x28xf32> to vector<28x28xbf16>
    %311 = arith.truncf %295 : vector<28x16xf32> to vector<28x16xbf16>
    %cst_214 = arith.constant dense<0.000000e+00> : vector<28x16xf32>
    %312 = tpu.matmul %310, %311, %cst_214 {dimension_numbers = #tpu.dot_dimension_numbers<[1], [0], [0], [1], [0, 0, 1, 1], [], []>} : vector<28x28xbf16>, vector<28x16xbf16>, vector<28x16xf32> -> vector<28x16xf32>
    %313 = arith.truncf %312 : vector<28x16xf32> to vector<28x16xbf16>
    %c1_215 = arith.constant 1 : index
    %c1_216 = arith.constant 1 : index
    %c0_217 = arith.constant 0 : index
    %c0_218 = arith.constant 0 : index
    %314 = vector.load %arg14[%c1_215, %c1_216, %c0_217, %c0_218] : memref<2x2x16x32xbf16, #tpu.memory_space<vmem>>, vector<1x1x16x32xbf16>
    %315 = vector.shape_cast %314 : vector<1x1x16x32xbf16> to vector<16x32xbf16>
    %cst_219 = arith.constant dense<0.000000e+00> : vector<28x32xf32>
    %316 = tpu.matmul %313, %315, %cst_219 {dimension_numbers = #tpu.dot_dimension_numbers<[1], [0], [0], [1], [0, 0, 1, 1], [], []>} : vector<28x16xbf16>, vector<16x32xbf16>, vector<28x32xf32> -> vector<28x32xf32>
    %317 = arith.addf %286, %316 : vector<28x32xf32>
    %c1_220 = arith.constant 1 : index
    %c0_221 = arith.constant 0 : index
    %c0_222 = arith.constant 0 : index
    %318 = vector.load %arg15[%c1_220, %c0_221, %c0_222] : memref<2x1x32xf32, #tpu.memory_space<vmem>>, vector<1x1x32xf32>
    %319 = vector.shape_cast %318 : vector<1x1x32xf32> to vector<1x32xf32>
    %320 = vector.broadcast %319 : vector<1x32xf32> to vector<28x32xf32>
    %321 = arith.addf %317, %320 : vector<28x32xf32>
    %322 = arith.addf %321, %255 : vector<28x32xf32>
    %c1_223 = arith.constant 1 : index
    %c0_224 = arith.constant 0 : index
    %c0_225 = arith.constant 0 : index
    %323 = vector.load %arg16[%c1_223, %c0_224, %c0_225] : memref<2x1x32xf32, #tpu.memory_space<vmem>>, vector<1x1x32xf32>
    %324 = vector.shape_cast %323 : vector<1x1x32xf32> to vector<1x32xf32>
    %c1_226 = arith.constant 1 : index
    %c0_227 = arith.constant 0 : index
    %c0_228 = arith.constant 0 : index
    %325 = vector.load %arg17[%c1_226, %c0_227, %c0_228] : memref<2x1x32xf32, #tpu.memory_space<vmem>>, vector<1x1x32xf32>
    %326 = vector.shape_cast %325 : vector<1x1x32xf32> to vector<1x32xf32>
    %cst_229 = arith.constant dense<0.000000e+00> : vector<28xf32>
    %327 = vector.multi_reduction <add>, %322, %cst_229 [1] : vector<28x32xf32> to vector<28xf32>
    %328 = vector.shape_cast %327 : vector<28xf32> to vector<28x1xf32>
    %cst_230 = arith.constant 3.200000e+01 : f32
    %329 = vector.broadcast %cst_230 : f32 to vector<28x1xf32>
    %330 = arith.divf %328, %329 : vector<28x1xf32>
    %331 = vector.broadcast %330 : vector<28x1xf32> to vector<28x32xf32>
    %332 = arith.subf %322, %331 : vector<28x32xf32>
    %333 = arith.mulf %332, %332 : vector<28x32xf32>
    %cst_231 = arith.constant dense<0.000000e+00> : vector<28xf32>
    %334 = vector.multi_reduction <add>, %333, %cst_231 [1] : vector<28x32xf32> to vector<28xf32>
    %335 = vector.shape_cast %334 : vector<28xf32> to vector<28x1xf32>
    %cst_232 = arith.constant 3.200000e+01 : f32
    %336 = vector.broadcast %cst_232 : f32 to vector<28x1xf32>
    %337 = arith.divf %335, %336 : vector<28x1xf32>
    %338 = vector.broadcast %330 : vector<28x1xf32> to vector<28x32xf32>
    %339 = arith.subf %322, %338 : vector<28x32xf32>
    %cst_233 = arith.constant 9.99999997E-7 : f32
    %340 = vector.broadcast %cst_233 : f32 to vector<28x1xf32>
    %341 = arith.addf %337, %340 : vector<28x1xf32>
    %342 = math.rsqrt %341 : vector<28x1xf32>
    %343 = vector.broadcast %342 : vector<28x1xf32> to vector<28x32xf32>
    %344 = arith.mulf %339, %343 : vector<28x32xf32>
    %345 = vector.broadcast %324 : vector<1x32xf32> to vector<28x32xf32>
    %346 = arith.mulf %344, %345 : vector<28x32xf32>
    %347 = vector.broadcast %326 : vector<1x32xf32> to vector<28x32xf32>
    %348 = arith.addf %346, %347 : vector<28x32xf32>
    %349 = arith.truncf %348 : vector<28x32xf32> to vector<28x32xbf16>
    %c1_234 = arith.constant 1 : index
    %c0_235 = arith.constant 0 : index
    %c0_236 = arith.constant 0 : index
    %350 = vector.load %arg18[%c1_234, %c0_235, %c0_236] : memref<2x32x64xbf16, #tpu.memory_space<vmem>>, vector<1x32x64xbf16>
    %351 = vector.shape_cast %350 : vector<1x32x64xbf16> to vector<32x64xbf16>
    %cst_237 = arith.constant dense<0.000000e+00> : vector<28x64xf32>
    %352 = tpu.matmul %349, %351, %cst_237 {dimension_numbers = #tpu.dot_dimension_numbers<[1], [0], [0], [1], [0, 0, 1, 1], [], []>} : vector<28x32xbf16>, vector<32x64xbf16>, vector<28x64xf32> -> vector<28x64xf32>
    %c1_238 = arith.constant 1 : index
    %c0_239 = arith.constant 0 : index
    %c0_240 = arith.constant 0 : index
    %353 = vector.load %arg19[%c1_238, %c0_239, %c0_240] : memref<2x1x64xf32, #tpu.memory_space<vmem>>, vector<1x1x64xf32>
    %354 = vector.shape_cast %353 : vector<1x1x64xf32> to vector<1x64xf32>
    %355 = vector.broadcast %354 : vector<1x64xf32> to vector<28x64xf32>
    %356 = arith.addf %352, %355 : vector<28x64xf32>
    %cst_241 = arith.constant 5.000000e-01 : f32
    %357 = vector.broadcast %cst_241 : f32 to vector<28x64xf32>
    %358 = arith.mulf %357, %356 : vector<28x64xf32>
    %cst_242 = arith.constant 0.707106769 : f32
    %359 = vector.broadcast %cst_242 : f32 to vector<28x64xf32>
    %360 = arith.mulf %356, %359 : vector<28x64xf32>
    %361 = math.erf %360 : vector<28x64xf32>
    %cst_243 = arith.constant 1.000000e+00 : f32
    %362 = vector.broadcast %cst_243 : f32 to vector<28x64xf32>
    %363 = arith.addf %362, %361 : vector<28x64xf32>
    %364 = arith.mulf %358, %363 : vector<28x64xf32>
    %365 = arith.truncf %364 : vector<28x64xf32> to vector<28x64xbf16>
    %c1_244 = arith.constant 1 : index
    %c0_245 = arith.constant 0 : index
    %c0_246 = arith.constant 0 : index
    %366 = vector.load %arg20[%c1_244, %c0_245, %c0_246] : memref<2x64x32xbf16, #tpu.memory_space<vmem>>, vector<1x64x32xbf16>
    %367 = vector.shape_cast %366 : vector<1x64x32xbf16> to vector<64x32xbf16>
    %cst_247 = arith.constant dense<0.000000e+00> : vector<28x32xf32>
    %368 = tpu.matmul %365, %367, %cst_247 {dimension_numbers = #tpu.dot_dimension_numbers<[1], [0], [0], [1], [0, 0, 1, 1], [], []>} : vector<28x64xbf16>, vector<64x32xbf16>, vector<28x32xf32> -> vector<28x32xf32>
    %c1_248 = arith.constant 1 : index
    %c0_249 = arith.constant 0 : index
    %c0_250 = arith.constant 0 : index
    %369 = vector.load %arg21[%c1_248, %c0_249, %c0_250] : memref<2x1x32xf32, #tpu.memory_space<vmem>>, vector<1x1x32xf32>
    %370 = vector.shape_cast %369 : vector<1x1x32xf32> to vector<1x32xf32>
    %371 = vector.broadcast %370 : vector<1x32xf32> to vector<28x32xf32>
    %372 = arith.addf %368, %371 : vector<28x32xf32>
    %373 = arith.addf %372, %348 : vector<28x32xf32>
    %c1_251 = arith.constant 1 : index
    %c0_252 = arith.constant 0 : index
    %c0_253 = arith.constant 0 : index
    %374 = vector.load %arg22[%c1_251, %c0_252, %c0_253] : memref<2x1x32xf32, #tpu.memory_space<vmem>>, vector<1x1x32xf32>
    %375 = vector.shape_cast %374 : vector<1x1x32xf32> to vector<1x32xf32>
    %c1_254 = arith.constant 1 : index
    %c0_255 = arith.constant 0 : index
    %c0_256 = arith.constant 0 : index
    %376 = vector.load %arg23[%c1_254, %c0_255, %c0_256] : memref<2x1x32xf32, #tpu.memory_space<vmem>>, vector<1x1x32xf32>
    %377 = vector.shape_cast %376 : vector<1x1x32xf32> to vector<1x32xf32>
    %cst_257 = arith.constant dense<0.000000e+00> : vector<28xf32>
    %378 = vector.multi_reduction <add>, %373, %cst_257 [1] : vector<28x32xf32> to vector<28xf32>
    %379 = vector.shape_cast %378 : vector<28xf32> to vector<28x1xf32>
    %cst_258 = arith.constant 3.200000e+01 : f32
    %380 = vector.broadcast %cst_258 : f32 to vector<28x1xf32>
    %381 = arith.divf %379, %380 : vector<28x1xf32>
    %382 = vector.broadcast %381 : vector<28x1xf32> to vector<28x32xf32>
    %383 = arith.subf %373, %382 : vector<28x32xf32>
    %384 = arith.mulf %383, %383 : vector<28x32xf32>
    %cst_259 = arith.constant dense<0.000000e+00> : vector<28xf32>
    %385 = vector.multi_reduction <add>, %384, %cst_259 [1] : vector<28x32xf32> to vector<28xf32>
    %386 = vector.shape_cast %385 : vector<28xf32> to vector<28x1xf32>
    %cst_260 = arith.constant 3.200000e+01 : f32
    %387 = vector.broadcast %cst_260 : f32 to vector<28x1xf32>
    %388 = arith.divf %386, %387 : vector<28x1xf32>
    %389 = vector.broadcast %381 : vector<28x1xf32> to vector<28x32xf32>
    %390 = arith.subf %373, %389 : vector<28x32xf32>
    %cst_261 = arith.constant 9.99999997E-7 : f32
    %391 = vector.broadcast %cst_261 : f32 to vector<28x1xf32>
    %392 = arith.addf %388, %391 : vector<28x1xf32>
    %393 = math.rsqrt %392 : vector<28x1xf32>
    %394 = vector.broadcast %393 : vector<28x1xf32> to vector<28x32xf32>
    %395 = arith.mulf %390, %394 : vector<28x32xf32>
    %396 = vector.broadcast %375 : vector<1x32xf32> to vector<28x32xf32>
    %397 = arith.mulf %395, %396 : vector<28x32xf32>
    %398 = vector.broadcast %377 : vector<1x32xf32> to vector<28x32xf32>
    %399 = arith.addf %397, %398 : vector<28x32xf32>
    %c0_262 = arith.constant 0 : index
    %c0_263 = arith.constant 0 : index
    %c0_264 = arith.constant 0 : index
    %400 = vector.load %arg24[%c0_262, %c0_263, %c0_264] : memref<3x16x28xf32, #tpu.memory_space<vmem>>, vector<1x16x28xf32>
    %401 = vector.shape_cast %400 : vector<1x16x28xf32> to vector<16x28xf32>
    %cst_265 = arith.constant dense<0.000000e+00> : vector<16x32xf32>
    %402 = tpu.matmul %401, %399, %cst_265 {dimension_numbers = #tpu.dot_dimension_numbers<[1], [0], [0], [1], [0, 0, 1, 1], [], []>} : vector<16x28xf32>, vector<28x32xf32>, vector<16x32xf32> -> vector<16x32xf32>
    %c0_266 = arith.constant 0 : index
    %c0_267 = arith.constant 0 : index
    %c0_268 = arith.constant 0 : index
    %403 = vector.load %arg25[%c0_266, %c0_267, %c0_268] : memref<3x32x96xf32, #tpu.memory_space<vmem>>, vector<1x32x96xf32>
    %404 = vector.shape_cast %403 : vector<1x32x96xf32> to vector<32x96xf32>
    %cst_269 = arith.constant dense<0.000000e+00> : vector<16x96xf32>
    %405 = tpu.matmul %402, %404, %cst_269 {dimension_numbers = #tpu.dot_dimension_numbers<[1], [0], [0], [1], [0, 0, 1, 1], [], []>} : vector<16x32xf32>, vector<32x96xf32>, vector<16x96xf32> -> vector<16x96xf32>
    %c1_270 = arith.constant 1 : index
    %c0_271 = arith.constant 0 : index
    %c0_272 = arith.constant 0 : index
    %406 = vector.load %arg24[%c1_270, %c0_271, %c0_272] : memref<3x16x28xf32, #tpu.memory_space<vmem>>, vector<1x16x28xf32>
    %407 = vector.shape_cast %406 : vector<1x16x28xf32> to vector<16x28xf32>
    %cst_273 = arith.constant dense<0.000000e+00> : vector<16x32xf32>
    %408 = tpu.matmul %407, %399, %cst_273 {dimension_numbers = #tpu.dot_dimension_numbers<[1], [0], [0], [1], [0, 0, 1, 1], [], []>} : vector<16x28xf32>, vector<28x32xf32>, vector<16x32xf32> -> vector<16x32xf32>
    %c1_274 = arith.constant 1 : index
    %c0_275 = arith.constant 0 : index
    %c0_276 = arith.constant 0 : index
    %409 = vector.load %arg25[%c1_274, %c0_275, %c0_276] : memref<3x32x96xf32, #tpu.memory_space<vmem>>, vector<1x32x96xf32>
    %410 = vector.shape_cast %409 : vector<1x32x96xf32> to vector<32x96xf32>
    %cst_277 = arith.constant dense<0.000000e+00> : vector<16x96xf32>
    %411 = tpu.matmul %408, %410, %cst_277 {dimension_numbers = #tpu.dot_dimension_numbers<[1], [0], [0], [1], [0, 0, 1, 1], [], []>} : vector<16x32xf32>, vector<32x96xf32>, vector<16x96xf32> -> vector<16x96xf32>
    %412 = arith.addf %405, %411 : vector<16x96xf32>
    %c2 = arith.constant 2 : index
    %c0_278 = arith.constant 0 : index
    %c0_279 = arith.constant 0 : index
    %413 = vector.load %arg24[%c2, %c0_278, %c0_279] : memref<3x16x28xf32, #tpu.memory_space<vmem>>, vector<1x16x28xf32>
    %414 = vector.shape_cast %413 : vector<1x16x28xf32> to vector<16x28xf32>
    %cst_280 = arith.constant dense<0.000000e+00> : vector<16x32xf32>
    %415 = tpu.matmul %414, %399, %cst_280 {dimension_numbers = #tpu.dot_dimension_numbers<[1], [0], [0], [1], [0, 0, 1, 1], [], []>} : vector<16x28xf32>, vector<28x32xf32>, vector<16x32xf32> -> vector<16x32xf32>
    %c2_281 = arith.constant 2 : index
    %c0_282 = arith.constant 0 : index
    %c0_283 = arith.constant 0 : index
    %416 = vector.load %arg25[%c2_281, %c0_282, %c0_283] : memref<3x32x96xf32, #tpu.memory_space<vmem>>, vector<1x32x96xf32>
    %417 = vector.shape_cast %416 : vector<1x32x96xf32> to vector<32x96xf32>
    %cst_284 = arith.constant dense<0.000000e+00> : vector<16x96xf32>
    %418 = tpu.matmul %415, %417, %cst_284 {dimension_numbers = #tpu.dot_dimension_numbers<[1], [0], [0], [1], [0, 0, 1, 1], [], []>} : vector<16x32xf32>, vector<32x96xf32>, vector<16x96xf32> -> vector<16x96xf32>
    %419 = arith.addf %412, %418 : vector<16x96xf32>
    %c0_285 = arith.constant 0 : index
    %c0_286 = arith.constant 0 : index
    %c0_287 = arith.constant 0 : index
    %420 = vector.load %arg35[%c0_285, %c0_286, %c0_287] : memref<1x16x96xf32, #tpu.memory_space<vmem>>, vector<1x16x96xf32>
    %421 = vector.shape_cast %420 : vector<1x16x96xf32> to vector<16x96xf32>
    %422 = vector.shape_cast %419 : vector<16x96xf32> to vector<1x16x96xf32>
    tpu.vector_store %arg35[%c0_285, %c0_286, %c0_287], %422 {strides = array<i32>} : memref<1x16x96xf32, #tpu.memory_space<vmem>>, vector<1x16x96xf32>,
    return
  }
  func.func @transform_0(%arg0: i32) -> (i32, i32, i32) {
    %c0_i32 = arith.constant 0 : i32
    %c0_i32_0 = arith.constant 0 : i32
    %c0_i32_1 = arith.constant 0 : i32
    return %arg0, %c0_i32, %c0_i32_0 : i32, i32, i32
  }
  func.func @transform_1(%arg0: i32) -> (i32, i32) {
    %c0_i32 = arith.constant 0 : i32
    %c0_i32_0 = arith.constant 0 : i32
    %c0_i32_1 = arith.constant 0 : i32
    return %c0_i32, %c0_i32_0 : i32, i32
  }
  func.func @transform_2(%arg0: i32) -> (i32, i32) {
    %c0_i32 = arith.constant 0 : i32
    %c0_i32_0 = arith.constant 0 : i32
    %c0_i32_1 = arith.constant 0 : i32
    return %c0_i32, %c0_i32_0 : i32, i32
  }
  func.func @transform_3(%arg0: i32) -> (i32, i32) {
    %c0_i32 = arith.constant 0 : i32
    %c0_i32_0 = arith.constant 0 : i32
    %c0_i32_1 = arith.constant 0 : i32
    return %c0_i32, %c0_i32_0 : i32, i32
  }
  func.func @transform_4(%arg0: i32) -> (i32, i32) {
    %c0_i32 = arith.constant 0 : i32
    %c0_i32_0 = arith.constant 0 : i32
    %c0_i32_1 = arith.constant 0 : i32
    return %c0_i32, %c0_i32_0 : i32, i32
  }
  func.func @transform_5(%arg0: i32) -> (i32, i32) {
    %c0_i32 = arith.constant 0 : i32
    %c0_i32_0 = arith.constant 0 : i32
    %c0_i32_1 = arith.constant 0 : i32
    return %c0_i32, %c0_i32_0 : i32, i32
  }
  func.func @transform_6(%arg0: i32) -> (i32, i32) {
    %c0_i32 = arith.constant 0 : i32
    %c0_i32_0 = arith.constant 0 : i32
    %c0_i32_1 = arith.constant 0 : i32
    return %c0_i32, %c0_i32_0 : i32, i32
  }
  func.func @transform_7(%arg0: i32) -> (i32, i32) {
    %c0_i32 = arith.constant 0 : i32
    %c0_i32_0 = arith.constant 0 : i32
    %c0_i32_1 = arith.constant 0 : i32
    return %c0_i32, %c0_i32_0 : i32, i32
  }
  func.func @transform_8(%arg0: i32) -> (i32, i32) {
    %c0_i32 = arith.constant 0 : i32
    %c0_i32_0 = arith.constant 0 : i32
    %c0_i32_1 = arith.constant 0 : i32
    return %c0_i32, %c0_i32_0 : i32, i32
  }
  func.func @transform_9(%arg0: i32) -> (i32, i32) {
    %c0_i32 = arith.constant 0 : i32
    %c0_i32_0 = arith.constant 0 : i32
    %c0_i32_1 = arith.constant 0 : i32
    return %c0_i32, %c0_i32_0 : i32, i32
  }
  func.func @transform_10(%arg0: i32) -> (i32, i32, i32, i32) {
    %c0_i32 = arith.constant 0 : i32
    %c0_i32_0 = arith.constant 0 : i32
    %c0_i32_1 = arith.constant 0 : i32
    %c0_i32_2 = arith.constant 0 : i32
    %c0_i32_3 = arith.constant 0 : i32
    return %c0_i32, %c0_i32_0, %c0_i32_1, %c0_i32_2 : i32, i32, i32, i32
  }
  func.func @transform_11(%arg0: i32) -> (i32, i32, i32, i32) {
    %c0_i32 = arith.constant 0 : i32
    %c0_i32_0 = arith.constant 0 : i32
    %c0_i32_1 = arith.constant 0 : i32
    %c0_i32_2 = arith.constant 0 : i32
    %c0_i32_3 = arith.constant 0 : i32
    return %c0_i32, %c0_i32_0, %c0_i32_1, %c0_i32_2 : i32, i32, i32, i32
  }
  func.func @transform_12(%arg0: i32) -> (i32, i32, i32, i32) {
    %c0_i32 = arith.constant 0 : i32
    %c0_i32_0 = arith.constant 0 : i32
    %c0_i32_1 = arith.constant 0 : i32
    %c0_i32_2 = arith.constant 0 : i32
    %c0_i32_3 = arith.constant 0 : i32
    return %c0_i32, %c0_i32_0, %c0_i32_1, %c0_i32_2 : i32, i32, i32, i32
  }
  func.func @transform_13(%arg0: i32) -> (i32, i32, i32, i32) {
    %c0_i32 = arith.constant 0 : i32
    %c0_i32_0 = arith.constant 0 : i32
    %c0_i32_1 = arith.constant 0 : i32
    %c0_i32_2 = arith.constant 0 : i32
    %c0_i32_3 = arith.constant 0 : i32
    return %c0_i32, %c0_i32_0, %c0_i32_1, %c0_i32_2 : i32, i32, i32, i32
  }
  func.func @transform_14(%arg0: i32) -> (i32, i32, i32) {
    %c0_i32 = arith.constant 0 : i32
    %c0_i32_0 = arith.constant 0 : i32
    %c0_i32_1 = arith.constant 0 : i32
    %c0_i32_2 = arith.constant 0 : i32
    return %c0_i32, %c0_i32_0, %c0_i32_1 : i32, i32, i32
  }
  func.func @transform_15(%arg0: i32) -> (i32, i32, i32) {
    %c0_i32 = arith.constant 0 : i32
    %c0_i32_0 = arith.constant 0 : i32
    %c0_i32_1 = arith.constant 0 : i32
    %c0_i32_2 = arith.constant 0 : i32
    return %c0_i32, %c0_i32_0, %c0_i32_1 : i32, i32, i32
  }
  func.func @transform_16(%arg0: i32) -> (i32, i32, i32) {
    %c0_i32 = arith.constant 0 : i32
    %c0_i32_0 = arith.constant 0 : i32
    %c0_i32_1 = arith.constant 0 : i32
    %c0_i32_2 = arith.constant 0 : i32
    return %c0_i32, %c0_i32_0, %c0_i32_1 : i32, i32, i32
  }
  func.func @transform_17(%arg0: i32) -> (i32, i32, i32) {
    %c0_i32 = arith.constant 0 : i32
    %c0_i32_0 = arith.constant 0 : i32
    %c0_i32_1 = arith.constant 0 : i32
    %c0_i32_2 = arith.constant 0 : i32
    return %c0_i32, %c0_i32_0, %c0_i32_1 : i32, i32, i32
  }
  func.func @transform_18(%arg0: i32) -> (i32, i32, i32) {
    %c0_i32 = arith.constant 0 : i32
    %c0_i32_0 = arith.constant 0 : i32
    %c0_i32_1 = arith.constant 0 : i32
    %c0_i32_2 = arith.constant 0 : i32
    return %c0_i32, %c0_i32_0, %c0_i32_1 : i32, i32, i32
  }
  func.func @transform_19(%arg0: i32) -> (i32, i32, i32) {
    %c0_i32 = arith.constant 0 : i32
    %c0_i32_0 = arith.constant 0 : i32
    %c0_i32_1 = arith.constant 0 : i32
    %c0_i32_2 = arith.constant 0 : i32
    return %c0_i32, %c0_i32_0, %c0_i32_1 : i32, i32, i32
  }
  func.func @transform_20(%arg0: i32) -> (i32, i32, i32) {
    %c0_i32 = arith.constant 0 : i32
    %c0_i32_0 = arith.constant 0 : i32
    %c0_i32_1 = arith.constant 0 : i32
    %c0_i32_2 = arith.constant 0 : i32
    return %c0_i32, %c0_i32_0, %c0_i32_1 : i32, i32, i32
  }
  func.func @transform_21(%arg0: i32) -> (i32, i32, i32) {
    %c0_i32 = arith.constant 0 : i32
    %c0_i32_0 = arith.constant 0 : i32
    %c0_i32_1 = arith.constant 0 : i32
    %c0_i32_2 = arith.constant 0 : i32
    return %c0_i32, %c0_i32_0, %c0_i32_1 : i32, i32, i32
  }
  func.func @transform_22(%arg0: i32) -> (i32, i32, i32) {
    %c0_i32 = arith.constant 0 : i32
    %c0_i32_0 = arith.constant 0 : i32
    %c0_i32_1 = arith.constant 0 : i32
    %c0_i32_2 = arith.constant 0 : i32
    return %c0_i32, %c0_i32_0, %c0_i32_1 : i32, i32, i32
  }
  func.func @transform_23(%arg0: i32) -> (i32, i32, i32) {
    %c0_i32 = arith.constant 0 : i32
    %c0_i32_0 = arith.constant 0 : i32
    %c0_i32_1 = arith.constant 0 : i32
    %c0_i32_2 = arith.constant 0 : i32
    return %c0_i32, %c0_i32_0, %c0_i32_1 : i32, i32, i32
  }
  func.func @transform_24(%arg0: i32) -> (i32, i32, i32) {
    %c0_i32 = arith.constant 0 : i32
    %c0_i32_0 = arith.constant 0 : i32
    %c0_i32_1 = arith.constant 0 : i32
    %c0_i32_2 = arith.constant 0 : i32
    return %c0_i32, %c0_i32_0, %c0_i32_1 : i32, i32, i32
  }
  func.func @transform_25(%arg0: i32) -> (i32, i32) {
    %c0_i32 = arith.constant 0 : i32
    %c0_i32_0 = arith.constant 0 : i32
    %c0_i32_1 = arith.constant 0 : i32
    return %c0_i32, %c0_i32_0 : i32, i32
  }
  func.func @transform_26(%arg0: i32) -> (i32, i32, i32) {
    %c0_i32 = arith.constant 0 : i32
    %c0_i32_0 = arith.constant 0 : i32
    %c0_i32_1 = arith.constant 0 : i32
    %c0_i32_2 = arith.constant 0 : i32
    return %c0_i32, %c0_i32_0, %c0_i32_1 : i32, i32, i32
  }
  func.func @transform_27(%arg0: i32) -> (i32, i32) {
    %c0_i32 = arith.constant 0 : i32
    %c0_i32_0 = arith.constant 0 : i32
    %c0_i32_1 = arith.constant 0 : i32
    return %c0_i32, %c0_i32_0 : i32, i32
  }
  func.func @transform_28(%arg0: i32) -> (i32, i32, i32) {
    %c0_i32 = arith.constant 0 : i32
    %c0_i32_0 = arith.constant 0 : i32
    %c0_i32_1 = arith.constant 0 : i32
    %c0_i32_2 = arith.constant 0 : i32
    return %c0_i32, %c0_i32_0, %c0_i32_1 : i32, i32, i32
  }
  func.func @transform_29(%arg0: i32) -> (i32, i32) {
    %c0_i32 = arith.constant 0 : i32
    %c0_i32_0 = arith.constant 0 : i32
    %c0_i32_1 = arith.constant 0 : i32
    return %c0_i32, %c0_i32_0 : i32, i32
  }
  func.func @transform_30(%arg0: i32) -> (i32, i32, i32) {
    %c0_i32 = arith.constant 0 : i32
    %c0_i32_0 = arith.constant 0 : i32
    %c0_i32_1 = arith.constant 0 : i32
    %c0_i32_2 = arith.constant 0 : i32
    return %c0_i32, %c0_i32_0, %c0_i32_1 : i32, i32, i32
  }
  func.func @transform_31(%arg0: i32) -> (i32, i32) {
    %c0_i32 = arith.constant 0 : i32
    %c0_i32_0 = arith.constant 0 : i32
    %c0_i32_1 = arith.constant 0 : i32
    return %c0_i32, %c0_i32_0 : i32, i32
  }
  func.func @transform_32(%arg0: i32) -> (i32, i32, i32) {
    %c0_i32 = arith.constant 0 : i32
    %c0_i32_0 = arith.constant 0 : i32
    %c0_i32_1 = arith.constant 0 : i32
    %c0_i32_2 = arith.constant 0 : i32
    return %c0_i32, %c0_i32_0, %c0_i32_1 : i32, i32, i32
  }
  func.func @transform_33(%arg0: i32) -> (i32, i32) {
    %c0_i32 = arith.constant 0 : i32
    %c0_i32_0 = arith.constant 0 : i32
    %c0_i32_1 = arith.constant 0 : i32
    return %c0_i32, %c0_i32_0 : i32, i32
  }
  func.func @transform_34(%arg0: i32) -> (i32, i32, i32) {
    %c0_i32 = arith.constant 0 : i32
    %c0_i32_0 = arith.constant 0 : i32
    %c0_i32_1 = arith.constant 0 : i32
    return %arg0, %c0_i32, %c0_i32_0 : i32, i32, i32
  }
}

</mosaic_0001>

<bundles_post_ra>
// kernel: tpu_custom_call.1
= control target key start
LH: loop header
LB: loop body
LE: loop exit
PB: predicated region body
PF: predicated region fallthrough
CT: control target
= control target key end

     0   :  { %s6361_s6 = smov 1   ;;  %s6362_s10 = smov 2   ;;  %s7159_s0 = inlined_call_operand.smem [shape: u32[35], index: -1, kind: input, shape index: {}] }
   0x1   :  { %s6408_s5 = sld [smem:[%s7159_s0]]   ;;  %s6363_s14 = smov 3  }
   0x2   :  { %s6413_s9 = sld [smem:[%s7159_s0 + %s6361_s6]]   ;;  %s6364_s18 = smov 4  }
   0x3   :  { %s6418_s13 = sld [smem:[%s7159_s0 + %s6362_s10]]   ;;  %s6365_s22 = smov 5  }
   0x4   :  { %s6423_s17 = sld [smem:[%s7159_s0 + %s6363_s14]]   ;;  %s6366_s26 = smov 6  }
   0x5   :  { %s6428_s21 = sld [smem:[%s7159_s0 + %s6364_s18]]   ;;  %s6367_s30 = smov 7  }
   0x6   :  { %s6433_s25 = sld [smem:[%s7159_s0 + %s6365_s22]]   ;;  %s6368_s4 = smov 8  }
   0x7   :  { %7191 = sst [smem:[#allocation5_spill]] %s6408_s5  ;;  %s6369_s10 = smov 9  }
   0x8   :  { %7192 = sst [smem:[#allocation6_spill]] %s6413_s9  ;;  %s6370_s15 = smov 10  }
   0x9   :  { %7193 = sst [smem:[#allocation7_spill]] %s6418_s13  ;;  %s6371_s20 = smov 11  }
   0xa   :  { %s6438_s29 = sld [smem:[%s7159_s0 + %s6366_s26]]   ;;  %s6372_s26 = smov 12  }
   0xb   :  { %s6443_s3 = sld [smem:[%s7159_s0 + %s6367_s30]]   ;;  %s6373_s1 = smov 13  }
   0xc   :  { %s6448_s8 = sld [smem:[%s7159_s0 + %s6368_s4]]   ;;  %s6374_s7 = smov 14  }
   0xd   :  { %s6453_s14 = sld [smem:[%s7159_s0 + %s6369_s10]]   ;;  %s6376_s22 = smov 16  }
   0xe   :  { %s6458_s19 = sld [smem:[%s7159_s0 + %s6370_s15]]   ;;  %s6375_s15 = smov 15  }
   0xf   :  { %s6463_s24 = sld [smem:[%s7159_s0 + %s6371_s20]]   ;;  %s6377_s28 = smov 17  }
  0x10   :  { %s6468_s30 = sld [smem:[%s7159_s0 + %s6372_s26]]  }
  0x11   :  { %7194 = sst [smem:[#allocation8_spill]] %s6443_s3 }
  0x12   :  { %7195 = sst [smem:[#allocation9_spill]] %s6448_s8 }
  0x13   :  { %7196 = sst [smem:[#allocation10_spill]] %s6453_s14 }
  0x14   :  { %s6473_s6 = sld [smem:[%s7159_s0 + %s6373_s1]]  }
  0x15   :  { %7197 = sst [smem:[#allocation11_spill]] %s6463_s24 }
  0x16   :  { %7198 = sst [smem:[#allocation12_spill]] %s6468_s30 }
  0x17   :  { %s6478_s12 = sld [smem:[%s7159_s0 + %s6374_s7]]   ;;  %s6378_s7 = smov 18  }
  0x18   :  { %s6483_s20 = sld [smem:[%s7159_s0 + %s6375_s15]]   ;;  %s6379_s15 = smov 19  }
  0x19   :  { %s6488_s27 = sld [smem:[%s7159_s0 + %s6376_s22]]   ;;  %s6380_s22 = smov 20  }
  0x1a   :  { %7199 = sst [smem:[#allocation13_spill]] %s6473_s6 }
  0x1b   :  { %s6493_s4 = sld [smem:[%s7159_s0 + %s6377_s28]]   ;;  %s6381_s28 = smov 21  }
  0x1d   :  { %7200 = sst [smem:[#allocation14_spill]] %s6478_s12 }
  0x1e   :  { %7201 = sst [smem:[#allocation15_spill]] %s6483_s20 }
  0x1f   :  { %7202 = sst [smem:[#allocation16_spill]] %s6488_s27 }
  0x20   :  { %s6498_s12 = sld [smem:[%s7159_s0 + %s6378_s7]]   ;;  %s6382_s7 = smov 22  }
  0x21   :  { %7203 = sst [smem:[#allocation17_spill]] %s6493_s4 }
  0x22   :  { %s6503_s20 = sld [smem:[%s7159_s0 + %s6379_s15]]   ;;  %s6383_s15 = smov 23  }
  0x23   :  { %s6508_s27 = sld [smem:[%s7159_s0 + %s6380_s22]]   ;;  %s6384_s22 = smov 24  }
  0x24   :  { %s6513_s4 = sld [smem:[%s7159_s0 + %s6381_s28]]   ;;  %s6385_s28 = smov 25  }
  0x26   :  { %7204 = sst [smem:[#allocation18_spill]] %s6498_s12 }
  0x27   :  { %s6518_s12 = sld [smem:[%s7159_s0 + %s6382_s7]]   ;;  %s6386_s7 = smov 26  }
  0x28   :  { %7205 = sst [smem:[#allocation19_spill]] %s6503_s20 }
  0x29   :  { %7206 = sst [smem:[#allocation20_spill]] %s6508_s27 }
  0x2a   :  { %7207 = sst [smem:[#allocation21_spill]] %s6513_s4 }
  0x2b   :  { %s6523_s20 = sld [smem:[%s7159_s0 + %s6383_s15]]   ;;  %s6387_s15 = smov 27  }
  0x2c   :  { %s6528_s27 = sld [smem:[%s7159_s0 + %s6384_s22]]   ;;  %s6388_s22 = smov 28  }
  0x2d   :  { %7208 = sst [smem:[#allocation22_spill]] %s6518_s12 }
  0x2e   :  { %s6533_s4 = sld [smem:[%s7159_s0 + %s6385_s28]]   ;;  %s6389_s28 = smov 29  }
  0x2f   :  { %s6538_s12 = sld [smem:[%s7159_s0 + %s6386_s7]]   ;;  %s6390_s7 = smov 30  }
  0x30   :  { %s6553_s6 = sld [smem:[%s7159_s0 + %s6389_s28]]   ;;  %s6393_s28 = smov 33  }
  0x31   :  { %7209 = sst [smem:[#allocation23_spill]] %s6523_s20 }
  0x32   :  { %7210 = sst [smem:[#allocation24_spill]] %s6528_s27 }
  0x33   :  { %s6543_s20 = sld [smem:[%s7159_s0 + %s6387_s15]]   ;;  %s6391_s15 = smov 31  }
  0x34   :  { %7211 = sst [smem:[#allocation25_spill]] %s6533_s4 }
  0x35   :  { %7212 = sst [smem:[#allocation26_spill]] %s6538_s12 }
  0x36   :  { %s6548_s27 = sld [smem:[%s7159_s0 + %s6388_s22]]   ;;  %s6392_s22 = smov 32  }
  0x37   :  { %7213 = sst [smem:[#allocation27_spill]] %s6553_s6 }
  0x38   :  { %s6558_s9 = sld [smem:[%s7159_s0 + %s6390_s7]]   ;;  %s6394_s7 = smov 34  }
  0x39   :  { %s6563_s14 = sld [smem:[%s7159_s0 + %s6391_s15]]  }
  0x3a   :  { %s6568_s8 = sld [smem:[%s7159_s0 + %s6392_s22]]  }
  0x3b   :  { %s6573_s30 = sld [smem:[%s7159_s0 + %s6393_s28]]  }
  0x3c   :  { %s6578_s24 = sld [smem:[%s7159_s0 + %s6394_s7]]  }
  0x3e   :  { %7214 = sst [smem:[#allocation28_spill]] %s6558_s9 }
  0x3f   :  { %7215 = sst [smem:[#allocation29_spill]] %s6563_s14 }
  0x40   :  { %7216 = sst [smem:[#allocation30_spill]] %s6568_s8 }
  0x41   :  { %74 = vsyncpa [#allocation3], 0 }
  0x42   :  { %76 = vsyncpa [#allocation3 + $0x1], 0  ;;  %s6580_s15 = smov 0   ;;  %s6582_s16 = smov 0  }
  0x43   :  { %s6584_s18 = smov 0   ;;  %s6586_s22 = smov 0  }
  0x44 LB: > { %s7217_s12 = sld [smem:[#allocation26_spill]]  ;;  %s6601_s0 = sadd.s32 4294967295, %s6359_s22   ;;  %s6347_s15 = sphi %s6580_s15, %s7245_s15   ;;  %s6359_s22 = sphi %s6586_s22, %s7248_s22   ;;  %s6355_s18 = sphi %s6584_s18, %s7247_s18   ;;  %s6351_s16 = sphi %s6582_s16, %s7246_s16  }
  0x45   : > { %s7218_s9 = sld [smem:[#allocation28_spill]]  ;;  %s5198_s23 = sadd.s32 4294967294, %s6359_s22  }
  0x46   : > { %s7219_s8 = sld [smem:[#allocation30_spill]]  ;;  %s6605_s26 = sadd.s32 1, %s6359_s22  }
  0x47   : > { %s7220_s6 = sld [smem:[#allocation27_spill]]  ;;  %s808_s28 = sadd.s32 1, %s6355_s18 }
  0x48   : > { %s7221_s4 = sld [smem:[#allocation25_spill]]  ;;  %s805_s1 = ssub.s32 %s6359_s22, %s6605_s26 }
  0x49   : > { %p818_p0 = scmp.ne.s32.totalorder %s6355_s18, %s6351_s16  ;;  %p806_p1 = scmp.eq.s32.totalorder %s805_s1, 0 }
  0x4a   : > { %p819_p2 = scmp.eq.s32.totalorder %s6601_s0, 1  ;;  %p824_p3 = scmp.ne.s32.totalorder %s6351_s16, %s6347_s15 }
  0x4b   : > { %p825_p4 = scmp.eq.s32.totalorder %s5198_s23, 1  ;;  %p5201_p7 = scmp.ge.s32.totalorder %s6359_s22, 1 }
  0x4c   : > { %s6616_s2 = scalar_select %p806_p1, %s6355_s18, %s808_s28  }
  0x4d   : > { %p6618_p5 = por %p819_p2, %p818_p0  ;;  %p6622_p6 = por %p825_p4, %p824_p3 }
  0x4e   : > { %p950_p8 = scmp.lt.s32.totalorder %s6359_s22, 3 }
  0x50   : > { %p951_p9 = pnand %p5201_p7, %p950_p8 }
  0x51   : > { %s7224_s13 = sld [smem:[#allocation7_spill]] (!%p951_p9)  ;;  %p1036_p10 = scmp.lt.s32.totalorder (!%p951_p9), %s6601_s0, 1 }
  0x52   : > { %954 = sbr.rel (%p951_p9) target bundleno = 8723 (0x2213), region = 156  ;;  %s7225_s5 = sld [smem:[#allocation5_spill]] (!%p951_p9) }
  0x53   : > { %s7226_s3 = sld [smem:[#allocation8_spill]] (!%p951_p9) }
  0x54   : > { %s7227_s14 = sld [smem:[#allocation29_spill]] (!%p951_p9) }
  0x55   : > { %s7228_s1 = sld [smem:[#allocation11_spill]] (!%p951_p9) }
  0x57   : > { %v1045_v0 = vld [vmem:[%s7224_s13] sm:$0x3]  ;;  %vm1052_vm0 = vcmask 1041408   ;;  %v6395_v1 = vmov 0.0   ;;  %vm6396_vm1 = vmmov 0   ;;  %s1037_s11 = scalar_select %p1036_p10, %s6601_s0, 1 }
  0x58   : > { %5645 = vmatprep.subr.bf16.mxu0 %v6395_v1  ;;  %v1054_v2 = vsel %vm1052_vm0, %v1045_v0, 0  ;;  %5647 = vmatprep.mubr.msk.bf16.mxu0 %vm6396_vm1, %v6395_v1  ;;  %vm1048_vm2 = vcmask 31744   ;;  %v6124_v6 = vld [vmem:[%s6428_s21 + $0x8] sm:$0xff]   ;;  %v6125_v7 = vld [vmem:[%s6428_s21] sm:$0xff]   ;;  %vm1121_vm3 = vcmask 261120   ;;  %vm1172_vm4 = vcmask 130048  }
  0x59   : > { %5646 = vmatpush3.bf16.msra.mxu0 %v1054_v2  ;;  %5651 = vmatprep.subr.bf16.mxu1 %v6395_v1  ;;  %s5454_s23 = sshll.u32 %s1037_s11, 4  ;;  %v1046_v9 = vld [vmem:[%s6423_s17] sm:$0xff]  ;;  %v1047_v11 = vld [vmem:[%s6423_s17 + $0x8] sm:$0xff]  ;;  %vm1642_vm6 = vcmask 1043456   ;;  %v1168_v60 = vld [vmem:[%s7221_s4 + $0x10] sm:$0xff]  ;;  %vm1443_vm7 = vcmask 64512  }
  0x5a   : > { %5655 = vmatprep.mubr.msk.bf16.mxu1 %vm6396_vm1, %v6395_v1  ;;  %5659 = vmatprep.subr.bf16.mxu0 %v6395_v1  ;;  %s1040_s28 = scalar_lea.vmem %s7225_s5, %s5454_s23  ;;  %v5206_v18 = vld [vmem:[%s6433_s25] ss:$0 sm:$0xff]  ;;  %v5211_v26 = vld [vmem:[%s6548_s27 + $0x4] sm:$0xf]  ;;  %v6126_v27 = vld [vmem:[%s7217_s12 + $0x8] sm:$0xff]   ;;  %vm2012_vm9 = vcmask 257024  }
  0x5b   : > { %v1042_v3 = vld [vmem:[%s1040_s28] sm:$0xff]  ;;  %v1043_v4 = vld [vmem:[%s1040_s28 + $0x8] sm:$0xff]  ;;  %5652 = vmatpush3.bf16.msra.mxu1 %v6124_v6  ;;  %v1169_v61 = vld [vmem:[%s7221_s4 + $0x18] sm:$0xf]  ;;  %s7229_s11 = sld [smem:[#allocation12_spill]]  ;;  %vm2405_vm10 = vcmask 1045504  }
  0x5c   : > { %v1044_v5 = vpack.c.bf16 %v1043_v4, %v1042_v3  ;;  %5653 = vmatprep.subr.bf16.mxu1 %v6395_v1  ;;  %v1171_v25 = vld [vmem:[%s6548_s27] sm:$0xf]  ;;  %v1167_v58 = vld [vmem:[%s7221_s4 + $0x8] sm:$0xff]  ;;  %v1441_v6 = vld [vmem:[%s7220_s6 + $0x10] sm:$0xff]  ;;  %s7230_s23 = sld [smem:[#allocation9_spill]]  ;;  %vm2349_vm11 = vcmask 228352  }
  0x5d   : > { %v6127_v28 = vld [vmem:[%s7217_s12] sm:$0xff]   ;;  %s7231_s28 = sld [smem:[#allocation10_spill]]  ;;  %vm2359_vm12 = vcmask 224256   ;;  %vm3188_vm13 = vcmask 523264   ;;  %vm5085_vm14 = vcmask 785408  }
  0x5e   : > { %5648 = vmatmul.mubr.msk.bf16.vlgmr.msra.gmra.mxu0 %vm1048_vm2, %v1044_v5  ;;  %v6672_v31 = vld [vmem:[%s6438_s29] sm:$0xff]   ;;  %v1440_v5 = vld [vmem:[%s7220_s6 + $0x8] sm:$0xff]  ;;  %s7236_s5 = sld [smem:[#allocation15_spill]] }
  0x5f   : > { %5661 = vmatprep.mubr.msk.bf16.mxu0 %vm6396_vm1, %v6395_v1  ;;  %5654 = vmatpush3.bf16.msra.mxu1 %v6125_v7  ;;  %v5219_v42 = vld [vmem:[%s6543_s20] ss:$0 sm:$0xff]  ;;  %v5233_v63 = vld [vmem:[%s7219_s8 + $0x2] sm:$0x3]  ;;  %s7240_s12 = sld [smem:[#allocation20_spill]] }
  0x60   : > { %5665 = vmatprep.subr.bf16.mxu1 %v6395_v1  ;;  %v1166_v57 = vld [vmem:[%s7221_s4] sm:$0xff]  ;;  %s7235_s4 = sld [smem:[#allocation17_spill]] }
  0x61   : > { %v1439_v62 = vld [vmem:[%s7220_s6] sm:$0xff]  ;;  %s7241_s13 = sld [smem:[#allocation21_spill]] }
  0x62   : > { %v6705_v0 = vld [vmem:[%s7226_s3] ss:$0 sm:$0xff]  ;;  %s7234_s3 = sld [smem:[#allocation14_spill]] }
 0x11e   : > { %v1090_v8 = vpop.f32.mrf.mxu0 }
 0x11f   : > { %v6648_v13 = vadd.f32 %v1090_v8, %v1046_v9  ;;  %v1442_v9 = vld [vmem:[%s7220_s6 + $0x18] sm:$0xf]  ;;  %s7237_s6 = sld [smem:[#allocation16_spill]] }
 0x120   : > { %v5649_v10 = vpop.f32.mrf.mxu0 }
 0x121   : > { %v1638_v10 = vld [vmem:[%s7219_s8] sm:$0x3]  ;;  %s7238_s8 = sld [smem:[#allocation19_spill]] }
 0x122   : > { %v1093_v12 = vpop.f32.mrf.mxu0 }
 0x123   : > { %v6650_v14 = vadd.f32 %v1093_v12, %v1047_v11 }
 0x124   : > { %v5650_v15 = vpop.f32.mrf.mxu0 }
 0x125   : > { %v1097_v16 = vpack.c.bf16 %v6650_v14, %v6648_v13  ;;  %v6129_v15 = vld [vmem:[%s7218_s9 + $0x8] sm:$0xff]  }
 0x127   : > { %5656 = vmatmul.mubr.msk.bf16.vlgmr.msra.gmra.mxu1 %vm1121_vm3, %v1097_v16 }
 0x128   : > { %5667 = vmatprep.mubr.msk.bf16.mxu1 %vm6396_vm1, %v6395_v1 }
 0x1e7   : > { %v1159_v17 = vpop.f32.mrf.mxu1 }
 0x1e8   : > { %v1160_v21 = vadd.f32 %v5206_v18, %v1159_v17 }
 0x1e9   : > { %v5657_v19 = vpop.f32.mrf.mxu1 }
 0x1eb   : > { %v1162_v20 = vpop.f32.mrf.mxu1 }
 0x1ec   : > { %v1163_v22 = vadd.f32 %v5206_v18, %v1162_v20  ;;  %v6130_v20 = vld [vmem:[%s7218_s9] sm:$0xff]   ;;  %s7239_s9 = sld [smem:[#allocation18_spill]] }
 0x1ed   : > { %v5658_v23 = vpop.f32.mrf.mxu1 }
 0x1ee   : > { %v1170_v24 = vpack.c.bf16 %v1163_v22, %v1160_v21 }
 0x1f0   : > { %5660 = vmatpush3.bf16.msra.mxu0 %v1170_v24  ;;  %5666 = vmatpush3.bf16.msra.mxu1 %v1170_v24 }
 0x1f1   : > { %5671 = vmatprep.subr.bf16.mxu0 %v6395_v1  ;;  %5677 = vmatprep.subr.bf16.mxu1 %v6395_v1 }
 0x1f3   : > { %5662 = vmatmul.mubr.msk.bf16.vlgmr.msra.gmra.mxu0 %vm1172_vm4, %v1171_v25  ;;  %5668 = vmatmul.mubr.msk.bf16.vlgmr.msra.gmra.mxu1 %vm1172_vm4, %v5211_v26 }
 0x1f4   : > { %5672 = vmatpush3.bf16.msra.mxu0 %v6126_v27  ;;  %5673 = vmatprep.mubr.msk.bf16.mxu0 %vm6396_vm1, %v6395_v1 }
 0x1f5   : > { %5679 = vmatprep.mubr.msk.bf16.mxu1 %vm6396_vm1, %v6395_v1  ;;  %5683 = vmatprep.subr.bf16.mxu0 %v6395_v1 }
 0x1f6   : > { %5678 = vmatpush3.bf16.msra.mxu1 %v6127_v28 }
 0x2b3   : > { %v1210_v29 = vpop.f32.mrf.mxu0  ;;  %v1258_v30 = vpop.f32.mrf.mxu1 }
 0x2b4   : > { %v1216_v32 = vpack.c.bf16 %v1210_v29, %v1210_v29  ;;  %v1264_v33 = vpack.c.bf16 %v1258_v30, %v1258_v30 }
 0x2b5   : > { %v5663_v34 = vpop.f32.mrf.mxu0  ;;  %v5669_v35 = vpop.f32.mrf.mxu1 }
 0x2b6   : > { %5674 = vmatmul.mubr.msk.bf16.vlgmr.msra.gmra.mxu0 %vm1172_vm4, %v1264_v33  ;;  %5680 = vmatmul.mubr.msk.bf16.vlgmr.msra.gmra.mxu1 %vm1172_vm4, %v1216_v32 }
 0x2b7   : > { %5684 = vmatpush3.bf16.msra.mxu0 %v6672_v31  ;;  %v1213_v36 = vpop.f32.mrf.mxu0  ;;  %v1261_v37 = vpop.f32.mrf.mxu1  ;;  %5685 = vmatprep.mubr.msk.bf16.mxu0 %vm6396_vm1, %v6395_v1 }
 0x2b8   : > { %5697 = vmatprep.subr.mxu0 %v6650_v14  ;;  %5691 = vmatprep.mubr.msk.f32.mxu1 %vm1443_vm7, %v1439_v62 }
 0x2b9   : > { %v5664_v38 = vpop.f32.mrf.mxu0  ;;  %v5670_v39 = vpop.f32.mrf.mxu1 }
 0x376   : > { %v1311_v40 = vpop.f32.mrf.mxu0  ;;  %v1360_v41 = vpop.f32.mrf.mxu1 }
 0x377   : > { %v1361_v43 = vadd.f32 %v1360_v41, %v1311_v40 }
 0x378   : > { %v5675_v44 = vpop.f32.mrf.mxu0  ;;  %v5681_v45 = vpop.f32.mrf.mxu1 }
 0x379   : > { %v1373_v46 = vadd.f32 %v5219_v42, %v1361_v43 }
 0x37a   : > { %v1314_v47 = vpop.f32.mrf.mxu0  ;;  %v1363_v48 = vpop.f32.mrf.mxu1 }
 0x37b   : > { %v1375_v49 = vmin.f32 %v1373_v46, 0.0  ;;  %vm1374_vm5 = vcmp.gt.f32.partialorder %v1373_v46, 0.0  ;;  %v1893_v47 = vld [vmem:[%s6573_s30] sm:$0xff] }
 0x37c   : > { %v5676_v50 = vpop.f32.mrf.mxu0  ;;  %v5682_v51 = vpop.f32.mrf.mxu1 }
 0x37d   : > { %v1376_v52 = vmul.f32 1.442695, %v1375_v49  ;;  %v1894_v51 = vld [vmem:[%s6573_s30 + $0x8] sm:$0xff] }
 0x37f   : > { %6171 = vpow2.f32 %v1376_v52  ;;  %v1895_v52 = vld [vmem:[%s6573_s30 + $0x10] sm:$0xff] }
 0x38c   : > { %v6172_v53 = vpop.eup %6171 }
 0x38d   : > { %v5220_v54 = vadd.f32 -1.0, %v6172_v53 }
 0x38f   : > { %v1379_v55 = vsel %vm1374_vm5, %v1373_v46, %v5220_v54 }
 0x390   : > { %v1380_v56 = vpack.c.bf16 %v1379_v55, %v1379_v55  ;;  %v1896_v55 = vld [vmem:[%s6573_s30 + $0x18] sm:$0xf] }
 0x392   : > { %5686 = vmatmul.mubr.msk.bf16.vlgmr.msra.gmra.mxu0 %vm1172_vm4, %v1380_v56  ;;  %v1643_v59 = vsel %vm1642_vm6, %v1380_v56, 0 }
 0x393   : > { %5698 = vmatpush3.msra.mxu0 %v6650_v14  ;;  %5701 = vmatprep.mubr.msk.f32.mxu0 %vm1172_vm4, %v1166_v57 }
 0x394   : > { %5699 = vmatprep.subr.mxu0 %v6648_v13 }
 0x395   : > { %5700 = vmatpush3.msra.mxu0 %v6648_v13 }
 0x396   : > { %5713 = vmatprep.subr.bf16.mxu0 %v6395_v1 }
 0x39a   : > { %5702 = vmatmul.mubr.msk.f32.vlgmr.msra.gmra.mxu0 %vm1172_vm4, %v1167_v58 }
 0x39b   : > { %5714 = vmatpush3.bf16.msra.mxu0 %v1643_v59  ;;  %5704 = vmatprep.mubr.msk.f32.mxu0 %vm1172_vm4, %v1168_v60 }
 0x39c   : > { %5725 = vmatprep.subr.bf16.mxu0 %v6395_v1 }
 0x39e   : > { %5705 = vmatmul.mubr.msk.f32.gmra.mxu0 %vm1172_vm4, %v1169_v61 }
 0x39f   : > { %5715 = vmatprep.mubr.msk.bf16.mxu0 %vm6396_vm1, %v6395_v1 }
 0x3a2   : > { %5716 = vmatmul.mubr.msk.bf16.vlgmr.msra.gmra.mxu0 %vm1443_vm7, %v5233_v63 }
 0x3a3   : > { %5727 = vmatprep.mubr.msk.bf16.mxu0 %vm6396_vm1, %v6395_v1  ;;  %5726 = vmatpush3.bf16.msra.mxu0 %v6130_v20 }
 0x452   : > { %v1433_v2 = vpop.f32.mrf.mxu0 }
 0x453   : > { %v1434_v3 = vadd.f32 %v6705_v0, %v1433_v2 }
 0x454   : > { %v5687_v4 = vpop.f32.mrf.mxu0 }
 0x455   : > { %5689 = vmatprep.subr.mxu1 %v1434_v3 }
 0x456   : > { %v1436_v7 = vpop.f32.mrf.mxu0  ;;  %5690 = vmatpush3.msra.mxu1 %v1434_v3 }
 0x457   : > { %5692 = vmatmul.mubr.msk.f32.vlgmr.msra.gmra.mxu1 %vm1443_vm7, %v1440_v5  ;;  %5707 = vmatprep.subr.bf16.mxu1 %v6395_v1 }
 0x458   : > { %v5688_v8 = vpop.f32.mrf.mxu0  ;;  %5708 = vmatpush3.bf16.msra.mxu1 %v1643_v59  ;;  %5694 = vmatprep.mubr.msk.f32.mxu1 %vm1443_vm7, %v1441_v6 }
 0x459   : > { %5719 = vmatprep.subr.bf16.mxu1 %v6395_v1 }
 0x45a   : > { %v6722_v11 = vpop.f32.mrf.mxu0 }
 0x45b   : > { %5695 = vmatmul.mubr.msk.f32.gmra.mxu1 %vm1443_vm7, %v1442_v9 }
 0x45c   : > { %5709 = vmatprep.mubr.msk.bf16.mxu1 %vm6396_vm1, %v6395_v1  ;;  %v1619_v12 = vpop.f32.mrf.mxu0 }
 0x45e   : > { %v6724_v13 = vpop.f32.mrf.mxu0 }
 0x45f   : > { %5710 = vmatmul.mubr.msk.bf16.vlgmr.msra.gmra.mxu1 %vm1443_vm7, %v1638_v10 }
 0x460   : > { %5721 = vmatprep.mubr.msk.bf16.mxu1 %vm6396_vm1, %v6395_v1  ;;  %v6726_v14 = vpop.f32.mrf.mxu0  ;;  %5720 = vmatpush3.bf16.msra.mxu1 %v6129_v15 }
 0x461   : > { %5731 = vmatprep.subr.bf16.mxu1 %v6395_v1 }
 0x462   : > { %v1727_v16 = vpop.f32.mrf.mxu0 }
 0x463   : > { %v1733_v17 = vpack.c.bf16 %v1727_v16, %v1727_v16 }
 0x464   : > { %v5717_v18 = vpop.f32.mrf.mxu0 }
 0x466   : > { %v1730_v19 = vpop.f32.mrf.mxu0 }
 0x467   : > { %5722 = vmatmul.mubr.msk.bf16.vlgmr.msra.gmra.mxu1 %vm1172_vm4, %v1733_v17 }
 0x468   : > { %5732 = vmatpush3.bf16.msra.mxu1 %v6672_v31  ;;  %5733 = vmatprep.mubr.msk.bf16.mxu1 %vm6396_vm1, %v6395_v1  ;;  %v5718_v21 = vpop.f32.mrf.mxu0  ;;  %v5241_v1 = vld [vmem:[%s7227_s14] ss:$0 sm:$0xff]  ;;  %s7242_s14 = sld [smem:[#allocation22_spill]] }
 0x517   : > { %v5693_v22 = vpop.f32.mrf.mxu1 }
 0x518   : > { %v1625_v59 = vadd.f32 %v6722_v11, %v5693_v22 }
 0x519   : > { %v1522_v23 = vpop.f32.mrf.mxu1 }
 0x51a   : > { %v1620_v57 = vadd.f32 %v1619_v12, %v1522_v23 }
 0x51b   : > { %v5696_v24 = vpop.f32.mrf.mxu1 }
 0x51c   : > { %v1635_v3 = vadd.f32 %v6724_v13, %v5696_v24 }
 0x51d   : > { %v1532_v25 = vpop.f32.mrf.mxu1 }
 0x51e   : > { %v1630_v62 = vadd.f32 %v6726_v14, %v1532_v25 }
 0x51f   : > { %v1679_v26 = vpop.f32.mrf.mxu1 }
 0x520   : > { %v1685_v27 = vpack.c.bf16 %v1679_v26, %v1679_v26 }
 0x521   : > { %v5711_v28 = vpop.f32.mrf.mxu1 }
 0x522   : > { %5728 = vmatmul.mubr.msk.bf16.vlgmr.msra.gmra.mxu0 %vm1172_vm4, %v1685_v27 }
 0x523   : > { %v1682_v29 = vpop.f32.mrf.mxu1  ;;  %5739 = vmatprep.mubr.msk.f32.mxu0 %vm1048_vm2, %v1893_v47  ;;  %v5249_v47 = vld [vmem:[%s7230_s23] ss:$0 sm:$0xff]  ;;  %s7232_s23 = sld [smem:[#allocation6_spill]] }
 0x524   : > { %v6131_v29 = vld [vmem:[%s6458_s19 + $0x8] sm:$0xff]  }
 0x525   : > { %v5712_v30 = vpop.f32.mrf.mxu1  ;;  %5745 = vmatprep.subr.bf16.mxu1 %v6131_v29 }
 0x526   : > { %v6132_v30 = vld [vmem:[%s7228_s1 + $0x8] sm:$0xff]  }
 0x527   : > { %v1780_v32 = vpop.f32.mrf.mxu1 }
 0x529   : > { %v5723_v33 = vpop.f32.mrf.mxu1 }
 0x52a   : > { %v6134_v33 = vld [vmem:[%s7228_s1] sm:$0xff]  }
 0x52b   : > { %v1783_v31 = vpop.f32.mrf.mxu1 }
 0x52c   : > { %v6135_v31 = vld [vmem:[%s7229_s11 + $0x8] sm:$0xff]  }
 0x52d   : > { %v5724_v34 = vpop.f32.mrf.mxu1 }
 0x5e2   : > { %v1829_v35 = vpop.f32.mrf.mxu0 }
 0x5e3   : > { %v1830_v36 = vadd.f32 %v1829_v35, %v1780_v32  ;;  %v6133_v32 = vld [vmem:[%s6458_s19] sm:$0xff]  }
 0x5e4   : > { %v5729_v37 = vpop.f32.mrf.mxu0 }
 0x5e5   : > { %v1842_v38 = vadd.f32 %v5241_v1, %v1830_v36 }
 0x5e6   : > { %v1832_v39 = vpop.f32.mrf.mxu0 }
 0x5e7   : > { %v1844_v40 = vmin.f32 %v1842_v38, 0.0  ;;  %vm1843_vm8 = vcmp.gt.f32.partialorder %v1842_v38, 0.0 }
 0x5e8   : > { %v5730_v41 = vpop.f32.mrf.mxu0 }
 0x5e9   : > { %v1845_v42 = vmul.f32 1.442695, %v1844_v40 }
 0x5eb   : > { %6173 = vpow2.f32 %v1845_v42 }
 0x5f8   : > { %v6174_v43 = vpop.eup %6173 }
 0x5f9   : > { %v5242_v44 = vadd.f32 -1.0, %v6174_v43 }
 0x5fb   : > { %v1848_v45 = vsel %vm1843_vm8, %v1842_v38, %v5242_v44 }
 0x5fc   : > { %v1849_v46 = vpack.c.bf16 %v1848_v45, %v1848_v45 }
 0x5fe   : > { %5734 = vmatmul.mubr.msk.bf16.vlgmr.msra.gmra.mxu1 %vm1172_vm4, %v1849_v46 }
 0x5ff   : > { %5746 = vmatpush3.bf16.msra.mxu1 %v6131_v29 }
 0x600   : > { %5747 = vmatprep.subr.bf16.mxu1 %v6133_v32 }
 0x603   : > { %5748 = vmatpush3.bf16.msra.mxu1 %v6133_v32 }
 0x604   : > { %5761 = vmatprep.subr.bf16.mxu1 %v6135_v31 }
 0x6be   : > { %v1887_v48 = vpop.f32.mrf.mxu1 }
 0x6bf   : > { %v1888_v49 = vadd.f32 %v6705_v0, %v1887_v48 }
 0x6c0   : > { %v5735_v50 = vpop.f32.mrf.mxu1 }
 0x6c1   : > { %5737 = vmatprep.subr.msk.mxu0 %vm1642_vm6, %v1888_v49 }
 0x6c2   : > { %v1890_v53 = vpop.f32.mrf.mxu1  ;;  %5738 = vmatpush3.msk.msra.mxu0 %vm1642_vm6, %v1888_v49 }
 0x6c3   : > { %5740 = vmatmul.mubr.msk.f32.vlgmr.msra.gmra.mxu0 %vm1048_vm2, %v1894_v51  ;;  %5753 = vmatprep.subr.bf16.mxu0 %v6132_v30  ;;  %v5250_v53 = vld [vmem:[%s7231_s28] ss:$0 sm:$0xff]  ;;  %s7233_s28 = sld [smem:[#allocation13_spill]] }
 0x6c4   : > { %v5736_v54 = vpop.f32.mrf.mxu1  ;;  %5742 = vmatprep.mubr.msk.f32.mxu0 %vm1048_vm2, %v1895_v52  ;;  %5754 = vmatpush3.bf16.msra.mxu0 %v6132_v30 }
 0x6c5   : > { %5755 = vmatprep.subr.bf16.mxu0 %v6134_v33 }
 0x6c7   : > { %5743 = vmatmul.mubr.msk.f32.gmra.mxu0 %vm1048_vm2, %v1896_v55 }
 0x6c8   : > { %5756 = vmatpush3.bf16.msra.mxu0 %v6134_v33  ;;  %v6818_v33 = vld [vmem:[%s7232_s23 + $0x8] sm:$0xff] }
 0x783   : > { %v5741_v56 = vpop.f32.mrf.mxu0 }
 0x784   : > { %v1998_v63 = vadd.f32 %v5741_v56, %v1625_v59 }
 0x785   : > { %v1978_v58 = vpop.f32.mrf.mxu0 }
 0x786   : > { %v1997_v60 = vadd.f32 %v1978_v58, %v1620_v57  ;;  %v2006_v7 = vsel %vm1121_vm3, %v1998_v63, 0.0 }
 0x787   : > { %v5744_v61 = vpop.f32.mrf.mxu0 }
 0x788   : > { %v2003_v0 = vsel %vm1121_vm3, %v1997_v60, 0.0  ;;  %v2000_v5 = vadd.f32 %v5744_v61, %v1635_v3 }
 0x789   : > { %v1988_v2 = vpop.f32.mrf.mxu0  ;;  %2004 = vadd.xlane.f32.xlu0 %v2003_v0 }
 0x78a   : > { %v1999_v4 = vadd.f32 %v1988_v2, %v1630_v62  ;;  %v2013_v8 = vsel %vm2012_vm9, %v2000_v5, 0.0  ;;  %v6136_v2 = vld [vmem:[%s7229_s11] sm:$0xff]  }
 0x78c   : > { %v2009_v6 = vsel %vm1121_vm3, %v1999_v4, 0.0 }
 0x78d   : > { %2010 = vadd.xlane.f32.xlu1 %v2009_v6  ;;  %2007 = vadd.xlane.f32.xlu0 %v2006_v7 }
 0x791   : > { %2014 = vadd.xlane.f32.xlu1 %v2013_v8 }
 0x812   : > { %v2005_v9 = vpop.xlane.xlu0 %2004 }
 0x813   : > { %v2017_v10 = vmul.f32 0.03125, %v2005_v9 }
 0x815   : > { %v2021_v11 = vsub.f32 %v1997_v60, %v2017_v10 }
 0x816   : > { %v2011_v12 = vpop.xlane.xlu1 %2010  ;;  %v2008_v14 = vpop.xlane.xlu0 %2007 }
 0x817   : > { %v2019_v15 = vmul.f32 0.03125, %v2011_v12  ;;  %v2018_v16 = vmul.f32 0.03125, %v2008_v14  ;;  %v2025_v13 = vmul.f32 %v2021_v11, %v2021_v11 }
 0x819   : > { %v2023_v17 = vsub.f32 %v1999_v4, %v2019_v15  ;;  %v2022_v18 = vsub.f32 %v1998_v63, %v2018_v16  ;;  %v2029_v19 = vsel %vm1121_vm3, %v2025_v13, 0.0 }
 0x81a   : > { %v2015_v20 = vpop.xlane.xlu1 %2014  ;;  %2030 = vadd.xlane.f32.xlu0 %v2029_v19  ;;  %v6137_v19 = vld [vmem:[%s7228_s1 + $0x18] sm:$0xff]  }
 0x81b   : > { %v2020_v21 = vmul.f32 0.03125, %v2015_v20  ;;  %v2027_v22 = vmul.f32 %v2023_v17, %v2023_v17  ;;  %v2026_v23 = vmul.f32 %v2022_v18, %v2022_v18 }
 0x81d   : > { %v2024_v24 = vsub.f32 %v2000_v5, %v2020_v21  ;;  %v2035_v25 = vsel %vm1121_vm3, %v2027_v22, 0.0  ;;  %v2032_v26 = vsel %vm1121_vm3, %v2026_v23, 0.0 }
 0x81e   : > { %2036 = vadd.xlane.f32.xlu0 %v2035_v25  ;;  %2033 = vadd.xlane.f32.xlu1 %v2032_v26  ;;  %v6138_v25 = vld [vmem:[%s7228_s1 + $0x10] sm:$0xff]  }
 0x81f   : > { %v2028_v27 = vmul.f32 %v2024_v24, %v2024_v24 }
 0x821   : > { %v2038_v28 = vsel %vm2012_vm9, %v2028_v27, 0.0  ;;  %v6811_v27 = vld [vmem:[%s7232_s23] sm:$0xff] }
 0x822   : > { %2039 = vadd.xlane.f32.xlu1 %v2038_v28  ;;  %v6814_v28 = vld [vmem:[%s7232_s23 + $0x10] sm:$0xff] }
 0x8a3   : > { %v2031_v34 = vpop.xlane.xlu0 %2030 }
 0x8a4   : > { %v2041_v35 = vmul.f32 0.03125, %v2031_v34 }
 0x8a6   : > { %v2045_v1 = vadd.f32 1e-05, %v2041_v35  ;;  %v6823_v35 = vld [vmem:[%s7232_s23 + $0x18] sm:$0xf] }
 0x8a7   : > { %v2034_v36 = vpop.xlane.xlu1 %2033  ;;  %v2037_v37 = vpop.xlane.xlu0 %2036 }
 0x8a8   : > { %6175 = vrsqrt.f32 %v2045_v1  ;;  %v2042_v38 = vmul.f32 0.03125, %v2034_v36  ;;  %v2043_v39 = vmul.f32 0.03125, %v2037_v37 }
 0x8aa   : > { %v2046_v40 = vadd.f32 1e-05, %v2042_v38  ;;  %v2047_v41 = vadd.f32 1e-05, %v2043_v39 }
 0x8ab   : > { %v2040_v42 = vpop.xlane.xlu1 %2039 }
 0x8ac   : > { %6177 = vrsqrt.f32 %v2046_v40  ;;  %v2044_v43 = vmul.f32 0.03125, %v2040_v42 }
 0x8ad   : > { %6179 = vrsqrt.f32 %v2047_v41 }
 0x8ae   : > { %v2048_v44 = vadd.f32 1e-05, %v2044_v43 }
 0x8b0   : > { %6181 = vrsqrt.f32 %v2048_v44 }
 0x8b5   : > { %v6176_v45 = vpop.eup %6175 }
 0x8b6   : > { %v2053_v46 = vmul.f32 %v6176_v45, %v2021_v11 }
 0x8b8   : > { %v2063_v50 = vmul.f32 %v5249_v47, %v2053_v46 }
 0x8b9   : > { %v6178_v48 = vpop.eup %6177 }
 0x8ba   : > { %v6180_v49 = vpop.eup %6179  ;;  %v2054_v51 = vmul.f32 %v6178_v48, %v2022_v18  ;;  %v6767_v58 = vadd.f32 %v5250_v53, %v2063_v50 }
 0x8bb   : > { %v2055_v52 = vmul.f32 %v6180_v49, %v2023_v17 }
 0x8bc   : > { %v2064_v54 = vmul.f32 %v5249_v47, %v2054_v51 }
 0x8bd   : > { %v6182_v55 = vpop.eup %6181  ;;  %v2065_v56 = vmul.f32 %v5249_v47, %v2055_v52 }
 0x8be   : > { %v2056_v57 = vmul.f32 %v6182_v55, %v2024_v24  ;;  %v6769_v59 = vadd.f32 %v5250_v53, %v2064_v54 }
 0x8bf   : > { %v6779_v62 = vadd.f32 %v5250_v53, %v2065_v56 }
 0x8c0   : > { %v2066_v60 = vmul.f32 %v5249_v47, %v2056_v57  ;;  %v6773_v61 = vpack.c.bf16 %v6769_v59, %v6767_v58 }
 0x8c2   : > { %5749 = vmatprep.mubr.msk.bf16.mxu1 %vm1121_vm3, %v6773_v61  ;;  %5757 = vmatprep.mubr.msk.bf16.mxu0 %vm1121_vm3, %v6773_v61  ;;  %v6781_v63 = vadd.f32 %v5250_v53, %v2066_v60 }
 0x8c4   : > { %v6785_v0 = vpack.c.bf16 %v6781_v63, %v6779_v62 }
 0x8c6   : > { %5750 = vmatmul.mubr.msk.bf16.vlgmr.msra.gmra.mxu1 %vm1121_vm3, %v6785_v0  ;;  %5758 = vmatmul.mubr.msk.bf16.vlgmr.msra.gmra.mxu0 %vm1121_vm3, %v6785_v0 }
 0x8c7   : > { %5762 = vmatpush3.bf16.msra.mxu1 %v6135_v31  ;;  %5765 = vmatprep.mubr.msk.bf16.mxu1 %vm1121_vm3, %v6773_v61 }
 0x8c8   : > { %5763 = vmatprep.subr.bf16.mxu1 %v6136_v2 }
 0x8cb   : > { %5764 = vmatpush3.bf16.msra.mxu1 %v6136_v2 }
 0x8ce   : > { %5766 = vmatmul.mubr.msk.bf16.vlgmr.msra.gmra.mxu1 %vm1121_vm3, %v6785_v0 }
 0x986   : > { %v5751_v3 = vpop.f32.mrf.mxu1  ;;  %v5759_v4 = vpop.f32.mrf.mxu0 }
 0x988   : > { %v2139_v5 = vpop.f32.mrf.mxu1  ;;  %v2204_v6 = vpop.f32.mrf.mxu0 }
 0x98a   : > { %v5752_v7 = vpop.f32.mrf.mxu1  ;;  %v5760_v8 = vpop.f32.mrf.mxu0 }
 0x98b   : > { %v2287_v9 = vpack.c.bf16 %v5760_v8, %v5759_v4  ;;  %v2285_v24 = vpack.c.bf16 %v5752_v7, %v5751_v3 }
 0x98c   : > { %v2142_v10 = vpop.f32.mrf.mxu1  ;;  %v2207_v11 = vpop.f32.mrf.mxu0 }
 0x98d   : > { %v2298_v12 = vsel %vm1172_vm4, %v2287_v9, 0  ;;  %v2284_v14 = vpack.c.bf16 %v2142_v10, %v2139_v5  ;;  %v2286_v15 = vpack.c.bf16 %v2207_v11, %v2204_v6  ;;  %6035 = vmatprep.subr.msk.bf16.mxu0 %vm1172_vm4, %v2287_v9 }
 0x98e   : > { %v5767_v16 = vpop.f32.mrf.mxu1  ;;  %5770 = vmatpush3.bf16.xpose.msra.mxu0 %v2298_v12  ;;  %v6139_v12 = vld [vmem:[%s6458_s19 + $0x18] sm:$0xff]  }
 0x98f   : > { %6036 = vmatprep.subr.msk.bf16.mxu0 %vm1172_vm4, %v2286_v15  ;;  %5773 = vmatprep.mubr.msk.bf16.mxu0 %vm1172_vm4, %v2284_v14  ;;  %v2295_v21 = vsel %vm1172_vm4, %v2286_v15, 0 }
 0x990   : > { %v2269_v13 = vpop.f32.mrf.mxu1 }
 0x992   : > { %v5768_v17 = vpop.f32.mrf.mxu1 }
 0x993   : > { %v2398_v18 = vpack.c.bf16 %v5768_v17, %v5767_v16 }
 0x994   : > { %v2272_v20 = vpop.f32.mrf.mxu1 }
 0x995   : > { %v2407_v22 = vsel %vm2405_vm10, %v2398_v18, 0  ;;  %v2397_v23 = vpack.c.bf16 %v2272_v20, %v2269_v13  ;;  %6037 = vmatprep.subr.msk.bf16.mxu1 %vm2405_vm10, %v2398_v18 }
 0x996   : > { %5772 = vmatpush3.bf16.xpose.msra.mxu0 %v2295_v21  ;;  %5778 = vmatpush3.bf16.msra.mxu1 %v2407_v22 }
 0x997   : > { %5779 = vmatprep.subr.bf16.mxu1 %v2397_v23  ;;  %5793 = vmatprep.subr.bf16.mxu0 %v6137_v19 }
 0x99a   : > { %5780 = vmatpush3.bf16.msra.mxu1 %v2397_v23 }
 0x99b   : > { %5785 = vmatprep.subr.bf16.mxu1 %v6139_v12 }
 0x99d   : > { %5774 = vmatmul.mubr.msk.bf16.vlgmr.msra.gmra.mxu0 %vm1172_vm4, %v2285_v24 }
 0x99e   : > { %5794 = vmatpush3.bf16.msra.mxu0 %v6137_v19  ;;  %5797 = vmatprep.mubr.msk.bf16.mxu0 %vm1121_vm3, %v6773_v61 }
 0x99f   : > { %5795 = vmatprep.subr.bf16.mxu0 %v6138_v25 }
 0x9a2   : > { %5796 = vmatpush3.bf16.msra.mxu0 %v6138_v25 }
 0x9a5   : > { %5798 = vmatmul.mubr.msk.bf16.vlgmr.msra.gmra.mxu0 %vm1121_vm3, %v6785_v0 }
 0xa5d   : > { %v5775_v26 = vpop.f32.mrf.mxu0 }
 0xa5e   : > { %v2343_v31 = vadd.f32 %v5775_v26, %v6814_v28 }
 0xa5f   : > { %v2334_v29 = vpop.f32.mrf.mxu0 }
 0xa60   : > { %v2335_v30 = vadd.f32 %v2334_v29, %v6811_v27  ;;  %v2356_v40 = vsel %vm2349_vm11, %v2343_v31, -inf  ;;  %v6140_v29 = vld [vmem:[%s6458_s19 + $0x10] sm:$0xff]  }
 0xa61   : > { %v5776_v32 = vpop.f32.mrf.mxu0 }
 0xa62   : > { %v2350_v34 = vsel %vm2349_vm11, %v2335_v30, -inf  ;;  %v2346_v38 = vadd.f32 %v5776_v32, %v6823_v35  ;;  %v6142_v32 = vld [vmem:[%s7229_s11 + $0x10] sm:$0xff]  }
 0xa63   : > { %v2337_v1 = vpop.f32.mrf.mxu0  ;;  %2351 = vmax.xlane.f32.xlu0 %v2350_v34 }
 0xa64   : > { %v2338_v36 = vadd.f32 %v2337_v1, %v6818_v33  ;;  %v2360_v44 = vsel %vm2359_vm12, %v2346_v38, -inf }
 0xa65   : > { %v5799_v37 = vpop.f32.mrf.mxu0 }
 0xa66   : > { %v2353_v39 = vsel %vm2349_vm11, %v2338_v36, -inf }
 0xa67   : > { %v2579_v41 = vpop.f32.mrf.mxu0  ;;  %2354 = vmax.xlane.f32.xlu1 %v2353_v39  ;;  %2357 = vmax.xlane.f32.xlu0 %v2356_v40 }
 0xa69   : > { %v5800_v42 = vpop.f32.mrf.mxu0 }
 0xa6a   : > { %v2663_v43 = vpack.c.bf16 %v5800_v42, %v5799_v37 }
 0xa6b   : > { %v2582_v45 = vpop.f32.mrf.mxu0  ;;  %2361 = vmax.xlane.f32.xlu1 %v2360_v44 }
 0xa6c   : > { %v2674_v46 = vsel %vm1172_vm4, %v2663_v43, 0  ;;  %v2662_v47 = vpack.c.bf16 %v2582_v45, %v2579_v41  ;;  %6038 = vmatprep.subr.msk.bf16.mxu0 %vm1172_vm4, %v2663_v43 }
 0xa6d   : > { %5810 = vmatpush3.bf16.xpose.msra.mxu0 %v2674_v46 }
 0xa6e   : > { %6039 = vmatprep.subr.msk.bf16.mxu0 %vm1172_vm4, %v2662_v47  ;;  %v2671_v48 = vsel %vm1172_vm4, %v2662_v47, 0 }
 0xa75   : > { %5812 = vmatpush3.bf16.xpose.msra.mxu0 %v2671_v48 }
 0xaec   : > { %v2352_v49 = vpop.xlane.xlu0 %2351 }
 0xaed   : > { %v2363_v50 = vsub.f32 %v2335_v30, %v2352_v49  ;;  %v6141_v30 = vld [vmem:[%s7229_s11 + $0x18] sm:$0xff]  }
 0xaef   : > { %v2367_v51 = vmul.f32 1.442695, %v2363_v50 }
 0xaf0   : > { %v2355_v52 = vpop.xlane.xlu1 %2354  ;;  %v2358_v53 = vpop.xlane.xlu0 %2357 }
 0xaf1   : > { %6183 = vpow2.f32 %v2367_v51  ;;  %v2364_v54 = vsub.f32 %v2338_v36, %v2355_v52  ;;  %v2365_v55 = vsub.f32 %v2343_v31, %v2358_v53  ;;  %v6143_v31 = vld [vmem:[%s7233_s28] sm:$0xff]  }
 0xaf2   : > { %5831 = vmatprep.subr.bf16.mxu0 %v6143_v31 }
 0xaf3   : > { %v2369_v56 = vmul.f32 1.442695, %v2364_v54  ;;  %v2371_v57 = vmul.f32 1.442695, %v2365_v55 }
 0xaf4   : > { %v2362_v60 = vpop.xlane.xlu1 %2361 }
 0xaf5   : > { %6185 = vpow2.f32 %v2369_v56  ;;  %v2366_v2 = vsub.f32 %v2346_v38, %v2362_v60 }
 0xaf6   : > { %6187 = vpow2.f32 %v2371_v57 }
 0xaf7   : > { %v2373_v3 = vmul.f32 1.442695, %v2366_v2 }
 0xaf9   : > { %6189 = vpow2.f32 %v2373_v3 }
 0xafe   : > { %v6184_v4 = vpop.eup %6183 }
 0xaff   : > { %v2375_v5 = vsel %vm2349_vm11, %v6184_v4, 0.0 }
 0xb00   : > { %2376 = vadd.xlane.f32.xlu0 %v2375_v5 }
 0xb02   : > { %v6186_v6 = vpop.eup %6185 }
 0xb03   : > { %v6188_v7 = vpop.eup %6187  ;;  %v2378_v8 = vsel %vm2349_vm11, %v6186_v6, 0.0 }
 0xb04   : > { %2379 = vadd.xlane.f32.xlu1 %v2378_v8  ;;  %v2381_v9 = vsel %vm2349_vm11, %v6188_v7, 0.0 }
 0xb05   : > { %2382 = vadd.xlane.f32.xlu0 %v2381_v9 }
 0xb06   : > { %v6190_v10 = vpop.eup %6189 }
 0xb07   : > { %v2384_v11 = vsel %vm2359_vm12, %v6190_v10, 0.0 }
 0xb08   : > { %2385 = vadd.xlane.f32.xlu1 %v2384_v11 }
 0xb89   : > { %v2377_v14 = vpop.xlane.xlu0 %2376 }
 0xb8a   : > { %6191 = vrcp.f32 %v2377_v14 }
 0xb8d   : > { %v2380_v15 = vpop.xlane.xlu1 %2379 }
 0xb8e   : > { %6193 = vrcp.f32 %v2380_v15  ;;  %v2383_v16 = vpop.xlane.xlu0 %2382 }
 0xb8f   : > { %6195 = vrcp.f32 %v2383_v16 }
 0xb91   : > { %v2386_v13 = vpop.xlane.xlu1 %2385 }
 0xb92   : > { %6197 = vrcp.f32 %v2386_v13 }
 0xb97   : > { %v6192_v17 = vpop.eup %6191 }
 0xb98   : > { %v2391_v19 = vmul.f32 %v6192_v17, %v6184_v4 }
 0xb9b   : > { %v6194_v18 = vpop.eup %6193 }
 0xb9c   : > { %v2392_v20 = vmul.f32 %v6194_v18, %v6186_v6  ;;  %v6196_v21 = vpop.eup %6195 }
 0xb9d   : > { %v2393_v24 = vmul.f32 %v6196_v21, %v6188_v7 }
 0xb9e   : > { %v2395_v22 = vpack.c.bf16 %v2392_v20, %v2391_v19 }
 0xb9f   : > { %v6198_v23 = vpop.eup %6197 }
 0xba0   : > { %5781 = vmatprep.mubr.msk.bf16.mxu1 %vm2349_vm11, %v2395_v22  ;;  %v2394_v25 = vmul.f32 %v6198_v23, %v6190_v10 }
 0xba2   : > { %v2396_v26 = vpack.c.bf16 %v2394_v25, %v2393_v24 }
 0xba4   : > { %5782 = vmatmul.mubr.msk.bf16.vlgmr.msra.gmra.mxu1 %vm2349_vm11, %v2396_v26 }
 0xba5   : > { %5786 = vmatpush3.bf16.msra.mxu1 %v6139_v12  ;;  %5789 = vmatprep.mubr.msk.bf16.mxu1 %vm1121_vm3, %v6773_v61 }
 0xba6   : > { %5787 = vmatprep.subr.bf16.mxu1 %v6140_v29 }
 0xba9   : > { %5788 = vmatpush3.bf16.msra.mxu1 %v6140_v29 }
 0xbaa   : > { %5801 = vmatprep.subr.bf16.mxu1 %v6141_v30 }
 0xbac   : > { %5790 = vmatmul.mubr.msk.bf16.vlgmr.msra.gmra.mxu1 %vm1121_vm3, %v6785_v0 }
 0xbad   : > { %5802 = vmatpush3.bf16.msra.mxu1 %v6141_v30  ;;  %5805 = vmatprep.mubr.msk.bf16.mxu1 %vm1121_vm3, %v6773_v61 }
 0xbae   : > { %5803 = vmatprep.subr.bf16.mxu1 %v6142_v32 }
 0xbb1   : > { %5804 = vmatpush3.bf16.msra.mxu1 %v6142_v32 }
 0xbb4   : > { %5806 = vmatmul.mubr.msk.bf16.vlgmr.msra.gmra.mxu1 %vm1121_vm3, %v6785_v0 }
 0xc64   : > { %v5783_v34 = vpop.f32.mrf.mxu1 }
 0xc66   : > { %v2443_v1 = vpop.f32.mrf.mxu1 }
 0xc68   : > { %v5784_v36 = vpop.f32.mrf.mxu1 }
 0xc69   : > { %v2459_v50 = vpack.c.bf16 %v5784_v36, %v5783_v34 }
 0xc6a   : > { %v2446_v37 = vpop.f32.mrf.mxu1 }
 0xc6b   : > { %v2458_v45 = vpack.c.bf16 %v2446_v37, %v2443_v1 }
 0xc6c   : > { %v5791_v38 = vpop.f32.mrf.mxu1 }
 0xc6e   : > { %v2513_v39 = vpop.f32.mrf.mxu1 }
 0xc70   : > { %v5792_v40 = vpop.f32.mrf.mxu1 }
 0xc71   : > { %v2661_v43 = vpack.c.bf16 %v5792_v40, %v5791_v38 }
 0xc72   : > { %v2516_v41 = vpop.f32.mrf.mxu1 }
 0xc73   : > { %v2660_v42 = vpack.c.bf16 %v2516_v41, %v2513_v39 }
 0xc74   : > { %v5807_v44 = vpop.f32.mrf.mxu1 }
 0xc75   : > { %5813 = vmatprep.mubr.msk.bf16.mxu0 %vm1172_vm4, %v2660_v42 }
 0xc76   : > { %v2645_v61 = vpop.f32.mrf.mxu1  ;;  %5814 = vmatmul.mubr.msk.bf16.vlgmr.msra.gmra.mxu0 %vm1172_vm4, %v2661_v43  ;;  %v6144_v43 = vld [vmem:[%s7233_s28 + $0x8] sm:$0xff]  }
 0xc77   : > { %5833 = vmatprep.mubr.msk.bf16.mxu0 %vm1172_vm4, %v2458_v45  ;;  %5832 = vmatpush3.bf16.msra.mxu0 %v6143_v31 }
 0xc78   : > { %v5808_v0 = vpop.f32.mrf.mxu1 }
 0xc79   : > { %v2772_v46 = vpack.c.bf16 %v5808_v0, %v5807_v44 }
 0xc7a   : > { %v2648_v47 = vpop.f32.mrf.mxu1 }
 0xc7b   : > { %v2780_v48 = vsel %vm2405_vm10, %v2772_v46, 0  ;;  %v2771_v49 = vpack.c.bf16 %v2648_v47, %v2645_v61  ;;  %6040 = vmatprep.subr.msk.bf16.mxu1 %vm2405_vm10, %v2772_v46 }
 0xc7c   : > { %5818 = vmatpush3.bf16.msra.mxu1 %v2780_v48 }
 0xc7d   : > { %5819 = vmatprep.subr.bf16.mxu1 %v2771_v49 }
 0xc7e   : > { %5834 = vmatmul.mubr.msk.bf16.vlgmr.msra.gmra.mxu0 %vm1172_vm4, %v2459_v50 }
 0xc80   : > { %5820 = vmatpush3.bf16.msra.mxu1 %v2771_v49 }
 0xc81   : > { %5825 = vmatprep.subr.bf16.mxu1 %v6144_v43 }
 0xd36   : > { %v5815_v51 = vpop.f32.mrf.mxu0 }
 0xd37   : > { %v2719_v55 = vadd.f32 %v5815_v51, %v6814_v28 }
 0xd38   : > { %v2710_v52 = vpop.f32.mrf.mxu0 }
 0xd39   : > { %v2711_v53 = vadd.f32 %v2710_v52, %v6811_v27  ;;  %v2731_v4 = vsel %vm2349_vm11, %v2719_v55, -inf }
 0xd3a   : > { %v5816_v54 = vpop.f32.mrf.mxu0 }
 0xd3b   : > { %v2725_v56 = vsel %vm2349_vm11, %v2711_v53, -inf  ;;  %v2722_v2 = vadd.f32 %v5816_v54, %v6823_v35 }
 0xd3c   : > { %v2713_v57 = vpop.f32.mrf.mxu0  ;;  %2726 = vmax.xlane.f32.xlu0 %v2725_v56 }
 0xd3d   : > { %v2714_v60 = vadd.f32 %v2713_v57, %v6818_v33  ;;  %v2734_v5 = vsel %vm2359_vm12, %v2722_v2, -inf }
 0xd3e   : > { %v5835_v48 = vpop.f32.mrf.mxu0 }
 0xd3f   : > { %v2728_v3 = vsel %vm2349_vm11, %v2714_v60, -inf }
 0xd40   : > { %2729 = vmax.xlane.f32.xlu1 %v2728_v3  ;;  %2732 = vmax.xlane.f32.xlu0 %v2731_v4  ;;  %v2943_v49 = vpop.f32.mrf.mxu0 }
 0xd42   : > { %v5836_v52 = vpop.f32.mrf.mxu0 }
 0xd44   : > { %2735 = vmax.xlane.f32.xlu1 %v2734_v5  ;;  %v2946_v3 = vpop.f32.mrf.mxu0 }
 0xdc5   : > { %v2727_v6 = vpop.xlane.xlu0 %2726 }
 0xdc6   : > { %v2737_v7 = vsub.f32 %v2711_v53, %v2727_v6  ;;  %v5303_v53 = vld [vmem:[%s7234_s3] ss:$0 sm:$0xff] }
 0xdc8   : > { %v2741_v8 = vmul.f32 1.442695, %v2737_v7 }
 0xdc9   : > { %v2730_v9 = vpop.xlane.xlu1 %2729  ;;  %v2733_v10 = vpop.xlane.xlu0 %2732 }
 0xdca   : > { %6199 = vpow2.f32 %v2741_v8  ;;  %v2738_v11 = vsub.f32 %v2714_v60, %v2730_v9  ;;  %v2739_v12 = vsub.f32 %v2719_v55, %v2733_v10 }
 0xdcc   : > { %v2743_v14 = vmul.f32 1.442695, %v2738_v11  ;;  %v2745_v15 = vmul.f32 1.442695, %v2739_v12 }
 0xdcd   : > { %v2736_v16 = vpop.xlane.xlu1 %2735 }
 0xdce   : > { %6201 = vpow2.f32 %v2743_v14  ;;  %v2740_v13 = vsub.f32 %v2722_v2, %v2736_v16 }
 0xdcf   : > { %6203 = vpow2.f32 %v2745_v15 }
 0xdd0   : > { %v2747_v17 = vmul.f32 1.442695, %v2740_v13 }
 0xdd2   : > { %6205 = vpow2.f32 %v2747_v17 }
 0xdd7   : > { %v6200_v18 = vpop.eup %6199 }
 0xdd8   : > { %v2749_v19 = vsel %vm2349_vm11, %v6200_v18, 0.0 }
 0xdd9   : > { %2750 = vadd.xlane.f32.xlu0 %v2749_v19 }
 0xddb   : > { %v6202_v20 = vpop.eup %6201 }
 0xddc   : > { %v6204_v21 = vpop.eup %6203  ;;  %v2752_v22 = vsel %vm2349_vm11, %v6202_v20, 0.0 }
 0xddd   : > { %2753 = vadd.xlane.f32.xlu1 %v2752_v22  ;;  %v2755_v23 = vsel %vm2349_vm11, %v6204_v21, 0.0 }
 0xdde   : > { %2756 = vadd.xlane.f32.xlu0 %v2755_v23 }
 0xddf   : > { %v6206_v24 = vpop.eup %6205 }
 0xde0   : > { %v2758_v25 = vsel %vm2359_vm12, %v6206_v24, 0.0 }
 0xde1   : > { %2759 = vadd.xlane.f32.xlu1 %v2758_v25 }
 0xe62   : > { %v2751_v26 = vpop.xlane.xlu0 %2750 }
 0xe63   : > { %6207 = vrcp.f32 %v2751_v26 }
 0xe66   : > { %v2754_v29 = vpop.xlane.xlu1 %2753 }
 0xe67   : > { %6209 = vrcp.f32 %v2754_v29  ;;  %v2757_v30 = vpop.xlane.xlu0 %2756 }
 0xe68   : > { %6211 = vrcp.f32 %v2757_v30 }
 0xe6a   : > { %v2760_v32 = vpop.xlane.xlu1 %2759 }
 0xe6b   : > { %6213 = vrcp.f32 %v2760_v32 }
 0xe70   : > { %v6208_v31 = vpop.eup %6207 }
 0xe71   : > { %v2765_v1 = vmul.f32 %v6208_v31, %v6200_v18 }
 0xe74   : > { %v6210_v34 = vpop.eup %6209 }
 0xe75   : > { %v2766_v36 = vmul.f32 %v6210_v34, %v6202_v20  ;;  %v6212_v37 = vpop.eup %6211 }
 0xe76   : > { %v2767_v40 = vmul.f32 %v6212_v37, %v6204_v21 }
 0xe77   : > { %v2769_v38 = vpack.c.bf16 %v2766_v36, %v2765_v1  ;;  %v6145_v1 = vld [vmem:[%s7235_s4 + $0x8] sm:$0xff]   ;;  %v6146_v36 = vld [vmem:[%s7235_s4] sm:$0xff]  }
 0xe78   : > { %v6214_v39 = vpop.eup %6213 }
 0xe79   : > { %5821 = vmatprep.mubr.msk.bf16.mxu1 %vm2349_vm11, %v2769_v38  ;;  %v2768_v41 = vmul.f32 %v6214_v39, %v6206_v24 }
 0xe7b   : > { %v2770_v42 = vpack.c.bf16 %v2768_v41, %v2767_v40 }
 0xe7d   : > { %5822 = vmatmul.mubr.msk.bf16.vlgmr.msra.gmra.mxu1 %vm2349_vm11, %v2770_v42 }
 0xe7e   : > { %5826 = vmatpush3.bf16.msra.mxu1 %v6144_v43 }
 0xe7f   : > { %5837 = vmatprep.subr.bf16.mxu1 %v6145_v1 }
 0xf3d   : > { %v5823_v44 = vpop.f32.mrf.mxu1 }
 0xf3f   : > { %v2816_v45 = vpop.f32.mrf.mxu1 }
 0xf41   : > { %v5824_v61 = vpop.f32.mrf.mxu1 }
 0xf42   : > { %v2832_v47 = vpack.c.bf16 %v5824_v61, %v5823_v44 }
 0xf43   : > { %v2819_v0 = vpop.f32.mrf.mxu1 }
 0xf44   : > { %v2831_v46 = vpack.c.bf16 %v2819_v0, %v2816_v45 }
 0xf46   : > { %5827 = vmatprep.mubr.msk.bf16.mxu1 %vm1172_vm4, %v2831_v46 }
 0xf47   : > { %5828 = vmatmul.mubr.msk.bf16.vlgmr.msra.gmra.mxu1 %vm1172_vm4, %v2832_v47 }
 0xf48   : > { %5838 = vmatpush3.bf16.msra.mxu1 %v6145_v1 }
 0xf49   : > { %5839 = vmatprep.subr.bf16.mxu1 %v6146_v36 }
 0xf4c   : > { %5840 = vmatpush3.bf16.msra.mxu1 %v6146_v36 }
0x1007   : > { %v5829_v50 = vpop.f32.mrf.mxu1 }
0x1008   : > { %v2952_v51 = vadd.f32 %v5835_v48, %v5829_v50 }
0x1009   : > { %v2882_v54 = vpop.f32.mrf.mxu1 }
0x100a   : > { %v2944_v55 = vadd.f32 %v2943_v49, %v2882_v54  ;;  %v2967_v57 = vadd.f32 %v5303_v53, %v2952_v51  ;;  %v5304_v49 = vld [vmem:[%s7236_s5] ss:$0 sm:$0xff] }
0x100b   : > { %v5830_v56 = vpop.f32.mrf.mxu1 }
0x100c   : > { %v2965_v60 = vadd.f32 %v5303_v53, %v2944_v55  ;;  %v2955_v2 = vadd.f32 %v5836_v52, %v5830_v56  ;;  %v2971_v10 = vadd.f32 %v2967_v57, %v6779_v62  ;;  %v5305_v55 = vld [vmem:[%s7237_s6] ss:$0 sm:$0xff] }
0x100d   : > { %v2885_v4 = vpop.f32.mrf.mxu1 }
0x100e   : > { %v2947_v5 = vadd.f32 %v2946_v3, %v2885_v4  ;;  %v2969_v6 = vadd.f32 %v2965_v60, %v6767_v58  ;;  %v2968_v7 = vadd.f32 %v5303_v53, %v2955_v2  ;;  %v2981_v14 = vsel %vm1121_vm3, %v2971_v10, 0.0 }
0x1010   : > { %v2966_v8 = vadd.f32 %v5303_v53, %v2947_v5  ;;  %v2975_v9 = vsel %vm1121_vm3, %v2969_v6, 0.0  ;;  %v2972_v15 = vadd.f32 %v2968_v7, %v6781_v63 }
0x1011   : > { %2976 = vadd.xlane.f32.xlu0 %v2975_v9 }
0x1012   : > { %v2970_v11 = vadd.f32 %v2966_v8, %v6769_v59  ;;  %v2984_v16 = vsel %vm2012_vm9, %v2972_v15, 0.0 }
0x1014   : > { %v2978_v12 = vsel %vm1121_vm3, %v2970_v11, 0.0 }
0x1015   : > { %2979 = vadd.xlane.f32.xlu1 %v2978_v12  ;;  %2982 = vadd.xlane.f32.xlu0 %v2981_v14  ;;  %v6149_v12 = vld [vmem:[%s7238_s8 + $0x8] sm:$0xff]   ;;  %v6150_v14 = vld [vmem:[%s7238_s8] sm:$0xff]  }
0x1019   : > { %2985 = vadd.xlane.f32.xlu1 %v2984_v16 }
0x109a   : > { %v2977_v58 = vpop.xlane.xlu0 %2976 }
0x109b   : > { %v2987_v13 = vmul.f32 0.03125, %v2977_v58 }
0x109d   : > { %v2991_v17 = vsub.f32 %v2969_v6, %v2987_v13 }
0x109e   : > { %v2980_v18 = vpop.xlane.xlu1 %2979  ;;  %v2983_v19 = vpop.xlane.xlu0 %2982 }
0x109f   : > { %v2988_v62 = vmul.f32 0.03125, %v2980_v18  ;;  %v2989_v20 = vmul.f32 0.03125, %v2983_v19  ;;  %v2995_v21 = vmul.f32 %v2991_v17, %v2991_v17 }
0x10a1   : > { %v2992_v59 = vsub.f32 %v2970_v11, %v2988_v62  ;;  %v2993_v22 = vsub.f32 %v2971_v10, %v2989_v20  ;;  %v2999_v23 = vsel %vm1121_vm3, %v2995_v21, 0.0  ;;  %v6147_v10 = vld [vmem:[%s7238_s8 + $0x18] sm:$0xff]   ;;  %v6148_v11 = vld [vmem:[%s7238_s8 + $0x10] sm:$0xff]  }
0x10a2   : > { %v2986_v63 = vpop.xlane.xlu1 %2985  ;;  %3000 = vadd.xlane.f32.xlu0 %v2999_v23  ;;  %5845 = vmatprep.subr.bf16.mxu0 %v6147_v10 }
0x10a3   : > { %v2990_v24 = vmul.f32 0.03125, %v2986_v63  ;;  %v2996_v25 = vmul.f32 %v2992_v59, %v2992_v59  ;;  %v2997_v26 = vmul.f32 %v2993_v22, %v2993_v22  ;;  %5846 = vmatpush3.bf16.msra.mxu0 %v6147_v10 }
0x10a4   : > { %5847 = vmatprep.subr.bf16.mxu0 %v6148_v11 }
0x10a5   : > { %v2994_v29 = vsub.f32 %v2972_v15, %v2990_v24  ;;  %v3002_v30 = vsel %vm1121_vm3, %v2996_v25, 0.0  ;;  %v3005_v32 = vsel %vm1121_vm3, %v2997_v26, 0.0  ;;  %v5306_v15 = vld [vmem:[%s7239_s9] ss:$0 sm:$0xff] }
0x10a6   : > { %3003 = vadd.xlane.f32.xlu1 %v3002_v30  ;;  %3006 = vadd.xlane.f32.xlu0 %v3005_v32 }
0x10a7   : > { %v2998_v31 = vmul.f32 %v2994_v29, %v2994_v29  ;;  %5848 = vmatpush3.bf16.msra.mxu0 %v6148_v11 }
0x10a8   : > { %5849 = vmatprep.subr.bf16.mxu0 %v6149_v12 }
0x10a9   : > { %v3008_v34 = vsel %vm2012_vm9, %v2998_v31, 0.0 }
0x10aa   : > { %3009 = vadd.xlane.f32.xlu1 %v3008_v34 }
0x10ab   : > { %5850 = vmatpush3.bf16.msra.mxu0 %v6149_v12 }
0x10ac   : > { %5851 = vmatprep.subr.bf16.mxu0 %v6150_v14 }
0x10af   : > { %5852 = vmatpush3.bf16.msra.mxu0 %v6150_v14 }
0x112b   : > { %v3001_v37 = vpop.xlane.xlu0 %3000 }
0x112c   : > { %v3011_v38 = vmul.f32 0.03125, %v3001_v37 }
0x112e   : > { %v3015_v39 = vadd.f32 1e-06, %v3011_v38 }
0x112f   : > { %v3004_v40 = vpop.xlane.xlu1 %3003  ;;  %v3007_v41 = vpop.xlane.xlu0 %3006 }
0x1130   : > { %6215 = vrsqrt.f32 %v3015_v39  ;;  %v3012_v42 = vmul.f32 0.03125, %v3004_v40  ;;  %v3013_v43 = vmul.f32 0.03125, %v3007_v41 }
0x1132   : > { %v3016_v44 = vadd.f32 1e-06, %v3012_v42  ;;  %v3017_v45 = vadd.f32 1e-06, %v3013_v43 }
0x1133   : > { %v3010_v61 = vpop.xlane.xlu1 %3009 }
0x1134   : > { %6217 = vrsqrt.f32 %v3016_v44  ;;  %v3014_v0 = vmul.f32 0.03125, %v3010_v61 }
0x1135   : > { %6219 = vrsqrt.f32 %v3017_v45  ;;  %v5311_v45 = vld [vmem:[%s7240_s12] ss:$0 sm:$0xff] }
0x1136   : > { %v3018_v46 = vadd.f32 1e-06, %v3014_v0 }
0x1138   : > { %6221 = vrsqrt.f32 %v3018_v46 }
0x113d   : > { %v6216_v47 = vpop.eup %6215 }
0x113e   : > { %v3023_v48 = vmul.f32 %v6216_v47, %v2991_v17 }
0x1140   : > { %v3033_v53 = vmul.f32 %v5304_v49, %v3023_v48 }
0x1141   : > { %v6218_v50 = vpop.eup %6217 }
0x1142   : > { %v6220_v51 = vpop.eup %6219  ;;  %v3024_v52 = vmul.f32 %v6218_v50, %v2992_v59  ;;  %v6893_v2 = vadd.f32 %v5305_v55, %v3033_v53 }
0x1143   : > { %v3025_v54 = vmul.f32 %v6220_v51, %v2993_v22 }
0x1144   : > { %v3034_v56 = vmul.f32 %v5304_v49, %v3024_v52 }
0x1145   : > { %v6222_v57 = vpop.eup %6221  ;;  %v3035_v4 = vmul.f32 %v5304_v49, %v3025_v54 }
0x1146   : > { %v3026_v60 = vmul.f32 %v6222_v57, %v2994_v29  ;;  %v6895_v3 = vadd.f32 %v5305_v55, %v3034_v56 }
0x1147   : > { %v6900_v7 = vadd.f32 %v5305_v55, %v3035_v4 }
0x1148   : > { %v3047_v5 = vpack.c.bf16 %v6895_v3, %v6893_v2  ;;  %v3036_v6 = vmul.f32 %v5304_v49, %v3026_v60 }
0x114a   : > { %5841 = vmatprep.mubr.msk.bf16.mxu1 %vm1121_vm3, %v3047_v5  ;;  %v6902_v8 = vadd.f32 %v5305_v55, %v3036_v6 }
0x114c   : > { %v3048_v9 = vpack.c.bf16 %v6902_v8, %v6900_v7 }
0x114e   : > { %5842 = vmatmul.mubr.msk.bf16.vlgmr.msra.gmra.mxu1 %vm1121_vm3, %v3048_v9 }
0x120e   : > { %v5843_v16 = vpop.f32.mrf.mxu1 }
0x120f   : > { %v3121_v58 = vadd.f32 %v5843_v16, %v5306_v15 }
0x1210   : > { %v3112_v13 = vpop.f32.mrf.mxu1 }
0x1211   : > { %v3113_v17 = vadd.f32 %v5306_v15, %v3112_v13  ;;  %v3133_v18 = vmul.f32 0.70710677, %v3121_v58  ;;  %v3129_v37 = vmul.f32 0.5, %v3121_v58 }
0x1212   : > { %v5844_v19 = vpop.f32.mrf.mxu1 }
0x1213   : > { %v3131_v62 = vmul.f32 0.70710677, %v3113_v17  ;;  %v3124_v20 = vadd.f32 %v5844_v19, %v5306_v15  ;;  %v3127_v34 = vmul.f32 0.5, %v3113_v17 }
0x1214   : > { %v3115_v21 = vpop.f32.mrf.mxu1 }
0x1215   : > { %6223 = verf.f32 %v3131_v62  ;;  %v3134_v59 = vmul.f32 0.70710677, %v3124_v20  ;;  %v3116_v22 = vadd.f32 %v5306_v15, %v3115_v21  ;;  %v3130_v31 = vmul.f32 0.5, %v3124_v20  ;;  %v6151_v20 = vld [vmem:[%s6458_s19 + $0x28] sm:$0xff]  }
0x1216   : > { %6225 = verf.f32 %v3133_v18  ;;  %v6152_v21 = vld [vmem:[%s7229_s11 + $0x28] sm:$0xff]   ;;  %5857 = vmatprep.subr.bf16.mxu1 %v6151_v20 }
0x1217   : > { %6227 = verf.f32 %v3134_v59  ;;  %v3132_v23 = vmul.f32 0.70710677, %v3116_v22  ;;  %v3128_v1 = vmul.f32 0.5, %v3116_v22  ;;  %5873 = vmatprep.subr.bf16.mxu0 %v6152_v21  ;;  %5858 = vmatpush3.bf16.msra.mxu1 %v6151_v20  ;;  %v6153_v59 = vld [vmem:[%s6458_s19 + $0x20] sm:$0xff]   ;;  %v6158_v20 = vld [vmem:[%s7228_s1 + $0x30] sm:$0xff]  }
0x1218   : > { %v6154_v22 = vld [vmem:[%s7229_s11 + $0x20] sm:$0xff]   ;;  %5859 = vmatprep.subr.bf16.mxu1 %v6153_v59 }
0x1219   : > { %6229 = verf.f32 %v3132_v23  ;;  %v6155_v23 = vld [vmem:[%s7228_s1 + $0x28] sm:$0xff]  }
0x121b   : > { %5860 = vmatpush3.bf16.msra.mxu1 %v6153_v59 }
0x121c   : > { %5865 = vmatprep.subr.bf16.mxu1 %v6155_v23 }
0x1222   : > { %v6224_v63 = vpop.eup %6223 }
0x1223   : > { %v6226_v24 = vpop.eup %6225  ;;  %v3139_v26 = vadd.f32 1.0, %v6224_v63 }
0x1224   : > { %v6228_v25 = vpop.eup %6227  ;;  %v3141_v32 = vadd.f32 1.0, %v6226_v24 }
0x1225   : > { %v3142_v29 = vadd.f32 1.0, %v6228_v25  ;;  %v3143_v39 = vmul.f32 %v3139_v26, %v3127_v34 }
0x1226   : > { %v6230_v30 = vpop.eup %6229  ;;  %v3145_v41 = vmul.f32 %v3141_v32, %v3129_v37 }
0x1227   : > { %v3140_v36 = vadd.f32 1.0, %v6230_v30  ;;  %v3146_v38 = vmul.f32 %v3142_v29, %v3130_v31 }
0x1229   : > { %v3144_v40 = vmul.f32 %v3140_v36, %v3128_v1  ;;  %v3148_v43 = vpack.c.bf16 %v3146_v38, %v3145_v41 }
0x122b   : > { %v3147_v42 = vpack.c.bf16 %v3144_v40, %v3143_v39  ;;  %v5318_v40 = vld [vmem:[%s7241_s13] ss:$0 sm:$0xff] }
0x122d   : > { %5853 = vmatprep.mubr.msk.bf16.mxu0 %vm3188_vm13, %v3147_v42 }
0x122e   : > { %5854 = vmatmul.mubr.msk.bf16.vlgmr.msra.gmra.mxu0 %vm3188_vm13, %v3148_v43 }
0x122f   : > { %5874 = vmatpush3.bf16.msra.mxu0 %v6152_v21 }
0x1230   : > { %5875 = vmatprep.subr.bf16.mxu0 %v6154_v22 }
0x1233   : > { %5876 = vmatpush3.bf16.msra.mxu0 %v6154_v22 }
0x12ee   : > { %v5855_v44 = vpop.f32.mrf.mxu0 }
0x12ef   : > { %v3238_v0 = vadd.f32 %v5855_v44, %v5311_v45 }
0x12f0   : > { %v3229_v61 = vpop.f32.mrf.mxu0 }
0x12f1   : > { %v3230_v46 = vadd.f32 %v5311_v45, %v3229_v61  ;;  %v3246_v53 = vadd.f32 %v3238_v0, %v6900_v7  ;;  %v5319_v61 = vld [vmem:[%s7242_s14] ss:$0 sm:$0xff] }
0x12f2   : > { %v5856_v47 = vpop.f32.mrf.mxu0 }
0x12f3   : > { %v3244_v48 = vadd.f32 %v3230_v46, %v6893_v2  ;;  %v3241_v50 = vadd.f32 %v5856_v47, %v5311_v45  ;;  %v3256_v56 = vsel %vm1121_vm3, %v3246_v53, 0.0 }
0x12f4   : > { %v3232_v49 = vpop.f32.mrf.mxu0 }
0x12f5   : > { %v3233_v51 = vadd.f32 %v5311_v45, %v3232_v49  ;;  %v3250_v52 = vsel %vm1121_vm3, %v3244_v48, 0.0  ;;  %v3247_v57 = vadd.f32 %v3241_v50, %v6902_v8 }
0x12f6   : > { %3251 = vadd.xlane.f32.xlu0 %v3250_v52 }
0x12f7   : > { %v3245_v54 = vadd.f32 %v3233_v51, %v6895_v3  ;;  %v3259_v60 = vsel %vm2012_vm9, %v3247_v57, 0.0 }
0x12f9   : > { %v3253_v55 = vsel %vm1121_vm3, %v3245_v54, 0.0 }
0x12fa   : > { %3254 = vadd.xlane.f32.xlu1 %v3253_v55  ;;  %3257 = vadd.xlane.f32.xlu0 %v3256_v56  ;;  %v6156_v56 = vld [vmem:[%s7228_s1 + $0x20] sm:$0xff]  }
0x12fe   : > { %3260 = vadd.xlane.f32.xlu1 %v3259_v60 }
0x137f   : > { %v3252_v2 = vpop.xlane.xlu0 %3251 }
0x1380   : > { %v3262_v4 = vmul.f32 0.03125, %v3252_v2 }
0x1382   : > { %v3266_v5 = vsub.f32 %v3244_v48, %v3262_v4 }
0x1383   : > { %v3255_v6 = vpop.xlane.xlu1 %3254  ;;  %v3258_v9 = vpop.xlane.xlu0 %3257 }
0x1384   : > { %v3263_v7 = vmul.f32 0.03125, %v3255_v6  ;;  %v3264_v10 = vmul.f32 0.03125, %v3258_v9  ;;  %v3270_v11 = vmul.f32 %v3266_v5, %v3266_v5 }
0x1386   : > { %v3267_v3 = vsub.f32 %v3245_v54, %v3263_v7  ;;  %v3268_v12 = vsub.f32 %v3246_v53, %v3264_v10  ;;  %v3274_v14 = vsel %vm1121_vm3, %v3270_v11, 0.0 }
0x1387   : > { %v3261_v8 = vpop.xlane.xlu1 %3260  ;;  %3275 = vadd.xlane.f32.xlu0 %v3274_v14 }
0x1388   : > { %v3265_v15 = vmul.f32 0.03125, %v3261_v8  ;;  %v3271_v16 = vmul.f32 %v3267_v3, %v3267_v3  ;;  %v3272_v58 = vmul.f32 %v3268_v12, %v3268_v12 }
0x138a   : > { %v3269_v13 = vsub.f32 %v3247_v57, %v3265_v15  ;;  %v3277_v17 = vsel %vm1121_vm3, %v3271_v16, 0.0  ;;  %v3280_v18 = vsel %vm1121_vm3, %v3272_v58, 0.0 }
0x138b   : > { %3278 = vadd.xlane.f32.xlu1 %v3277_v17  ;;  %3281 = vadd.xlane.f32.xlu0 %v3280_v18  ;;  %v6157_v18 = vld [vmem:[%s7228_s1 + $0x38] sm:$0xff]   ;;  %s7243_s1 = sld [smem:[#allocation24_spill]] }
0x138c   : > { %v3273_v19 = vmul.f32 %v3269_v13, %v3269_v13 }
0x138e   : > { %v3283_v62 = vsel %vm2012_vm9, %v3273_v19, 0.0 }
0x138f   : > { %3284 = vadd.xlane.f32.xlu1 %v3283_v62 }
0x1410   : > { %v3276_v63 = vpop.xlane.xlu0 %3275 }
0x1411   : > { %v3286_v24 = vmul.f32 0.03125, %v3276_v63 }
0x1413   : > { %v3290_v25 = vadd.f32 1e-06, %v3286_v24 }
0x1414   : > { %v3279_v26 = vpop.xlane.xlu1 %3278  ;;  %v3282_v29 = vpop.xlane.xlu0 %3281 }
0x1415   : > { %6231 = vrsqrt.f32 %v3290_v25  ;;  %v3287_v30 = vmul.f32 0.03125, %v3279_v26  ;;  %v3288_v32 = vmul.f32 0.03125, %v3282_v29 }
0x1417   : > { %v3291_v31 = vadd.f32 1e-06, %v3287_v30  ;;  %v3292_v34 = vadd.f32 1e-06, %v3288_v32 }
0x1418   : > { %v3285_v1 = vpop.xlane.xlu1 %3284 }
0x1419   : > { %6233 = vrsqrt.f32 %v3291_v31  ;;  %v3289_v36 = vmul.f32 0.03125, %v3285_v1 }
0x141a   : > { %6235 = vrsqrt.f32 %v3292_v34 }
0x141b   : > { %v3293_v37 = vadd.f32 1e-06, %v3289_v36 }
0x141d   : > { %6237 = vrsqrt.f32 %v3293_v37 }
0x1422   : > { %v6232_v38 = vpop.eup %6231 }
0x1423   : > { %v3298_v39 = vmul.f32 %v6232_v38, %v3266_v5 }
0x1425   : > { %v3308_v43 = vmul.f32 %v5318_v40, %v3298_v39 }
0x1426   : > { %v6234_v41 = vpop.eup %6233 }
0x1427   : > { %v6236_v42 = vpop.eup %6235  ;;  %v3299_v44 = vmul.f32 %v6234_v41, %v3267_v3  ;;  %v6934_v49 = vadd.f32 %v5319_v61, %v3308_v43 }
0x1428   : > { %v3300_v45 = vmul.f32 %v6236_v42, %v3268_v12 }
0x1429   : > { %v3309_v0 = vmul.f32 %v5318_v40, %v3299_v44 }
0x142a   : > { %v6238_v46 = vpop.eup %6237  ;;  %v3310_v47 = vmul.f32 %v5318_v40, %v3300_v45 }
0x142b   : > { %v3301_v48 = vmul.f32 %v6238_v46, %v3269_v13  ;;  %v6936_v50 = vadd.f32 %v5319_v61, %v3309_v0 }
0x142c   : > { %v6946_v53 = vadd.f32 %v5319_v61, %v3310_v47 }
0x142d   : > { %v3311_v51 = vmul.f32 %v5318_v40, %v3301_v48  ;;  %v6940_v52 = vpack.c.bf16 %v6936_v50, %v6934_v49 }
0x142f   : > { %5861 = vmatprep.mubr.msk.bf16.mxu1 %vm1121_vm3, %v6940_v52  ;;  %5877 = vmatprep.mubr.msk.bf16.mxu0 %vm1121_vm3, %v6940_v52  ;;  %v6948_v54 = vadd.f32 %v5319_v61, %v3311_v51 }
0x1431   : > { %v6952_v55 = vpack.c.bf16 %v6948_v54, %v6946_v53 }
0x1433   : > { %5862 = vmatmul.mubr.msk.bf16.vlgmr.msra.gmra.mxu1 %vm1121_vm3, %v6952_v55  ;;  %5878 = vmatmul.mubr.msk.bf16.vlgmr.msra.gmra.mxu0 %vm1121_vm3, %v6952_v55 }
0x1434   : > { %5866 = vmatpush3.bf16.msra.mxu1 %v6155_v23  ;;  %5869 = vmatprep.mubr.msk.bf16.mxu1 %vm1121_vm3, %v6940_v52 }
0x1435   : > { %5867 = vmatprep.subr.bf16.mxu1 %v6156_v56 }
0x1438   : > { %5868 = vmatpush3.bf16.msra.mxu1 %v6156_v56 }
0x143b   : > { %5870 = vmatmul.mubr.msk.bf16.vlgmr.msra.gmra.mxu1 %vm1121_vm3, %v6952_v55 }
0x14f3   : > { %v5863_v57 = vpop.f32.mrf.mxu1  ;;  %v5879_v60 = vpop.f32.mrf.mxu0 }
0x14f5   : > { %v3381_v2 = vpop.f32.mrf.mxu1  ;;  %v3513_v4 = vpop.f32.mrf.mxu0 }
0x14f7   : > { %v5864_v5 = vpop.f32.mrf.mxu1  ;;  %v5880_v6 = vpop.f32.mrf.mxu0 }
0x14f8   : > { %v3640_v9 = vpack.c.bf16 %v5880_v6, %v5879_v60  ;;  %v3529_v62 = vpack.c.bf16 %v5864_v5, %v5863_v57  ;;  %v6159_v6 = vld [vmem:[%s6458_s19 + $0x38] sm:$0xff]  }
0x14f9   : > { %v3384_v7 = vpop.f32.mrf.mxu1  ;;  %v3516_v10 = vpop.f32.mrf.mxu0 }
0x14fa   : > { %v3648_v11 = vsel %vm2405_vm10, %v3640_v9, 0  ;;  %v3528_v3 = vpack.c.bf16 %v3384_v7, %v3381_v2  ;;  %v3639_v12 = vpack.c.bf16 %v3516_v10, %v3513_v4  ;;  %6043 = vmatprep.subr.msk.bf16.mxu0 %vm2405_vm10, %v3640_v9 }
0x14fb   : > { %v5871_v14 = vpop.f32.mrf.mxu1  ;;  %5890 = vmatpush3.bf16.msra.mxu0 %v3648_v11 }
0x14fc   : > { %5885 = vmatprep.mubr.msk.bf16.mxu1 %vm1172_vm4, %v3528_v3  ;;  %5891 = vmatprep.subr.bf16.mxu0 %v3639_v12 }
0x14fd   : > { %v3447_v8 = vpop.f32.mrf.mxu1 }
0x14ff   : > { %v5872_v15 = vpop.f32.mrf.mxu1  ;;  %5892 = vmatpush3.bf16.msra.mxu0 %v3639_v12 }
0x1500   : > { %v3531_v16 = vpack.c.bf16 %v5872_v15, %v5871_v14  ;;  %5897 = vmatprep.subr.bf16.mxu0 %v6159_v6 }
0x1501   : > { %v3450_v58 = vpop.f32.mrf.mxu1 }
0x1502   : > { %v3542_v13 = vsel %vm1172_vm4, %v3531_v16, 0  ;;  %v3530_v17 = vpack.c.bf16 %v3450_v58, %v3447_v8  ;;  %6041 = vmatprep.subr.msk.bf16.mxu1 %vm1172_vm4, %v3531_v16 }
0x1503   : > { %5882 = vmatpush3.bf16.xpose.msra.mxu1 %v3542_v13 }
0x1504   : > { %6042 = vmatprep.subr.msk.bf16.mxu1 %vm1172_vm4, %v3530_v17  ;;  %v3539_v19 = vsel %vm1172_vm4, %v3530_v17, 0 }
0x150b   : > { %5884 = vmatpush3.bf16.xpose.msra.mxu1 %v3539_v19  ;;  %v6160_v19 = vld [vmem:[%s6458_s19 + $0x30] sm:$0xff]  }
0x150c   : > { %5905 = vmatprep.subr.bf16.mxu1 %v6157_v18 }
0x1512   : > { %5886 = vmatmul.mubr.msk.bf16.vlgmr.msra.gmra.mxu1 %vm1172_vm4, %v3529_v62  ;;  %v6161_v62 = vld [vmem:[%s7229_s11 + $0x38] sm:$0xff]  }
0x1513   : > { %5906 = vmatpush3.bf16.msra.mxu1 %v6157_v18  ;;  %5909 = vmatprep.mubr.msk.bf16.mxu1 %vm1121_vm3, %v6940_v52 }
0x1514   : > { %5907 = vmatprep.subr.bf16.mxu1 %v6158_v20 }
0x1517   : > { %5908 = vmatpush3.bf16.msra.mxu1 %v6158_v20  ;;  %v6162_v20 = vld [vmem:[%s7229_s11 + $0x30] sm:$0xff]  }
0x151a   : > { %5910 = vmatmul.mubr.msk.bf16.vlgmr.msra.gmra.mxu1 %vm1121_vm3, %v6952_v55 }
0x15d2   : > { %v5887_v21 = vpop.f32.mrf.mxu1 }
0x15d3   : > { %v3587_v63 = vadd.f32 %v5887_v21, %v6814_v28  ;;  %v6163_v21 = vld [vmem:[%s7233_s28 + $0x10] sm:$0xff]  }
0x15d4   : > { %v3578_v59 = vpop.f32.mrf.mxu1 }
0x15d5   : > { %v3579_v22 = vadd.f32 %v3578_v59, %v6811_v27  ;;  %v3599_v31 = vsel %vm2349_vm11, %v3587_v63, -inf }
0x15d6   : > { %v5888_v23 = vpop.f32.mrf.mxu1 }
0x15d7   : > { %v3593_v24 = vsel %vm2349_vm11, %v3579_v22, -inf  ;;  %v3590_v30 = vadd.f32 %v5888_v23, %v6823_v35 }
0x15d8   : > { %v3581_v25 = vpop.f32.mrf.mxu1  ;;  %3594 = vmax.xlane.f32.xlu0 %v3593_v24 }
0x15d9   : > { %v3582_v26 = vadd.f32 %v3581_v25, %v6818_v33  ;;  %v3602_v28 = vsel %vm2359_vm12, %v3590_v30, -inf }
0x15da   : > { %v5911_v29 = vpop.f32.mrf.mxu1 }
0x15db   : > { %v3596_v32 = vsel %vm2349_vm11, %v3582_v26, -inf }
0x15dc   : > { %v3821_v34 = vpop.f32.mrf.mxu1  ;;  %3597 = vmax.xlane.f32.xlu1 %v3596_v32  ;;  %3600 = vmax.xlane.f32.xlu0 %v3599_v31 }
0x15de   : > { %v5912_v27 = vpop.f32.mrf.mxu1 }
0x15df   : > { %v3905_v1 = vpack.c.bf16 %v5912_v27, %v5911_v29 }
0x15e0   : > { %v3824_v36 = vpop.f32.mrf.mxu1  ;;  %3603 = vmax.xlane.f32.xlu1 %v3602_v28 }
0x15e1   : > { %v3916_v37 = vsel %vm1172_vm4, %v3905_v1, 0  ;;  %v3904_v38 = vpack.c.bf16 %v3824_v36, %v3821_v34  ;;  %6044 = vmatprep.subr.msk.bf16.mxu1 %vm1172_vm4, %v3905_v1 }
0x15e2   : > { %5922 = vmatpush3.bf16.xpose.msra.mxu1 %v3916_v37 }
0x15e3   : > { %6045 = vmatprep.subr.msk.bf16.mxu1 %vm1172_vm4, %v3904_v38  ;;  %v3913_v33 = vsel %vm1172_vm4, %v3904_v38, 0 }
0x15ea   : > { %5924 = vmatpush3.bf16.xpose.msra.mxu1 %v3913_v33 }
0x15eb   : > { %5943 = vmatprep.subr.bf16.mxu1 %v6163_v21 }
0x1661   : > { %v3595_v35 = vpop.xlane.xlu0 %3594 }
0x1662   : > { %v3605_v39 = vsub.f32 %v3579_v22, %v3595_v35  ;;  %v6295_v35 = vld [vmem:[%s7232_s23] sm:$0xff] }
0x1664   : > { %v3609_v40 = vmul.f32 1.442695, %v3605_v39 }
0x1665   : > { %v3598_v41 = vpop.xlane.xlu1 %3597  ;;  %v3601_v42 = vpop.xlane.xlu0 %3600 }
0x1666   : > { %6239 = vpow2.f32 %v3609_v40  ;;  %v3606_v43 = vsub.f32 %v3582_v26, %v3598_v41  ;;  %v3607_v44 = vsub.f32 %v3587_v63, %v3601_v42  ;;  %v6296_v41 = vld [vmem:[%s7232_s23 + $0x10] sm:$0xff] }
0x1668   : > { %v3611_v45 = vmul.f32 1.442695, %v3606_v43  ;;  %v3613_v61 = vmul.f32 1.442695, %v3607_v44 }
0x1669   : > { %v3604_v0 = vpop.xlane.xlu1 %3603 }
0x166a   : > { %6241 = vpow2.f32 %v3611_v45  ;;  %v3608_v46 = vsub.f32 %v3590_v30, %v3604_v0  ;;  %v6297_v45 = vld [vmem:[%s7232_s23 + $0x8] sm:$0xff]  ;;  %v6298_v0 = vld [vmem:[%s7232_s23 + $0x18] sm:$0xf] }
0x166b   : > { %6243 = vpow2.f32 %v3613_v61 }
0x166c   : > { %v3615_v47 = vmul.f32 1.442695, %v3608_v46 }
0x166e   : > { %6245 = vpow2.f32 %v3615_v47 }
0x1673   : > { %v6240_v48 = vpop.eup %6239 }
0x1674   : > { %v3617_v51 = vsel %vm2349_vm11, %v6240_v48, 0.0 }
0x1675   : > { %3618 = vadd.xlane.f32.xlu0 %v3617_v51 }
0x1677   : > { %v6242_v56 = vpop.eup %6241 }
0x1678   : > { %v6244_v57 = vpop.eup %6243  ;;  %v3620_v60 = vsel %vm2349_vm11, %v6242_v56, 0.0 }
0x1679   : > { %3621 = vadd.xlane.f32.xlu1 %v3620_v60  ;;  %v3623_v2 = vsel %vm2349_vm11, %v6244_v57, 0.0 }
0x167a   : > { %3624 = vadd.xlane.f32.xlu0 %v3623_v2 }
0x167b   : > { %v6246_v4 = vpop.eup %6245 }
0x167c   : > { %v3626_v5 = vsel %vm2359_vm12, %v6246_v4, 0.0 }
0x167d   : > { %3627 = vadd.xlane.f32.xlu1 %v3626_v5 }
0x16fe   : > { %v3619_v9 = vpop.xlane.xlu0 %3618 }
0x16ff   : > { %6247 = vrcp.f32 %v3619_v9 }
0x1702   : > { %v3622_v7 = vpop.xlane.xlu1 %3621 }
0x1703   : > { %6249 = vrcp.f32 %v3622_v7  ;;  %v3625_v10 = vpop.xlane.xlu0 %3624 }
0x1704   : > { %6251 = vrcp.f32 %v3625_v10 }
0x1706   : > { %v3628_v11 = vpop.xlane.xlu1 %3627 }
0x1707   : > { %6253 = vrcp.f32 %v3628_v11 }
0x170c   : > { %v6248_v3 = vpop.eup %6247 }
0x170d   : > { %v3633_v14 = vmul.f32 %v6248_v3, %v6240_v48 }
0x1710   : > { %v6250_v12 = vpop.eup %6249 }
0x1711   : > { %v3634_v8 = vmul.f32 %v6250_v12, %v6242_v56  ;;  %v6252_v15 = vpop.eup %6251 }
0x1712   : > { %v3635_v13 = vmul.f32 %v6252_v15, %v6244_v57 }
0x1713   : > { %v3637_v16 = vpack.c.bf16 %v3634_v8, %v3633_v14 }
0x1714   : > { %v6254_v58 = vpop.eup %6253 }
0x1715   : > { %5893 = vmatprep.mubr.msk.bf16.mxu0 %vm2349_vm11, %v3637_v16  ;;  %v3636_v17 = vmul.f32 %v6254_v58, %v6246_v4 }
0x1717   : > { %v3638_v18 = vpack.c.bf16 %v3636_v17, %v3635_v13 }
0x1719   : > { %5894 = vmatmul.mubr.msk.bf16.vlgmr.msra.gmra.mxu0 %vm2349_vm11, %v3638_v18 }
0x171a   : > { %5898 = vmatpush3.bf16.msra.mxu0 %v6159_v6  ;;  %5901 = vmatprep.mubr.msk.bf16.mxu0 %vm1121_vm3, %v6940_v52 }
0x171b   : > { %5899 = vmatprep.subr.bf16.mxu0 %v6160_v19 }
0x171e   : > { %5900 = vmatpush3.bf16.msra.mxu0 %v6160_v19 }
0x171f   : > { %5913 = vmatprep.subr.bf16.mxu0 %v6161_v62 }
0x1721   : > { %5902 = vmatmul.mubr.msk.bf16.vlgmr.msra.gmra.mxu0 %vm1121_vm3, %v6952_v55 }
0x1722   : > { %5914 = vmatpush3.bf16.msra.mxu0 %v6161_v62  ;;  %5917 = vmatprep.mubr.msk.bf16.mxu0 %vm1121_vm3, %v6940_v52 }
0x1723   : > { %5915 = vmatprep.subr.bf16.mxu0 %v6162_v20 }
0x1726   : > { %5916 = vmatpush3.bf16.msra.mxu0 %v6162_v20 }
0x1729   : > { %5918 = vmatmul.mubr.msk.bf16.vlgmr.msra.gmra.mxu0 %vm1121_vm3, %v6952_v55 }
0x17d9   : > { %v5895_v59 = vpop.f32.mrf.mxu0 }
0x17db   : > { %v3684_v22 = vpop.f32.mrf.mxu0 }
0x17dd   : > { %v5896_v23 = vpop.f32.mrf.mxu0 }
0x17de   : > { %v3700_v37 = vpack.c.bf16 %v5896_v23, %v5895_v59 }
0x17df   : > { %v3687_v63 = vpop.f32.mrf.mxu0 }
0x17e0   : > { %v3699_v34 = vpack.c.bf16 %v3687_v63, %v3684_v22 }
0x17e1   : > { %v5903_v24 = vpop.f32.mrf.mxu0 }
0x17e3   : > { %v3755_v25 = vpop.f32.mrf.mxu0 }
0x17e5   : > { %v5904_v26 = vpop.f32.mrf.mxu0 }
0x17e6   : > { %v3903_v32 = vpack.c.bf16 %v5904_v26, %v5903_v24 }
0x17e7   : > { %v3758_v29 = vpop.f32.mrf.mxu0 }
0x17e8   : > { %v3902_v30 = vpack.c.bf16 %v3758_v29, %v3755_v25 }
0x17e9   : > { %v5919_v31 = vpop.f32.mrf.mxu0 }
0x17ea   : > { %5925 = vmatprep.mubr.msk.bf16.mxu1 %vm1172_vm4, %v3902_v30 }
0x17eb   : > { %v3887_v52 = vpop.f32.mrf.mxu0  ;;  %5926 = vmatmul.mubr.msk.bf16.vlgmr.msra.gmra.mxu1 %vm1172_vm4, %v3903_v32  ;;  %v6164_v32 = vld [vmem:[%s7233_s28 + $0x18] sm:$0xff]  }
0x17ec   : > { %5945 = vmatprep.mubr.msk.bf16.mxu1 %vm1172_vm4, %v3699_v34  ;;  %5944 = vmatpush3.bf16.msra.mxu1 %v6163_v21 }
0x17ed   : > { %v5920_v55 = vpop.f32.mrf.mxu0 }
0x17ee   : > { %v4014_v27 = vpack.c.bf16 %v5920_v55, %v5919_v31 }
0x17ef   : > { %v3890_v1 = vpop.f32.mrf.mxu0 }
0x17f0   : > { %v4022_v28 = vsel %vm2405_vm10, %v4014_v27, 0  ;;  %v4013_v36 = vpack.c.bf16 %v3890_v1, %v3887_v52  ;;  %6046 = vmatprep.subr.msk.bf16.mxu0 %vm2405_vm10, %v4014_v27 }
0x17f1   : > { %5930 = vmatpush3.bf16.msra.mxu0 %v4022_v28 }
0x17f2   : > { %5931 = vmatprep.subr.bf16.mxu0 %v4013_v36 }
0x17f3   : > { %5946 = vmatmul.mubr.msk.bf16.vlgmr.msra.gmra.mxu1 %vm1172_vm4, %v3700_v37 }
0x17f5   : > { %5932 = vmatpush3.bf16.msra.mxu0 %v4013_v36 }
0x17f6   : > { %5937 = vmatprep.subr.bf16.mxu0 %v6164_v32 }
0x18ab   : > { %v5927_v38 = vpop.f32.mrf.mxu1 }
0x18ac   : > { %v3961_v42 = vadd.f32 %v6296_v41, %v5927_v38 }
0x18ad   : > { %v3952_v33 = vpop.f32.mrf.mxu1 }
0x18ae   : > { %v3953_v39 = vadd.f32 %v6295_v35, %v3952_v33  ;;  %v3973_v48 = vsel %vm2349_vm11, %v3961_v42, -inf  ;;  %v5387_v35 = vld [vmem:[%s7234_s3 + $0x1] ss:$0 sm:$0xff]  ;;  %s7244_s3 = sld [smem:[#allocation23_spill]] }
0x18af   : > { %v5928_v40 = vpop.f32.mrf.mxu1 }
0x18b0   : > { %v3967_v43 = vsel %vm2349_vm11, %v3953_v39, -inf  ;;  %v3964_v46 = vadd.f32 %v6298_v0, %v5928_v40 }
0x18b1   : > { %v3955_v44 = vpop.f32.mrf.mxu1  ;;  %3968 = vmax.xlane.f32.xlu0 %v3967_v43 }
0x18b2   : > { %v3956_v61 = vadd.f32 %v6297_v45, %v3955_v44  ;;  %v3976_v51 = vsel %vm2359_vm12, %v3964_v46, -inf }
0x18b3   : > { %v5947_v28 = vpop.f32.mrf.mxu1 }
0x18b4   : > { %v3970_v47 = vsel %vm2349_vm11, %v3956_v61, -inf }
0x18b5   : > { %3971 = vmax.xlane.f32.xlu1 %v3970_v47  ;;  %3974 = vmax.xlane.f32.xlu0 %v3973_v48  ;;  %v4185_v36 = vpop.f32.mrf.mxu1 }
0x18b7   : > { %v5948_v33 = vpop.f32.mrf.mxu1 }
0x18b9   : > { %3977 = vmax.xlane.f32.xlu1 %v3976_v51  ;;  %v4188_v45 = vpop.f32.mrf.mxu1 }
0x193a   : > { %v3969_v56 = vpop.xlane.xlu0 %3968 }
0x193b   : > { %v3979_v57 = vsub.f32 %v3953_v39, %v3969_v56 }
0x193d   : > { %v3983_v60 = vmul.f32 1.442695, %v3979_v57 }
0x193e   : > { %v3972_v2 = vpop.xlane.xlu1 %3971  ;;  %v3975_v4 = vpop.xlane.xlu0 %3974 }
0x193f   : > { %6255 = vpow2.f32 %v3983_v60  ;;  %v3980_v5 = vsub.f32 %v3956_v61, %v3972_v2  ;;  %v3981_v6 = vsub.f32 %v3961_v42, %v3975_v4 }
0x1941   : > { %v3985_v9 = vmul.f32 1.442695, %v3980_v5  ;;  %v3987_v7 = vmul.f32 1.442695, %v3981_v6 }
0x1942   : > { %v3978_v10 = vpop.xlane.xlu1 %3977 }
0x1943   : > { %6257 = vpow2.f32 %v3985_v9  ;;  %v3982_v11 = vsub.f32 %v3964_v46, %v3978_v10 }
0x1944   : > { %6259 = vpow2.f32 %v3987_v7 }
0x1945   : > { %v3989_v3 = vmul.f32 1.442695, %v3982_v11 }
0x1947   : > { %6261 = vpow2.f32 %v3989_v3 }
0x194c   : > { %v6256_v12 = vpop.eup %6255 }
0x194d   : > { %v3991_v14 = vsel %vm2349_vm11, %v6256_v12, 0.0 }
0x194e   : > { %3992 = vadd.xlane.f32.xlu0 %v3991_v14 }
0x1950   : > { %v6258_v8 = vpop.eup %6257 }
0x1951   : > { %v6260_v15 = vpop.eup %6259  ;;  %v3994_v16 = vsel %vm2349_vm11, %v6258_v8, 0.0 }
0x1952   : > { %3995 = vadd.xlane.f32.xlu1 %v3994_v16  ;;  %v3997_v58 = vsel %vm2349_vm11, %v6260_v15, 0.0 }
0x1953   : > { %3998 = vadd.xlane.f32.xlu0 %v3997_v58 }
0x1954   : > { %v6262_v13 = vpop.eup %6261 }
0x1955   : > { %v4000_v17 = vsel %vm2359_vm12, %v6262_v13, 0.0 }
0x1956   : > { %4001 = vadd.xlane.f32.xlu1 %v4000_v17 }
0x19d7   : > { %v3993_v18 = vpop.xlane.xlu0 %3992 }
0x19d8   : > { %6263 = vrcp.f32 %v3993_v18 }
0x19db   : > { %v3996_v19 = vpop.xlane.xlu1 %3995 }
0x19dc   : > { %6265 = vrcp.f32 %v3996_v19  ;;  %v3999_v62 = vpop.xlane.xlu0 %3998 }
0x19dd   : > { %6267 = vrcp.f32 %v3999_v62  ;;  %v6165_v62 = vld [vmem:[%s7235_s4 + $0x18] sm:$0xff]  }
0x19df   : > { %v4002_v20 = vpop.xlane.xlu1 %4001 }
0x19e0   : > { %6269 = vrcp.f32 %v4002_v20  ;;  %v6166_v20 = vld [vmem:[%s7235_s4 + $0x10] sm:$0xff]  }
0x19e5   : > { %v6264_v21 = vpop.eup %6263 }
0x19e6   : > { %v4007_v22 = vmul.f32 %v6264_v21, %v6256_v12 }
0x19e9   : > { %v6266_v59 = vpop.eup %6265 }
0x19ea   : > { %v4008_v23 = vmul.f32 %v6266_v59, %v6258_v8  ;;  %v6268_v63 = vpop.eup %6267 }
0x19eb   : > { %v4009_v26 = vmul.f32 %v6268_v63, %v6260_v15 }
0x19ec   : > { %v4011_v24 = vpack.c.bf16 %v4008_v23, %v4007_v22 }
0x19ed   : > { %v6270_v25 = vpop.eup %6269 }
0x19ee   : > { %5933 = vmatprep.mubr.msk.bf16.mxu0 %vm2349_vm11, %v4011_v24  ;;  %v4010_v29 = vmul.f32 %v6270_v25, %v6262_v13 }
0x19f0   : > { %v4012_v30 = vpack.c.bf16 %v4010_v29, %v4009_v26 }
0x19f2   : > { %5934 = vmatmul.mubr.msk.bf16.vlgmr.msra.gmra.mxu0 %vm2349_vm11, %v4012_v30 }
0x19f3   : > { %5938 = vmatpush3.bf16.msra.mxu0 %v6164_v32 }
0x19f4   : > { %5949 = vmatprep.subr.bf16.mxu0 %v6165_v62 }
0x1ab2   : > { %v5935_v31 = vpop.f32.mrf.mxu0 }
0x1ab4   : > { %v4058_v34 = vpop.f32.mrf.mxu0 }
0x1ab6   : > { %v5936_v52 = vpop.f32.mrf.mxu0 }
0x1ab7   : > { %v4074_v1 = vpack.c.bf16 %v5936_v52, %v5935_v31 }
0x1ab8   : > { %v4061_v55 = vpop.f32.mrf.mxu0 }
0x1ab9   : > { %v4073_v27 = vpack.c.bf16 %v4061_v55, %v4058_v34  ;;  %v5390_v55 = vld [vmem:[%s7236_s5 + $0x1] ss:$0 sm:$0xff] }
0x1abb   : > { %5939 = vmatprep.mubr.msk.bf16.mxu0 %vm1172_vm4, %v4073_v27 }
0x1abc   : > { %5940 = vmatmul.mubr.msk.bf16.vlgmr.msra.gmra.mxu0 %vm1172_vm4, %v4074_v1 }
0x1abd   : > { %5950 = vmatpush3.bf16.msra.mxu0 %v6165_v62 }
0x1abe   : > { %5951 = vmatprep.subr.bf16.mxu0 %v6166_v20 }
0x1ac1   : > { %5952 = vmatpush3.bf16.msra.mxu0 %v6166_v20 }
0x1b7c   : > { %v5941_v37 = vpop.f32.mrf.mxu0 }
0x1b7d   : > { %v4194_v38 = vadd.f32 %v5947_v28, %v5941_v37 }
0x1b7e   : > { %v4124_v39 = vpop.f32.mrf.mxu0 }
0x1b7f   : > { %v4186_v40 = vadd.f32 %v4185_v36, %v4124_v39  ;;  %v4210_v42 = vadd.f32 %v5387_v35, %v4194_v38  ;;  %v5391_v38 = vld [vmem:[%s7237_s6 + $0x1] ss:$0 sm:$0xff]  ;;  %s5455_s6 = sshll.u32 %s6601_s0, 8  ;;  %s6397_s0 = smov [#allocation2]  }
0x1b80   : > { %v5942_v41 = vpop.f32.mrf.mxu0  ;;  %s6303_s11 = sshll.u32 %s6397_s0, 4  ;;  %s6304_s11 = int_to_ptr.vmem [resolvable:$false] %s6303_s11 }
0x1b81   : > { %v4208_v43 = vadd.f32 %v5387_v35, %v4186_v40  ;;  %v4197_v44 = vadd.f32 %v5948_v33, %v5942_v41  ;;  %v4214_v56 = vadd.f32 %v4210_v42, %v6946_v53 }
0x1b82   : > { %v4127_v61 = vpop.f32.mrf.mxu0 }
0x1b83   : > { %v4189_v0 = vadd.f32 %v4188_v45, %v4127_v61  ;;  %v4212_v46 = vadd.f32 %v4208_v43, %v6934_v49  ;;  %v4211_v47 = vadd.f32 %v5387_v35, %v4197_v44  ;;  %v4226_v2 = vsel %vm1121_vm3, %v4214_v56, 0.0 }
0x1b85   : > { %v4209_v48 = vadd.f32 %v5387_v35, %v4189_v0  ;;  %v4220_v51 = vsel %vm1121_vm3, %v4212_v46, 0.0  ;;  %v4215_v4 = vadd.f32 %v4211_v47, %v6948_v54  ;;  %v6168_v47 = vld [vmem:[%s7238_s8 + $0x30] sm:$0xff]  }
0x1b86   : > { %4221 = vadd.xlane.f32.xlu0 %v4220_v51  ;;  %v6170_v51 = vld [vmem:[%s7238_s8 + $0x20] sm:$0xff]  }
0x1b87   : > { %v4213_v57 = vadd.f32 %v4209_v48, %v6936_v50  ;;  %v4229_v5 = vsel %vm2012_vm9, %v4215_v4, 0.0  ;;  %v6169_v48 = vld [vmem:[%s7238_s8 + $0x28] sm:$0xff]  }
0x1b89   : > { %v4223_v60 = vsel %vm1121_vm3, %v4213_v57, 0.0 }
0x1b8a   : > { %4224 = vadd.xlane.f32.xlu1 %v4223_v60  ;;  %4227 = vadd.xlane.f32.xlu0 %v4226_v2 }
0x1b8e   : > { %4230 = vadd.xlane.f32.xlu1 %v4229_v5 }
0x1c0f   : > { %v4222_v49 = vpop.xlane.xlu0 %4221 }
0x1c10   : > { %v4232_v6 = vmul.f32 0.03125, %v4222_v49 }
0x1c12   : > { %v4236_v9 = vsub.f32 %v4212_v46, %v4232_v6  ;;  %v6167_v46 = vld [vmem:[%s7238_s8 + $0x38] sm:$0xff]   ;;  %s7121_s8 = scalar_lea.hbm %s6578_s24, %s5455_s6 }
0x1c13   : > { %v4225_v7 = vpop.xlane.xlu1 %4224  ;;  %v4228_v10 = vpop.xlane.xlu0 %4227  ;;  %5957 = vmatprep.subr.bf16.mxu1 %v6167_v46 }
0x1c14   : > { %v4233_v53 = vmul.f32 0.03125, %v4225_v7  ;;  %v4234_v11 = vmul.f32 0.03125, %v4228_v10  ;;  %v4240_v3 = vmul.f32 %v4236_v9, %v4236_v9  ;;  %5958 = vmatpush3.bf16.msra.mxu1 %v6167_v46 }
0x1c15   : > { %5959 = vmatprep.subr.bf16.mxu1 %v6168_v47 }
0x1c16   : > { %v4237_v50 = vsub.f32 %v4213_v57, %v4233_v53  ;;  %v4238_v12 = vsub.f32 %v4214_v56, %v4234_v11  ;;  %v4244_v14 = vsel %vm1121_vm3, %v4240_v3, 0.0  ;;  %v5397_v56 = vld [vmem:[%s7239_s9 + $0x1] ss:$0 sm:$0xff] }
0x1c17   : > { %v4231_v54 = vpop.xlane.xlu1 %4230  ;;  %4245 = vadd.xlane.f32.xlu0 %v4244_v14 }
0x1c18   : > { %v4235_v8 = vmul.f32 0.03125, %v4231_v54  ;;  %v4241_v15 = vmul.f32 %v4237_v50, %v4237_v50  ;;  %v4242_v16 = vmul.f32 %v4238_v12, %v4238_v12  ;;  %5960 = vmatpush3.bf16.msra.mxu1 %v6168_v47 }
0x1c19   : > { %5961 = vmatprep.subr.bf16.mxu1 %v6169_v48 }
0x1c1a   : > { %v4239_v58 = vsub.f32 %v4215_v4, %v4235_v8  ;;  %v4247_v13 = vsel %vm1121_vm3, %v4241_v15, 0.0  ;;  %v4250_v17 = vsel %vm1121_vm3, %v4242_v16, 0.0 }
0x1c1b   : > { %4248 = vadd.xlane.f32.xlu1 %v4247_v13  ;;  %4251 = vadd.xlane.f32.xlu0 %v4250_v17 }
0x1c1c   : > { %v4243_v18 = vmul.f32 %v4239_v58, %v4239_v58  ;;  %5962 = vmatpush3.bf16.msra.mxu1 %v6169_v48 }
0x1c1d   : > { %5963 = vmatprep.subr.bf16.mxu1 %v6170_v51 }
0x1c1e   : > { %v4253_v19 = vsel %vm2012_vm9, %v4243_v18, 0.0 }
0x1c1f   : > { %4254 = vadd.xlane.f32.xlu1 %v4253_v19 }
0x1c20   : > { %5964 = vmatpush3.bf16.msra.mxu1 %v6170_v51 }
0x1ca0   : > { %v4246_v21 = vpop.xlane.xlu0 %4245 }
0x1ca1   : > { %v4256_v59 = vmul.f32 0.03125, %v4246_v21 }
0x1ca3   : > { %v4260_v22 = vadd.f32 1e-06, %v4256_v59 }
0x1ca4   : > { %v4249_v23 = vpop.xlane.xlu1 %4248  ;;  %v4252_v63 = vpop.xlane.xlu0 %4251 }
0x1ca5   : > { %6271 = vrsqrt.f32 %v4260_v22  ;;  %v4257_v24 = vmul.f32 0.03125, %v4249_v23  ;;  %v4258_v25 = vmul.f32 0.03125, %v4252_v63  ;;  %v5411_v23 = vld [vmem:[%s7240_s12 + $0x1] ss:$0 sm:$0xff]  ;;  %s6305_s12 = scalar_lea.vmem %s6304_s11, 512 }
0x1ca7   : > { %v4261_v26 = vadd.f32 1e-06, %v4257_v24  ;;  %v4262_v29 = vadd.f32 1e-06, %v4258_v25 }
0x1ca8   : > { %v4255_v30 = vpop.xlane.xlu1 %4254 }
0x1ca9   : > { %6273 = vrsqrt.f32 %v4261_v26  ;;  %v4259_v32 = vmul.f32 0.03125, %v4255_v30 }
0x1caa   : > { %6275 = vrsqrt.f32 %v4262_v29 }
0x1cab   : > { %v4263_v31 = vadd.f32 1e-06, %v4259_v32 }
0x1cad   : > { %6277 = vrsqrt.f32 %v4263_v31 }
0x1cb2   : > { %v6272_v34 = vpop.eup %6271 }
0x1cb3   : > { %v4268_v52 = vmul.f32 %v6272_v34, %v4236_v9 }
0x1cb5   : > { %v4278_v36 = vmul.f32 %v5390_v55, %v4268_v52 }
0x1cb6   : > { %v6274_v27 = vpop.eup %6273 }
0x1cb7   : > { %v6276_v1 = vpop.eup %6275  ;;  %v4269_v28 = vmul.f32 %v6274_v27, %v4237_v50  ;;  %v7048_v40 = vadd.f32 %v5391_v38, %v4278_v36 }
0x1cb8   : > { %v4270_v37 = vmul.f32 %v6276_v1, %v4238_v12 }
0x1cb9   : > { %v4279_v33 = vmul.f32 %v5390_v55, %v4269_v28 }
0x1cba   : > { %v6278_v35 = vpop.eup %6277  ;;  %v4280_v42 = vmul.f32 %v5390_v55, %v4270_v37 }
0x1cbb   : > { %v4271_v39 = vmul.f32 %v6278_v35, %v4239_v58  ;;  %v7050_v41 = vadd.f32 %v5391_v38, %v4279_v33 }
0x1cbc   : > { %v4290_v45 = vadd.f32 %v5391_v38, %v4280_v42 }
0x1cbd   : > { %v4292_v43 = vpack.c.bf16 %v7050_v41, %v7048_v40  ;;  %v4281_v44 = vmul.f32 %v5390_v55, %v4271_v39 }
0x1cbf   : > { %5953 = vmatprep.mubr.msk.bf16.mxu0 %vm1121_vm3, %v4292_v43  ;;  %v7055_v61 = vadd.f32 %v5391_v38, %v4281_v44 }
0x1cc1   : > { %v4293_v0 = vpack.c.bf16 %v7055_v61, %v4290_v45 }
0x1cc3   : > { %5954 = vmatmul.mubr.msk.bf16.vlgmr.msra.gmra.mxu0 %vm1121_vm3, %v4293_v0 }
0x1d83   : > { %v5955_v57 = vpop.f32.mrf.mxu0 }
0x1d84   : > { %v4368_v60 = vadd.f32 %v5955_v57, %v5397_v56 }
0x1d85   : > { %v4359_v2 = vpop.f32.mrf.mxu0 }
0x1d86   : > { %v4360_v4 = vadd.f32 %v5397_v56, %v4359_v2  ;;  %v4380_v5 = vmul.f32 0.70710677, %v4368_v60  ;;  %v4376_v18 = vmul.f32 0.5, %v4368_v60 }
0x1d87   : > { %v5956_v49 = vpop.f32.mrf.mxu0 }
0x1d88   : > { %v4378_v6 = vmul.f32 0.70710677, %v4360_v4  ;;  %v4371_v9 = vadd.f32 %v5956_v49, %v5397_v56  ;;  %v4374_v58 = vmul.f32 0.5, %v4360_v4  ;;  %v5433_v4 = vld [vmem:[%s7243_s1 + $0x38] sm:$0xff]  ;;  %v5431_v49 = vld [vmem:[%s7243_s1 + $0x28] sm:$0xff] }
0x1d89   : > { %v4362_v7 = vpop.f32.mrf.mxu0  ;;  %5991 = vmatprep.subr.mxu1 %v5433_v4 }
0x1d8a   : > { %6279 = verf.f32 %v4378_v6  ;;  %v4381_v10 = vmul.f32 0.70710677, %v4371_v9  ;;  %v4363_v53 = vadd.f32 %v5397_v56, %v4362_v7  ;;  %v4377_v16 = vmul.f32 0.5, %v4371_v9  ;;  %v5430_v6 = vld [vmem:[%s7243_s1 + $0x20] sm:$0xff] }
0x1d8b   : > { %6281 = verf.f32 %v4380_v5  ;;  %v5432_v5 = vld [vmem:[%s7243_s1 + $0x30] sm:$0xff]  ;;  %v4572_v9 = vld [vmem:[%s7244_s3] sm:$0xff] }
0x1d8c   : > { %6283 = verf.f32 %v4381_v10  ;;  %v4379_v11 = vmul.f32 0.70710677, %v4363_v53  ;;  %v4375_v13 = vmul.f32 0.5, %v4363_v53  ;;  %5977 = vmatprep.mubr.msk.f32.mxu0 %vm2349_vm11, %v4572_v9 }
0x1d8e   : > { %6285 = verf.f32 %v4379_v11 }
0x1d97   : > { %v6280_v3 = vpop.eup %6279 }
0x1d98   : > { %v6282_v50 = vpop.eup %6281  ;;  %v4386_v14 = vadd.f32 1.0, %v6280_v3 }
0x1d99   : > { %v6284_v12 = vpop.eup %6283  ;;  %v4388_v15 = vadd.f32 1.0, %v6282_v50 }
0x1d9a   : > { %v4389_v54 = vadd.f32 1.0, %v6284_v12  ;;  %v4390_v62 = vmul.f32 %v4386_v14, %v4374_v58 }
0x1d9b   : > { %v6286_v8 = vpop.eup %6285  ;;  %v4392_v21 = vmul.f32 %v4388_v15, %v4376_v18  ;;  %v5420_v18 = vld [vmem:[%s7241_s13 + $0x1] ss:$0 sm:$0xff] }
0x1d9c   : > { %v4387_v17 = vadd.f32 1.0, %v6286_v8  ;;  %v4393_v19 = vmul.f32 %v4389_v54, %v4377_v16 }
0x1d9e   : > { %v4391_v20 = vmul.f32 %v4387_v17, %v4375_v13  ;;  %v4395_v22 = vpack.c.bf16 %v4393_v19, %v4392_v21 }
0x1da0   : > { %v4394_v59 = vpack.c.bf16 %v4391_v20, %v4390_v62 }
0x1da2   : > { %5965 = vmatprep.mubr.msk.bf16.mxu1 %vm3188_vm13, %v4394_v59 }
0x1da3   : > { %5966 = vmatmul.mubr.msk.bf16.vlgmr.msra.gmra.mxu1 %vm3188_vm13, %v4395_v22 }
0x1da4   : > { %5992 = vmatpush3.msra.mxu1 %v5433_v4 }
0x1da5   : > { %5993 = vmatprep.subr.mxu1 %v5432_v5 }
0x1da6   : > { %5994 = vmatpush3.msra.mxu1 %v5432_v5 }
0x1da7   : > { %5995 = vmatprep.subr.mxu1 %v5431_v49 }
0x1da8   : > { %5996 = vmatpush3.msra.mxu1 %v5431_v49 }
0x1da9   : > { %5997 = vmatprep.subr.mxu1 %v5430_v6 }
0x1daa   : > { %5998 = vmatpush3.msra.mxu1 %v5430_v6 }
0x1e63   : > { %v5967_v63 = vpop.f32.mrf.mxu1 }
0x1e64   : > { %v4486_v24 = vadd.f32 %v5967_v63, %v5411_v23 }
0x1e65   : > { %v4477_v25 = vpop.f32.mrf.mxu1 }
0x1e66   : > { %v4478_v26 = vadd.f32 %v5411_v23, %v4477_v25  ;;  %v4494_v29 = vadd.f32 %v4486_v24, %v4290_v45 }
0x1e67   : > { %v5968_v30 = vpop.f32.mrf.mxu1 }
0x1e68   : > { %v4489_v32 = vadd.f32 %v5968_v30, %v5411_v23  ;;  %v4506_v31 = vsel %vm1121_vm3, %v4494_v29, 0.0  ;;  %v4492_v34 = vadd.f32 %v4478_v26, %v7048_v40 }
0x1e69   : > { %4507 = vadd.xlane.f32.xlu1 %v4506_v31  ;;  %v4480_v52 = vpop.f32.mrf.mxu1  ;;  %v4573_v31 = vld [vmem:[%s7244_s3 + $0x8] sm:$0xff] }
0x1e6a   : > { %v4481_v55 = vadd.f32 %v5411_v23, %v4480_v52  ;;  %v4495_v27 = vadd.f32 %v4489_v32, %v7055_v61  ;;  %v4500_v28 = vsel %vm1121_vm3, %v4492_v34, 0.0  ;;  %v5421_v23 = vld [vmem:[%s7242_s14 + $0x1] ss:$0 sm:$0xff]  ;;  %v5426_v52 = vld [vmem:[%s7244_s3 + $0x18] sm:$0xff] }
0x1e6c   : > { %v4509_v1 = vsel %vm2012_vm9, %v4495_v27, 0.0  ;;  %v4493_v36 = vadd.f32 %v4481_v55, %v7050_v41  ;;  %v4661_v55 = vld [vmem:[%s7243_s1 + $0x18] sm:$0xff] }
0x1e6d   : > { %4510 = vadd.xlane.f32.xlu0 %v4509_v1  ;;  %4501 = vadd.xlane.f32.xlu1 %v4500_v28  ;;  %v4659_v1 = vld [vmem:[%s7243_s1 + $0x8] sm:$0xff]  ;;  %v4658_v28 = vld [vmem:[%s7243_s1] sm:$0xff] }
0x1e6e   : > { %v4503_v37 = vsel %vm1121_vm3, %v4493_v36, 0.0 }
0x1e71   : > { %4504 = vadd.xlane.f32.xlu0 %v4503_v37 }
0x1ef2   : > { %v4508_v38 = vpop.xlane.xlu1 %4507 }
0x1ef3   : > { %v4514_v33 = vmul.f32 0.03125, %v4508_v38 }
0x1ef5   : > { %v4518_v35 = vsub.f32 %v4494_v29, %v4514_v33 }
0x1ef6   : > { %v4511_v39 = vpop.xlane.xlu0 %4510  ;;  %v4502_v40 = vpop.xlane.xlu1 %4501 }
0x1ef7   : > { %v4515_v42 = vmul.f32 0.03125, %v4511_v39  ;;  %v4512_v43 = vmul.f32 0.03125, %v4502_v40  ;;  %v4522_v44 = vmul.f32 %v4518_v35, %v4518_v35  ;;  %v5439_v39 = vld [vmem:[%s7244_s3 + $0x28] sm:$0xff]  ;;  %v5446_v40 = vld [vmem:[%s7243_s1 + $0x58] sm:$0xff] }
0x1ef9   : > { %v4519_v45 = vsub.f32 %v4495_v27, %v4515_v42  ;;  %v4516_v61 = vsub.f32 %v4492_v34, %v4512_v43  ;;  %v4530_v0 = vsel %vm1121_vm3, %v4522_v44, 0.0  ;;  %v5425_v34 = vld [vmem:[%s7244_s3 + $0x10] sm:$0xff]  ;;  %v5444_v43 = vld [vmem:[%s7243_s1 + $0x48] sm:$0xff]  ;;  %v5443_v44 = vld [vmem:[%s7243_s1 + $0x40] sm:$0xff] }
0x1efa   : > { %v4505_v46 = vpop.xlane.xlu0 %4504  ;;  %4531 = vadd.xlane.f32.xlu1 %v4530_v0  ;;  %v4660_v27 = vld [vmem:[%s7243_s1 + $0x10] sm:$0xff] }
0x1efb   : > { %v4513_v41 = vmul.f32 0.03125, %v4505_v46  ;;  %v4523_v47 = vmul.f32 %v4519_v45, %v4519_v45  ;;  %v4520_v48 = vmul.f32 %v4516_v61, %v4516_v61  ;;  %v5445_v42 = vld [vmem:[%s7243_s1 + $0x50] sm:$0xff] }
0x1efd   : > { %v4517_v51 = vsub.f32 %v4493_v36, %v4513_v41  ;;  %v4533_v56 = vsel %vm2012_vm9, %v4523_v47, 0.0  ;;  %v4524_v57 = vsel %vm1121_vm3, %v4520_v48, 0.0 }
0x1efe   : > { %4534 = vadd.xlane.f32.xlu0 %v4533_v56  ;;  %4525 = vadd.xlane.f32.xlu1 %v4524_v57 }
0x1eff   : > { %v4521_v60 = vmul.f32 %v4517_v51, %v4517_v51 }
0x1f01   : > { %v4527_v2 = vsel %vm1121_vm3, %v4521_v60, 0.0 }
0x1f02   : > { %4528 = vadd.xlane.f32.xlu0 %v4527_v2 }
0x1f83   : > { %v4532_v7 = vpop.xlane.xlu1 %4531 }
0x1f84   : > { %v4538_v10 = vmul.f32 0.03125, %v4532_v7 }
0x1f86   : > { %v4542_v53 = vadd.f32 1e-06, %v4538_v10 }
0x1f87   : > { %v4535_v11 = vpop.xlane.xlu0 %4534  ;;  %v4526_v3 = vpop.xlane.xlu1 %4525 }
0x1f88   : > { %6287 = vrsqrt.f32 %v4542_v53  ;;  %v4539_v50 = vmul.f32 0.03125, %v4535_v11  ;;  %v4536_v12 = vmul.f32 0.03125, %v4526_v3 }
0x1f8a   : > { %v4543_v14 = vadd.f32 1e-06, %v4539_v50  ;;  %v4540_v54 = vadd.f32 1e-06, %v4536_v12 }
0x1f8b   : > { %v4529_v8 = vpop.xlane.xlu0 %4528 }
0x1f8c   : > { %6289 = vrsqrt.f32 %v4543_v14  ;;  %v4537_v15 = vmul.f32 0.03125, %v4529_v8 }
0x1f8d   : > { %6291 = vrsqrt.f32 %v4540_v54 }
0x1f8e   : > { %v4541_v16 = vadd.f32 1e-06, %v4537_v15 }
0x1f90   : > { %6293 = vrsqrt.f32 %v4541_v16 }
0x1f95   : > { %v6288_v58 = vpop.eup %6287 }
0x1f96   : > { %v4550_v13 = vmul.f32 %v6288_v58, %v4518_v35  ;;  %v5438_v35 = vld [vmem:[%s7244_s3 + $0x20] sm:$0xff]  ;;  %s1033_s3 = sand.u32 1, %s6351_s16  }
0x1f97   : > { %s5202_s4 = sshll.u32 %s1033_s3, 4  ;;  %s7123_s9 = scalar_lea.sflag [#allocation3], %s1033_s3 }
0x1f98   : > { %v4560_v20 = vmul.f32 %v5420_v18, %v4550_v13  ;;  %s1035_s5 = scalar_lea.vmem [#allocation2], %s5202_s4 }
0x1f99   : > { %v6290_v17 = vpop.eup %6289  ;;  %s5102_s1 = sshll.u32 %s1035_s5, 4  ;;  %s7118_s1 = int_to_ptr.vmem [resolvable:$true] %s5102_s1 }
0x1f9a   : > { %v6292_v19 = vpop.eup %6291  ;;  %v4551_v62 = vmul.f32 %v6290_v17, %v4519_v45  ;;  %v4570_v29 = vadd.f32 %v5421_v23, %v4560_v20  ;;  %s6299_s4 = scalar_lea.vmem %s7118_s1, 256  ;;  %p6306_p0 = scmp.lt.s32.totalorder %s7118_s1, %s6304_s11 }
0x1f9b   : > { %v4548_v59 = vmul.f32 %v6292_v19, %v4516_v61  ;;  %p6300_p11 = scmp.ne.s32.totalorder %s7118_s1, %s6299_s4  ;;  %p6307_p1 = scmp.lt.s32.totalorder %s6305_s12, %s6299_s4 }
0x1f9c   : > { %v4561_v21 = vmul.f32 %v5420_v18, %v4551_v62 }
0x1f9d   : > { %v6294_v22 = vpop.eup %6293  ;;  %v4558_v25 = vmul.f32 %v5420_v18, %v4548_v59  ;;  %p6301_p12 = pnand %p6300_p11, %p6618_p5  ;;  %p6308_p2 = por %p6307_p1, %p6306_p0 }
0x1f9e   : > { %v4549_v63 = vmul.f32 %v6294_v22, %v4517_v51  ;;  %v4571_v24 = vadd.f32 %v5421_v23, %v4561_v21 }
0x1f9f   : > { %v4568_v32 = vadd.f32 %v5421_v23, %v4558_v25  ;;  %p6302_p13 = pneg %p6301_p12 }
0x1fa0   : > { %v4559_v26 = vmul.f32 %v5420_v18, %v4549_v63  ;;  %5969 = vmatprep.subr.msk.mxu0 %vm1642_vm6, %v4571_v24  ;;  %6013 = vmatprep.subr.msk.mxu1 %vm1642_vm6, %v4571_v24 }
0x1fa1   : > { %5970 = vmatpush3.msk.msra.mxu0 %vm1642_vm6, %v4571_v24  ;;  %p6309_p3 = pnand %p6308_p2, %p6302_p13 }
0x1fa2   : > { %5971 = vmatprep.subr.mxu0 %v4570_v29  ;;  %v4569_v30 = vadd.f32 %v5421_v23, %v4559_v26 }
0x1fa3   : > { %5972 = vmatpush3.msra.mxu0 %v4570_v29 }
0x1fa4   : > { %5973 = vmatprep.subr.mxu0 %v4569_v30 }
0x1fa5   : > { %5974 = vmatpush3.msra.mxu0 %v4569_v30 }
0x1fa6   : > { %5975 = vmatprep.subr.mxu0 %v4568_v32 }
0x1fa7   : > { %5976 = vmatpush3.msra.mxu0 %v4568_v32 }
0x1fa8   : > { %5980 = vmatprep.subr.msk.mxu0 %vm1642_vm6, %v4571_v24  ;;  %5978 = vmatmul.mubr.msk.f32.vlgmr.msra.gmra.mxu0 %vm2349_vm11, %v4573_v31 }
0x1fa9   : > { %5981 = vmatpush3.msk.msra.mxu0 %vm1642_vm6, %v4571_v24  ;;  %5988 = vmatprep.mubr.msk.f32.mxu0 %vm2349_vm11, %v5425_v34 }
0x1faa   : > { %5982 = vmatprep.subr.mxu0 %v4570_v29 }
0x1fab   : > { %5983 = vmatpush3.msra.mxu0 %v4570_v29 }
0x1fac   : > { %5984 = vmatprep.subr.mxu0 %v4569_v30 }
0x1fad   : > { %5985 = vmatpush3.msra.mxu0 %v4569_v30 }
0x1fae   : > { %5986 = vmatprep.subr.mxu0 %v4568_v32 }
0x1faf   : > { %5987 = vmatpush3.msra.mxu0 %v4568_v32 }
0x1fb0   : > { %5989 = vmatmul.mubr.msk.f32.vlgmr.msra.gmra.mxu0 %vm2349_vm11, %v5426_v52  ;;  %6002 = vmatprep.subr.mxu0 %v4661_v55 }
0x1fb1   : > { %6003 = vmatpush3.msra.mxu0 %v4661_v55 }
0x1fb2   : > { %6004 = vmatprep.subr.mxu0 %v4660_v27 }
0x1fb3   : > { %6005 = vmatpush3.msra.mxu0 %v4660_v27 }
0x1fb4   : > { %6006 = vmatprep.subr.mxu0 %v4659_v1 }
0x1fb5   : > { %6007 = vmatpush3.msra.mxu0 %v4659_v1 }
0x1fb6   : > { %6008 = vmatprep.subr.mxu0 %v4658_v28 }
0x1fb7   : > { %6009 = vmatpush3.msra.mxu0 %v4658_v28 }
0x1fb8   : > { %6024 = vmatprep.subr.mxu0 %v5446_v40 }
0x2068   : > { %v5979_v36 = vpop.f32.mrf.mxu0 }
0x206a   : > { %v4649_v37 = vpop.f32.mrf.mxu0 }
0x206b   : > { %6010 = vmatprep.mubr.msk.f32.mxu0 %vm1121_vm3, %v4649_v37 }
0x206c   : > { %6011 = vmatmul.mubr.msk.f32.vlgmr.msra.gmra.mxu0 %vm1121_vm3, %v5979_v36 }
0x206d   : > { %6025 = vmatpush3.msra.mxu0 %v5446_v40 }
0x206e   : > { %6026 = vmatprep.subr.mxu0 %v5445_v42 }
0x206f   : > { %6027 = vmatpush3.msra.mxu0 %v5445_v42 }
0x2070   : > { %v5990_v38 = vpop.f32.mrf.mxu0  ;;  %6028 = vmatprep.subr.mxu0 %v5444_v43 }
0x2071   : > { %6029 = vmatpush3.msra.mxu0 %v5444_v43 }
0x2072   : > { %v4737_v33 = vpop.f32.mrf.mxu0  ;;  %6030 = vmatprep.subr.mxu0 %v5443_v44 }
0x2073   : > { %5999 = vmatprep.mubr.msk.f32.mxu1 %vm1121_vm3, %v4737_v33  ;;  %6031 = vmatpush3.msra.mxu0 %v5443_v44 }
0x2074   : > { %6000 = vmatmul.mubr.msk.f32.vlgmr.msra.gmra.mxu1 %vm1121_vm3, %v5990_v38 }
0x2075   : > { %6014 = vmatpush3.msk.msra.mxu1 %vm1642_vm6, %v4571_v24  ;;  %6021 = vmatprep.mubr.msk.f32.mxu1 %vm2349_vm11, %v5438_v35 }
0x2076   : > { %6015 = vmatprep.subr.mxu1 %v4570_v29 }
0x2077   : > { %6016 = vmatpush3.msra.mxu1 %v4570_v29 }
0x2078   : > { %6017 = vmatprep.subr.mxu1 %v4569_v30 }
0x2079   : > { %6018 = vmatpush3.msra.mxu1 %v4569_v30 }
0x207a   : > { %6019 = vmatprep.subr.mxu1 %v4568_v32 }
0x207b   : > { %6020 = vmatpush3.msra.mxu1 %v4568_v32 }
0x207c   : > { %6022 = vmatmul.mubr.msk.f32.vlgmr.msra.gmra.mxu1 %vm2349_vm11, %v5439_v39 }
0x212c   : > { %v6012_v41 = vpop.f32.mrf.mxu0 }
0x212e   : > { %v4904_v47 = vpop.f32.mrf.mxu0 }
0x2134   : > { %v6001_v45 = vpop.f32.mrf.mxu1 }
0x2135   : > { %v4910_v48 = vadd.f32 %v6012_v41, %v6001_v45 }
0x2136   : > { %v4823_v61 = vpop.f32.mrf.mxu1 }
0x2137   : > { %v4905_v56 = vadd.f32 %v4904_v47, %v4823_v61 }
0x213c   : > { %v6023_v0 = vpop.f32.mrf.mxu1 }
0x213e   : > { %v4988_v46 = vpop.f32.mrf.mxu1 }
0x213f   : > { %6032 = vmatprep.mubr.msk.f32.mxu0 %vm1121_vm3, %v4988_v46 }
0x2140   : > { %6033 = vmatmul.mubr.msk.f32.vlgmr.msra.gmra.mxu0 %vm1121_vm3, %v6023_v0 }
0x2200   : > { %v6034_v51 = vpop.f32.mrf.mxu0 }
0x2201   : > { %v5084_v57 = vadd.f32 %v6034_v51, %v4910_v48 }
0x2202   : > { %v5074_v60 = vpop.f32.mrf.mxu0 }
0x2203   : > { %5087 = vst.msk [vmem:[%s1035_s5 + $0x8] sm:$0xff] %vm5085_vm14, %v5084_v57  ;;  %v5083_v2 = vadd.f32 %v5074_v60, %v4905_v56 }
0x2205   : > { %5086 = vst.msk [vmem:[%s1035_s5] sm:$0xff] %vm5085_vm14, %v5083_v2 }
0x2206   : > { %6312 = shalt.err (!%p6309_p3)
}
0x2207   : > { %s6313_s5 = scalar_lea.hbm %s7121_s8, 256  ;;  %s6317_s3 = scalar_lea.hbm %s6578_s24, 512 }
0x2208   : > { %p6314_p4 = scmp.ne.s32.totalorder %s7121_s8, %s6313_s5  ;;  %p6318_p9 = scmp.lt.s32.totalorder %s7121_s8, %s6578_s24 }
0x2209   : > { %p6319_p10 = scmp.lt.s32.totalorder %s6317_s3, %s6313_s5 }
0x220a   : > { %p6315_p7 = pnand %p6314_p4, %p6618_p5 }
0x220b   : > { %p6320_p11 = por %p6319_p10, %p6318_p9 }
0x220c   : > { %p6316_p8 = pneg %p6315_p7 }
0x220e   : > { %p6321_p12 = pnand %p6320_p11, %p6316_p8 }
0x2210   : > { %6324 = shalt.err (!%p6321_p12)
}
0x2211   : > { %s6398_s6 = smov 128   ;;  %s6399_s12 = smov 8  }
0x2212   : > { %6047 = dma.vmem_to_hbm [thread:$0]  (%p6618_p5), %s7118_s1, 256, %s7121_s8, %s7123_s9, %s6398_s6, %s6398_s6, %s6399_s12  }
0x2213 PF: > { %p6053_p13 = scmp.ge.s32.totalorder %s6359_s22, 2  ;;  %s5117_s11 = sand.u32 1, %s6347_s15  }
0x2214   : > { %s5118_s4 = scalar_lea.sflag [#allocation3], %s5117_s11 }
0x2215   : > { %p6050_p0 = pnand %p6053_p13, %p6622_p6 }
0x2217   : > { %p6051_p1 = pneg %p6050_p0 }
0x2219   : > { %6342 = dma.done.wait (%p6051_p1), %s5118_s4, 256  }
0x221a   : > { %6344 = vsyncadd (%p6051_p1), %s5118_s4, 4294967040  ;;  %p79_p2 = scmp.ge.s32.totalorder %s6605_s26, 4   ;;  %s7245_s15 = smov %s6351_s16 }
0x221b   : > { %s7246_s16 = smov %s6355_s18  ;;  %s7247_s18 = smov %s6616_s2 }
0x221c   : > { %s7248_s22 = smov %s6605_s26  ;;  %81 = sbr.rel (!%p79_p2) target bundleno = 68 (0x44), region = 254 }
0x2221   :  { %5123 = vsyncpa [#allocation3], 1 }
0x2222   :  { %5125 = vsyncpa [#allocation3 + $0x1], 1 }

</bundles_post_ra>
